<compile_context>
chip_gen: v6e
topology: v6e:2x2x1
jax: 0.10.0
libtpu: 0.0.40
codegen_flags: <defaults>
</compile_context>

<pallas_src>
import jax
import jax.numpy as jnp
import numpy as np
from jax.experimental import pallas as pl
from jax.experimental.pallas import tpu as pltpu

BN_EPS = 1e-5
KSIZE = 5
STRIDE = 2
MXU_DTYPE = jnp.bfloat16   # bf16 MXU feed (f32 accumulate); jnp.float32 for exact


def _conv_size(s, k=KSIZE, stride=STRIDE):
    return (s - (k - 1) - 1) // stride + 1


def _pad_to(v, m):
    return ((v + m - 1) // m) * m


# ---------------------------------------------------------------------------
# Fused kernel: 3 x (conv + BN + ReLU) + linear head, all resident in VMEM.
# ---------------------------------------------------------------------------
def _make_fused_kernel(bn_counts, n_head_taps):
    m1, m2, m3 = (float(c) for c in bn_counts)

    def conv_bn_relu(a, u_ref, s_ref, p_ref, pt_ref, g_ref, b_ref, m_count):
        # a: (R_in_p, L_in_p) f32 activations; padded lanes are exactly zero,
        #    padded rows may be garbage (the selection matrices never pick them).
        a_lo = a.astype(u_ref.dtype)
        # [R1] gather the stride-2 rows of each vertical tap FIRST (cheap,
        # contraction over R_in only), [R2] selection matrices are exact bf16.
        taps = [jnp.dot(s_ref[i], a_lo, preferred_element_type=jnp.float32)
                for i in range(s_ref.shape[0])]
        # [R4] one long-K MXU matmul: (R_out_p, k*L_in_p) @ (k*L_in_p, L_out_p).
        g = jnp.concatenate(taps, axis=1).astype(u_ref.dtype)   # exact re-cast
        o = jnp.dot(g, u_ref[...], preferred_element_type=jnp.float32)

        # [R3] BatchNorm batch statistics: sublane reductions on VPU/XLU, only
        # the tiny lane->channel folds touch the MXU.  Padded rows/lanes of o
        # are exactly zero, so summing the full tile is exact.
        lane_sum = jnp.sum(o, axis=0, keepdims=True)
        lane_ssq = jnp.sum(o * o, axis=0, keepdims=True)
        ch_sum = jnp.dot(lane_sum, p_ref[...], preferred_element_type=jnp.float32)
        ch_ssq = jnp.dot(lane_ssq, p_ref[...], preferred_element_type=jnp.float32)
        inv_m = 1.0 / m_count
        mean = ch_sum * inv_m
        var = jnp.maximum(ch_ssq * inv_m - mean * mean, 0.0)   # clamp >= 0
        inv_std = jax.lax.rsqrt(var + BN_EPS)
        scale = g_ref[...] * inv_std
        shift = b_ref[...] - mean * scale
        # Broadcast per-channel scale/shift back to the (w, c) lane layout.
        scale_l = jnp.dot(scale, pt_ref[...], preferred_element_type=jnp.float32)
        shift_l = jnp.dot(shift, pt_ref[...], preferred_element_type=jnp.float32)
        return jnp.maximum(o * scale_l + shift_l, 0.0)          # ReLU, f32

    def kernel(a0_ref,
               u1_ref, s1_ref, p1_ref, pt1_ref, g1_ref, b1_ref,
               u2_ref, s2_ref, p2_ref, pt2_ref, g2_ref, b2_ref,
               u3_ref, s3_ref, p3_ref, pt3_ref, g3_ref, b3_ref,
               vh_ref, sh_ref, bh_ref,
               out_ref):
        a1 = conv_bn_relu(a0_ref[...], u1_ref, s1_ref, p1_ref, pt1_ref, g1_ref, b1_ref, m1)
        a2 = conv_bn_relu(a1, u2_ref, s2_ref, p2_ref, pt2_ref, g2_ref, b2_ref, m2)
        a3 = conv_bn_relu(a2, u3_ref, s3_ref, p3_ref, pt3_ref, g3_ref, b3_ref, m3)
        # Linear head, same reorder + tap fusion: gather the h3 rows of each
        # image first, then ONE (out_rows, h3*L3_p) @ (h3*L3_p, 128) matmul.
        a3_lo = a3.astype(vh_ref.dtype)
        htaps = [jnp.dot(sh_ref[h], a3_lo, preferred_element_type=jnp.float32)
                 for h in range(n_head_taps)]
        gh = jnp.concatenate(htaps, axis=1).astype(vh_ref.dtype)
        out = jnp.dot(gh, vh_ref[...], preferred_element_type=jnp.float32)
        out_ref[...] = out + bh_ref[...]

    return kernel


# ---------------------------------------------------------------------------
# Host-side (init-time) packing of weights into the kernel's matmul operands.
# ---------------------------------------------------------------------------
def _build_conv_tap_matrices(w, h_in, w_in, n):
    """Operands for  conv(A) == concat_i(S_i @ A) @ U_stacked  with A[n*h, w*c]."""
    c_out, c_in, k, _ = w.shape
    h_out, w_out = _conv_size(h_in), _conv_size(w_in)
    l_in_p = _pad_to(w_in * c_in, 128)
    l_out_p = _pad_to(w_out * c_out, 128)
    r_in_p = _pad_to(n * h_in, 8)
    r_out_p = _pad_to(n * h_out, 8)

    w_np = np.asarray(w, dtype=np.float32)
    u = np.zeros((k, l_in_p, l_out_p), np.float32)
    s = np.zeros((k, r_out_p, r_in_p), np.float32)
    for i in range(k):
        for wo in range(w_out):
            for j in range(k):
                r0 = (STRIDE * wo + j) * c_in
                c0 = wo * c_out
                u[i, r0:r0 + c_in, c0:c0 + c_out] = w_np[:, :, i, j].T
        for b in range(n):
            for ho in range(h_out):
                s[i, b * h_out + ho, b * h_in + STRIDE * ho + i] = 1.0
    u_stacked = u.reshape(k * l_in_p, l_out_p)     # [R4] taps stacked along K

    # lane -> channel fold (stats) and channel -> lane broadcast (transpose).
    p = np.zeros((l_out_p, 128), np.float32)
    for wo in range(w_out):
        for co in range(c_out):
            p[wo * c_out + co, co] = 1.0

    return (jnp.asarray(u_stacked, MXU_DTYPE),     # [R2] bf16 MXU feed
            jnp.asarray(s, jnp.bfloat16),          # [R2] 0/1 selection, exact in bf16
            jnp.asarray(p, jnp.float32),           # tiny f32 folds: keep stats precise
            jnp.asarray(np.ascontiguousarray(p.T), jnp.float32),
            h_out, w_out)


def _build_head_matrices(hw, hb, h3, w3, c3, n):
    """Fold the NCHW flatten order + per-batch row gather into head operands."""
    outputs = hw.shape[0]
    l3_p = _pad_to(w3 * c3, 128)
    r3_p = _pad_to(n * h3, 8)
    out_rows = _pad_to(n, 8)
    hw_np = np.asarray(hw, np.float32)

    v = np.zeros((h3, l3_p, 128), np.float32)
    sp = np.zeros((h3, out_rows, r3_p), np.float32)
    for hh in range(h3):
        for ww in range(w3):
            for c in range(c3):
                # PyTorch flatten order of (n, c, h, w) is (c, h, w)
                v[hh, ww * c3 + c, :outputs] = hw_np[:, c * (h3 * w3) + hh * w3 + ww]
        for b in range(n):
            sp[hh, b, b * h3 + hh] = 1.0
    v_stacked = v.reshape(h3 * l3_p, 128)          # [R4] head taps stacked along K

    bh = np.zeros((1, 128), np.float32)
    bh[0, :outputs] = np.asarray(hb, np.float32)
    return (jnp.asarray(v_stacked, MXU_DTYPE),
            jnp.asarray(sp, jnp.bfloat16),
            jnp.asarray(bh, jnp.float32))


def init_params(key, h, w, outputs):
    convw = _conv_size(_conv_size(_conv_size(w)))
    convh = _conv_size(_conv_size(_conv_size(h)))
    linear_input_size = convw * convh * 32

    keys = jax.random.split(key, 8)
    conv_shapes = [(16, 3), (32, 16), (32, 32)]
    convs = []
    for li, (co, ci) in enumerate(conv_shapes):
        cw = 0.05 * jax.random.normal(keys[2 * li], (co, ci, KSIZE, KSIZE), jnp.float32)
        cb = 0.05 * jax.random.normal(keys[2 * li + 1], (co,), jnp.float32)
        gamma = jnp.ones((co,), jnp.float32)       # BatchNorm2d default init
        beta = jnp.zeros((co,), jnp.float32)
        convs.append((cw, cb, gamma, beta))
    hw = 0.05 * jax.random.normal(keys[6], (outputs, linear_input_size), jnp.float32)
    hb = 0.05 * jax.random.normal(keys[7], (outputs,), jnp.float32)
    return {"convs": convs, "head": (hw, hb)}


def prepare_fused_params(params, n, h, w):
    """One-time packing; batch size n is baked into the row-selection matrices."""
    prep = {}
    h_cur, w_cur = h, w
    c_out = None
    for li, (cw, _cb, gamma, beta) in enumerate(params["convs"], start=1):
        # _cb (conv bias) intentionally dropped: BN subtracts the batch mean,
        # so the bias cancels exactly.
        u, s, p, pt, h_cur, w_cur = _build_conv_tap_matrices(cw, h_cur, w_cur, n)
        c_out = cw.shape[0]
        g = np.zeros((1, 128), np.float32)
        b = np.zeros((1, 128), np.float32)
        g[0, :c_out] = np.asarray(gamma, np.float32)
        b[0, :c_out] = np.asarray(beta, np.float32)
        prep[f"l{li}"] = (u, s, p, pt, jnp.asarray(g), jnp.asarray(b))
    hw, hb = params["head"]
    prep["head"] = _build_head_matrices(hw, hb, h_cur, w_cur, c_out, n)
    return prep


# ---------------------------------------------------------------------------
# Forward pass (jit this; only glue is the NCHW -> lane-dense input packing).
# ---------------------------------------------------------------------------
def cnn_forward(x_nchw, prep, outputs):
    n, c0, h, w = x_nchw.shape
    h1, w1 = _conv_size(h), _conv_size(w)
    h2, w2 = _conv_size(h1), _conv_size(w1)
    h3, w3 = _conv_size(h2), _conv_size(w2)
    bn_counts = (n * h1 * w1, n * h2 * w2, n * h3 * w3)

    # Guard against a batch / image-size mismatch with the prep-time packing.
    if prep["l1"][1].shape[2] != _pad_to(n * h, 8):
        raise ValueError("batch/height do not match prepare_fused_params()")

    # Glue (jitted XLA): NCHW -> A0[n*H + h, w*C + c], zero-padded to (x8, x128).
    # Kept outside the kernel: at these sizes the call is launch-bound and this
    # is one fused transpose+pad op; pre-pack activations between calls to
    # remove it entirely when calling repeatedly.
    a0 = jnp.transpose(x_nchw.astype(jnp.float32), (0, 2, 3, 1)).reshape(n * h, w * c0)
    r0_p, l0_p = _pad_to(n * h, 8), _pad_to(w * c0, 128)
    a0 = jnp.pad(a0, ((0, r0_p - n * h), (0, l0_p - w * c0)))

    args = [a0]
    for li in range(1, 4):
        args.extend(prep[f"l{li}"])
    args.extend(prep["head"])

    out_rows = _pad_to(n, 8)
    kernel = _make_fused_kernel(bn_counts, h3)

    # [R7] no grid: single invocation, whole operands mapped into VMEM once
    # (no double-buffering of the constant weight matrices).
    vmem_spec = pl.BlockSpec(memory_space=pltpu.MemorySpace.VMEM)
    out_padded = pl.pallas_call(
        kernel,
        out_shape=jax.ShapeDtypeStruct((out_rows, 128), jnp.float32),
        in_specs=[vmem_spec] * len(args),
        out_specs=vmem_spec,
    )(*args)

    # Lane-dense (8, 128) kernel output; valid region sliced out here.
    return out_padded[:n, :outputs]


# ---------------------------------------------------------------------------
if __name__ == "__main__":
    H = W = 40          # 40 -> 18 -> 7 -> 2 after the three stride-2 convs
    BATCH = 2
    OUTPUTS = 4

    key = jax.random.PRNGKey(0)
    k_param, k_x = jax.random.split(key)
    params = init_params(k_param, H, W, OUTPUTS)
    prep = prepare_fused_params(params, BATCH, H, W)
    x = jax.random.normal(k_x, (BATCH, 3, H, W), dtype=jnp.float32)

    fwd = jax.jit(cnn_forward, static_argnums=(2,))
    out = fwd(x, prep, OUTPUTS)
    jax.block_until_ready(out)
    assert out.shape == (BATCH, OUTPUTS), out.shape
    assert bool(jnp.all(jnp.isfinite(out))), "non-finite output"
    print("KERNEL_OK")
</pallas_src>

<mosaic_0001>
module attributes {stable_mosaic.version = 11 : i64} {
  func.func @kernel(%arg0: memref<80x128xf32, #tpu.memory_space<vmem>>, %arg1: memref<640x384xbf16, #tpu.memory_space<vmem>>, %arg2: memref<5x40x80xbf16, #tpu.memory_space<vmem>>, %arg3: memref<384x128xf32, #tpu.memory_space<vmem>>, %arg4: memref<128x384xf32, #tpu.memory_space<vmem>>, %arg5: memref<1x128xf32, #tpu.memory_space<vmem>>, %arg6: memref<1x128xf32, #tpu.memory_space<vmem>>, %arg7: memref<1920x256xbf16, #tpu.memory_space<vmem>>, %arg8: memref<5x16x40xbf16, #tpu.memory_space<vmem>>, %arg9: memref<256x128xf32, #tpu.memory_space<vmem>>, %arg10: memref<128x256xf32, #tpu.memory_space<vmem>>, %arg11: memref<1x128xf32, #tpu.memory_space<vmem>>, %arg12: memref<1x128xf32, #tpu.memory_space<vmem>>, %arg13: memref<1280x128xbf16, #tpu.memory_space<vmem>>, %arg14: memref<5x8x16xbf16, #tpu.memory_space<vmem>>, %arg15: memref<128x128xf32, #tpu.memory_space<vmem>>, %arg16: memref<128x128xf32, #tpu.memory_space<vmem>>, %arg17: memref<1x128xf32, #tpu.memory_space<vmem>>, %arg18: memref<1x128xf32, #tpu.memory_space<vmem>>, %arg19: memref<256x128xbf16, #tpu.memory_space<vmem>>, %arg20: memref<2x8x8xbf16, #tpu.memory_space<vmem>>, %arg21: memref<1x128xf32, #tpu.memory_space<vmem>>, %arg22: memref<8x128xf32, #tpu.memory_space<vmem>>) attributes {dimension_semantics = [], scalar_prefetch = 0 : i64, scratch_operands = 0 : i64, tpu.core_type = #tpu.core_type<tc>} {
    %c0 = arith.constant 0 : index
    %c0_0 = arith.constant 0 : index
    %0 = vector.load %arg0[%c0, %c0_0] : memref<80x128xf32, #tpu.memory_space<vmem>>, vector<80x128xf32>
    %1 = arith.truncf %0 : vector<80x128xf32> to vector<80x128xbf16>
    %c0_1 = arith.constant 0 : index
    %c0_2 = arith.constant 0 : index
    %c0_3 = arith.constant 0 : index
    %2 = vector.load %arg2[%c0_1, %c0_2, %c0_3] : memref<5x40x80xbf16, #tpu.memory_space<vmem>>, vector<1x40x80xbf16>
    %3 = vector.shape_cast %2 : vector<1x40x80xbf16> to vector<40x80xbf16>
    %cst = arith.constant dense<0.000000e+00> : vector<40x128xf32>
    %4 = tpu.matmul %3, %1, %cst {dimension_numbers = #tpu.dot_dimension_numbers<[1], [0], [0], [1], [0, 0, 1, 1], [], []>} : vector<40x80xbf16>, vector<80x128xbf16>, vector<40x128xf32> -> vector<40x128xf32>
    %c1 = arith.constant 1 : index
    %c0_4 = arith.constant 0 : index
    %c0_5 = arith.constant 0 : index
    %5 = vector.load %arg2[%c1, %c0_4, %c0_5] : memref<5x40x80xbf16, #tpu.memory_space<vmem>>, vector<1x40x80xbf16>
    %6 = vector.shape_cast %5 : vector<1x40x80xbf16> to vector<40x80xbf16>
    %cst_6 = arith.constant dense<0.000000e+00> : vector<40x128xf32>
    %7 = tpu.matmul %6, %1, %cst_6 {dimension_numbers = #tpu.dot_dimension_numbers<[1], [0], [0], [1], [0, 0, 1, 1], [], []>} : vector<40x80xbf16>, vector<80x128xbf16>, vector<40x128xf32> -> vector<40x128xf32>
    %c2 = arith.constant 2 : index
    %c0_7 = arith.constant 0 : index
    %c0_8 = arith.constant 0 : index
    %8 = vector.load %arg2[%c2, %c0_7, %c0_8] : memref<5x40x80xbf16, #tpu.memory_space<vmem>>, vector<1x40x80xbf16>
    %9 = vector.shape_cast %8 : vector<1x40x80xbf16> to vector<40x80xbf16>
    %cst_9 = arith.constant dense<0.000000e+00> : vector<40x128xf32>
    %10 = tpu.matmul %9, %1, %cst_9 {dimension_numbers = #tpu.dot_dimension_numbers<[1], [0], [0], [1], [0, 0, 1, 1], [], []>} : vector<40x80xbf16>, vector<80x128xbf16>, vector<40x128xf32> -> vector<40x128xf32>
    %c3 = arith.constant 3 : index
    %c0_10 = arith.constant 0 : index
    %c0_11 = arith.constant 0 : index
    %11 = vector.load %arg2[%c3, %c0_10, %c0_11] : memref<5x40x80xbf16, #tpu.memory_space<vmem>>, vector<1x40x80xbf16>
    %12 = vector.shape_cast %11 : vector<1x40x80xbf16> to vector<40x80xbf16>
    %cst_12 = arith.constant dense<0.000000e+00> : vector<40x128xf32>
    %13 = tpu.matmul %12, %1, %cst_12 {dimension_numbers = #tpu.dot_dimension_numbers<[1], [0], [0], [1], [0, 0, 1, 1], [], []>} : vector<40x80xbf16>, vector<80x128xbf16>, vector<40x128xf32> -> vector<40x128xf32>
    %c4 = arith.constant 4 : index
    %c0_13 = arith.constant 0 : index
    %c0_14 = arith.constant 0 : index
    %14 = vector.load %arg2[%c4, %c0_13, %c0_14] : memref<5x40x80xbf16, #tpu.memory_space<vmem>>, vector<1x40x80xbf16>
    %15 = vector.shape_cast %14 : vector<1x40x80xbf16> to vector<40x80xbf16>
    %cst_15 = arith.constant dense<0.000000e+00> : vector<40x128xf32>
    %16 = tpu.matmul %15, %1, %cst_15 {dimension_numbers = #tpu.dot_dimension_numbers<[1], [0], [0], [1], [0, 0, 1, 1], [], []>} : vector<40x80xbf16>, vector<80x128xbf16>, vector<40x128xf32> -> vector<40x128xf32>
    %17 = tpu.concatenate %4, %7, %10, %13, %16 in 1 : vector<40x128xf32>, vector<40x128xf32>, vector<40x128xf32>, vector<40x128xf32>, vector<40x128xf32> -> vector<40x640xf32>
    %18 = arith.truncf %17 : vector<40x640xf32> to vector<40x640xbf16>
    %c0_16 = arith.constant 0 : index
    %c0_17 = arith.constant 0 : index
    %19 = vector.load %arg1[%c0_16, %c0_17] : memref<640x384xbf16, #tpu.memory_space<vmem>>, vector<640x384xbf16>
    %cst_18 = arith.constant dense<0.000000e+00> : vector<40x384xf32>
    %20 = tpu.matmul %18, %19, %cst_18 {dimension_numbers = #tpu.dot_dimension_numbers<[1], [0], [0], [1], [0, 0, 1, 1], [], []>} : vector<40x640xbf16>, vector<640x384xbf16>, vector<40x384xf32> -> vector<40x384xf32>
    %cst_19 = arith.constant dense<0.000000e+00> : vector<384xf32>
    %21 = vector.multi_reduction <add>, %20, %cst_19 [0] : vector<40x384xf32> to vector<384xf32>
    %22 = vector.shape_cast %21 : vector<384xf32> to vector<1x384xf32>
    %23 = arith.mulf %20, %20 : vector<40x384xf32>
    %cst_20 = arith.constant dense<0.000000e+00> : vector<384xf32>
    %24 = vector.multi_reduction <add>, %23, %cst_20 [0] : vector<40x384xf32> to vector<384xf32>
    %25 = vector.shape_cast %24 : vector<384xf32> to vector<1x384xf32>
    %c0_21 = arith.constant 0 : index
    %c0_22 = arith.constant 0 : index
    %26 = vector.load %arg3[%c0_21, %c0_22] : memref<384x128xf32, #tpu.memory_space<vmem>>, vector<384x128xf32>
    %cst_23 = arith.constant dense<0.000000e+00> : vector<1x128xf32>
    %27 = tpu.matmul %22, %26, %cst_23 {dimension_numbers = #tpu.dot_dimension_numbers<[1], [0], [0], [1], [0, 0, 1, 1], [], []>} : vector<1x384xf32>, vector<384x128xf32>, vector<1x128xf32> -> vector<1x128xf32>
    %c0_24 = arith.constant 0 : index
    %c0_25 = arith.constant 0 : index
    %28 = vector.load %arg3[%c0_24, %c0_25] : memref<384x128xf32, #tpu.memory_space<vmem>>, vector<384x128xf32>
    %cst_26 = arith.constant dense<0.000000e+00> : vector<1x128xf32>
    %29 = tpu.matmul %25, %28, %cst_26 {dimension_numbers = #tpu.dot_dimension_numbers<[1], [0], [0], [1], [0, 0, 1, 1], [], []>} : vector<1x384xf32>, vector<384x128xf32>, vector<1x128xf32> -> vector<1x128xf32>
    %cst_27 = arith.constant 0.00154320989 : f32
    %30 = vector.broadcast %cst_27 : f32 to vector<1x128xf32>
    %31 = arith.mulf %27, %30 : vector<1x128xf32>
    %cst_28 = arith.constant 0.00154320989 : f32
    %32 = vector.broadcast %cst_28 : f32 to vector<1x128xf32>
    %33 = arith.mulf %29, %32 : vector<1x128xf32>
    %34 = arith.mulf %31, %31 : vector<1x128xf32>
    %35 = arith.subf %33, %34 : vector<1x128xf32>
    %cst_29 = arith.constant 0.000000e+00 : f32
    %36 = vector.broadcast %cst_29 : f32 to vector<1x128xf32>
    %37 = arith.maximumf %35, %36 : vector<1x128xf32>
    %cst_30 = arith.constant 9.99999974E-6 : f32
    %38 = vector.broadcast %cst_30 : f32 to vector<1x128xf32>
    %39 = arith.addf %37, %38 : vector<1x128xf32>
    %40 = math.rsqrt %39 : vector<1x128xf32>
    %c0_31 = arith.constant 0 : index
    %c0_32 = arith.constant 0 : index
    %41 = vector.load %arg5[%c0_31, %c0_32] : memref<1x128xf32, #tpu.memory_space<vmem>>, vector<1x128xf32>
    %42 = arith.mulf %41, %40 : vector<1x128xf32>
    %c0_33 = arith.constant 0 : index
    %c0_34 = arith.constant 0 : index
    %43 = vector.load %arg6[%c0_33, %c0_34] : memref<1x128xf32, #tpu.memory_space<vmem>>, vector<1x128xf32>
    %44 = arith.mulf %31, %42 : vector<1x128xf32>
    %45 = arith.subf %43, %44 : vector<1x128xf32>
    %c0_35 = arith.constant 0 : index
    %c0_36 = arith.constant 0 : index
    %46 = vector.load %arg4[%c0_35, %c0_36] : memref<128x384xf32, #tpu.memory_space<vmem>>, vector<128x384xf32>
    %cst_37 = arith.constant dense<0.000000e+00> : vector<1x384xf32>
    %47 = tpu.matmul %42, %46, %cst_37 {dimension_numbers = #tpu.dot_dimension_numbers<[1], [0], [0], [1], [0, 0, 1, 1], [], []>} : vector<1x128xf32>, vector<128x384xf32>, vector<1x384xf32> -> vector<1x384xf32>
    %c0_38 = arith.constant 0 : index
    %c0_39 = arith.constant 0 : index
    %48 = vector.load %arg4[%c0_38, %c0_39] : memref<128x384xf32, #tpu.memory_space<vmem>>, vector<128x384xf32>
    %cst_40 = arith.constant dense<0.000000e+00> : vector<1x384xf32>
    %49 = tpu.matmul %45, %48, %cst_40 {dimension_numbers = #tpu.dot_dimension_numbers<[1], [0], [0], [1], [0, 0, 1, 1], [], []>} : vector<1x128xf32>, vector<128x384xf32>, vector<1x384xf32> -> vector<1x384xf32>
    %50 = vector.broadcast %47 : vector<1x384xf32> to vector<40x384xf32>
    %51 = arith.mulf %20, %50 : vector<40x384xf32>
    %52 = vector.broadcast %49 : vector<1x384xf32> to vector<40x384xf32>
    %53 = arith.addf %51, %52 : vector<40x384xf32>
    %cst_41 = arith.constant 0.000000e+00 : f32
    %54 = vector.broadcast %cst_41 : f32 to vector<40x384xf32>
    %55 = arith.maximumf %53, %54 : vector<40x384xf32>
    %56 = arith.truncf %55 : vector<40x384xf32> to vector<40x384xbf16>
    %c0_42 = arith.constant 0 : index
    %c0_43 = arith.constant 0 : index
    %c0_44 = arith.constant 0 : index
    %57 = vector.load %arg8[%c0_42, %c0_43, %c0_44] : memref<5x16x40xbf16, #tpu.memory_space<vmem>>, vector<1x16x40xbf16>
    %58 = vector.shape_cast %57 : vector<1x16x40xbf16> to vector<16x40xbf16>
    %cst_45 = arith.constant dense<0.000000e+00> : vector<16x384xf32>
    %59 = tpu.matmul %58, %56, %cst_45 {dimension_numbers = #tpu.dot_dimension_numbers<[1], [0], [0], [1], [0, 0, 1, 1], [], []>} : vector<16x40xbf16>, vector<40x384xbf16>, vector<16x384xf32> -> vector<16x384xf32>
    %c1_46 = arith.constant 1 : index
    %c0_47 = arith.constant 0 : index
    %c0_48 = arith.constant 0 : index
    %60 = vector.load %arg8[%c1_46, %c0_47, %c0_48] : memref<5x16x40xbf16, #tpu.memory_space<vmem>>, vector<1x16x40xbf16>
    %61 = vector.shape_cast %60 : vector<1x16x40xbf16> to vector<16x40xbf16>
    %cst_49 = arith.constant dense<0.000000e+00> : vector<16x384xf32>
    %62 = tpu.matmul %61, %56, %cst_49 {dimension_numbers = #tpu.dot_dimension_numbers<[1], [0], [0], [1], [0, 0, 1, 1], [], []>} : vector<16x40xbf16>, vector<40x384xbf16>, vector<16x384xf32> -> vector<16x384xf32>
    %c2_50 = arith.constant 2 : index
    %c0_51 = arith.constant 0 : index
    %c0_52 = arith.constant 0 : index
    %63 = vector.load %arg8[%c2_50, %c0_51, %c0_52] : memref<5x16x40xbf16, #tpu.memory_space<vmem>>, vector<1x16x40xbf16>
    %64 = vector.shape_cast %63 : vector<1x16x40xbf16> to vector<16x40xbf16>
    %cst_53 = arith.constant dense<0.000000e+00> : vector<16x384xf32>
    %65 = tpu.matmul %64, %56, %cst_53 {dimension_numbers = #tpu.dot_dimension_numbers<[1], [0], [0], [1], [0, 0, 1, 1], [], []>} : vector<16x40xbf16>, vector<40x384xbf16>, vector<16x384xf32> -> vector<16x384xf32>
    %c3_54 = arith.constant 3 : index
    %c0_55 = arith.constant 0 : index
    %c0_56 = arith.constant 0 : index
    %66 = vector.load %arg8[%c3_54, %c0_55, %c0_56] : memref<5x16x40xbf16, #tpu.memory_space<vmem>>, vector<1x16x40xbf16>
    %67 = vector.shape_cast %66 : vector<1x16x40xbf16> to vector<16x40xbf16>
    %cst_57 = arith.constant dense<0.000000e+00> : vector<16x384xf32>
    %68 = tpu.matmul %67, %56, %cst_57 {dimension_numbers = #tpu.dot_dimension_numbers<[1], [0], [0], [1], [0, 0, 1, 1], [], []>} : vector<16x40xbf16>, vector<40x384xbf16>, vector<16x384xf32> -> vector<16x384xf32>
    %c4_58 = arith.constant 4 : index
    %c0_59 = arith.constant 0 : index
    %c0_60 = arith.constant 0 : index
    %69 = vector.load %arg8[%c4_58, %c0_59, %c0_60] : memref<5x16x40xbf16, #tpu.memory_space<vmem>>, vector<1x16x40xbf16>
    %70 = vector.shape_cast %69 : vector<1x16x40xbf16> to vector<16x40xbf16>
    %cst_61 = arith.constant dense<0.000000e+00> : vector<16x384xf32>
    %71 = tpu.matmul %70, %56, %cst_61 {dimension_numbers = #tpu.dot_dimension_numbers<[1], [0], [0], [1], [0, 0, 1, 1], [], []>} : vector<16x40xbf16>, vector<40x384xbf16>, vector<16x384xf32> -> vector<16x384xf32>
    %72 = tpu.concatenate %59, %62, %65, %68, %71 in 1 : vector<16x384xf32>, vector<16x384xf32>, vector<16x384xf32>, vector<16x384xf32>, vector<16x384xf32> -> vector<16x1920xf32>
    %73 = arith.truncf %72 : vector<16x1920xf32> to vector<16x1920xbf16>
    %c0_62 = arith.constant 0 : index
    %c0_63 = arith.constant 0 : index
    %74 = vector.load %arg7[%c0_62, %c0_63] : memref<1920x256xbf16, #tpu.memory_space<vmem>>, vector<1920x256xbf16>
    %cst_64 = arith.constant dense<0.000000e+00> : vector<16x256xf32>
    %75 = tpu.matmul %73, %74, %cst_64 {dimension_numbers = #tpu.dot_dimension_numbers<[1], [0], [0], [1], [0, 0, 1, 1], [], []>} : vector<16x1920xbf16>, vector<1920x256xbf16>, vector<16x256xf32> -> vector<16x256xf32>
    %cst_65 = arith.constant dense<0.000000e+00> : vector<256xf32>
    %76 = vector.multi_reduction <add>, %75, %cst_65 [0] : vector<16x256xf32> to vector<256xf32>
    %77 = vector.shape_cast %76 : vector<256xf32> to vector<1x256xf32>
    %78 = arith.mulf %75, %75 : vector<16x256xf32>
    %cst_66 = arith.constant dense<0.000000e+00> : vector<256xf32>
    %79 = vector.multi_reduction <add>, %78, %cst_66 [0] : vector<16x256xf32> to vector<256xf32>
    %80 = vector.shape_cast %79 : vector<256xf32> to vector<1x256xf32>
    %c0_67 = arith.constant 0 : index
    %c0_68 = arith.constant 0 : index
    %81 = vector.load %arg9[%c0_67, %c0_68] : memref<256x128xf32, #tpu.memory_space<vmem>>, vector<256x128xf32>
    %cst_69 = arith.constant dense<0.000000e+00> : vector<1x128xf32>
    %82 = tpu.matmul %77, %81, %cst_69 {dimension_numbers = #tpu.dot_dimension_numbers<[1], [0], [0], [1], [0, 0, 1, 1], [], []>} : vector<1x256xf32>, vector<256x128xf32>, vector<1x128xf32> -> vector<1x128xf32>
    %c0_70 = arith.constant 0 : index
    %c0_71 = arith.constant 0 : index
    %83 = vector.load %arg9[%c0_70, %c0_71] : memref<256x128xf32, #tpu.memory_space<vmem>>, vector<256x128xf32>
    %cst_72 = arith.constant dense<0.000000e+00> : vector<1x128xf32>
    %84 = tpu.matmul %80, %83, %cst_72 {dimension_numbers = #tpu.dot_dimension_numbers<[1], [0], [0], [1], [0, 0, 1, 1], [], []>} : vector<1x256xf32>, vector<256x128xf32>, vector<1x128xf32> -> vector<1x128xf32>
    %cst_73 = arith.constant 0.0102040814 : f32
    %85 = vector.broadcast %cst_73 : f32 to vector<1x128xf32>
    %86 = arith.mulf %82, %85 : vector<1x128xf32>
    %cst_74 = arith.constant 0.0102040814 : f32
    %87 = vector.broadcast %cst_74 : f32 to vector<1x128xf32>
    %88 = arith.mulf %84, %87 : vector<1x128xf32>
    %89 = arith.mulf %86, %86 : vector<1x128xf32>
    %90 = arith.subf %88, %89 : vector<1x128xf32>
    %cst_75 = arith.constant 0.000000e+00 : f32
    %91 = vector.broadcast %cst_75 : f32 to vector<1x128xf32>
    %92 = arith.maximumf %90, %91 : vector<1x128xf32>
    %cst_76 = arith.constant 9.99999974E-6 : f32
    %93 = vector.broadcast %cst_76 : f32 to vector<1x128xf32>
    %94 = arith.addf %92, %93 : vector<1x128xf32>
    %95 = math.rsqrt %94 : vector<1x128xf32>
    %c0_77 = arith.constant 0 : index
    %c0_78 = arith.constant 0 : index
    %96 = vector.load %arg11[%c0_77, %c0_78] : memref<1x128xf32, #tpu.memory_space<vmem>>, vector<1x128xf32>
    %97 = arith.mulf %96, %95 : vector<1x128xf32>
    %c0_79 = arith.constant 0 : index
    %c0_80 = arith.constant 0 : index
    %98 = vector.load %arg12[%c0_79, %c0_80] : memref<1x128xf32, #tpu.memory_space<vmem>>, vector<1x128xf32>
    %99 = arith.mulf %86, %97 : vector<1x128xf32>
    %100 = arith.subf %98, %99 : vector<1x128xf32>
    %c0_81 = arith.constant 0 : index
    %c0_82 = arith.constant 0 : index
    %101 = vector.load %arg10[%c0_81, %c0_82] : memref<128x256xf32, #tpu.memory_space<vmem>>, vector<128x256xf32>
    %cst_83 = arith.constant dense<0.000000e+00> : vector<1x256xf32>
    %102 = tpu.matmul %97, %101, %cst_83 {dimension_numbers = #tpu.dot_dimension_numbers<[1], [0], [0], [1], [0, 0, 1, 1], [], []>} : vector<1x128xf32>, vector<128x256xf32>, vector<1x256xf32> -> vector<1x256xf32>
    %c0_84 = arith.constant 0 : index
    %c0_85 = arith.constant 0 : index
    %103 = vector.load %arg10[%c0_84, %c0_85] : memref<128x256xf32, #tpu.memory_space<vmem>>, vector<128x256xf32>
    %cst_86 = arith.constant dense<0.000000e+00> : vector<1x256xf32>
    %104 = tpu.matmul %100, %103, %cst_86 {dimension_numbers = #tpu.dot_dimension_numbers<[1], [0], [0], [1], [0, 0, 1, 1], [], []>} : vector<1x128xf32>, vector<128x256xf32>, vector<1x256xf32> -> vector<1x256xf32>
    %105 = vector.broadcast %102 : vector<1x256xf32> to vector<16x256xf32>
    %106 = arith.mulf %75, %105 : vector<16x256xf32>
    %107 = vector.broadcast %104 : vector<1x256xf32> to vector<16x256xf32>
    %108 = arith.addf %106, %107 : vector<16x256xf32>
    %cst_87 = arith.constant 0.000000e+00 : f32
    %109 = vector.broadcast %cst_87 : f32 to vector<16x256xf32>
    %110 = arith.maximumf %108, %109 : vector<16x256xf32>
    %111 = arith.truncf %110 : vector<16x256xf32> to vector<16x256xbf16>
    %c0_88 = arith.constant 0 : index
    %c0_89 = arith.constant 0 : index
    %c0_90 = arith.constant 0 : index
    %112 = vector.load %arg14[%c0_88, %c0_89, %c0_90] : memref<5x8x16xbf16, #tpu.memory_space<vmem>>, vector<1x8x16xbf16>
    %113 = vector.shape_cast %112 : vector<1x8x16xbf16> to vector<8x16xbf16>
    %cst_91 = arith.constant dense<0.000000e+00> : vector<8x256xf32>
    %114 = tpu.matmul %113, %111, %cst_91 {dimension_numbers = #tpu.dot_dimension_numbers<[1], [0], [0], [1], [0, 0, 1, 1], [], []>} : vector<8x16xbf16>, vector<16x256xbf16>, vector<8x256xf32> -> vector<8x256xf32>
    %c1_92 = arith.constant 1 : index
    %c0_93 = arith.constant 0 : index
    %c0_94 = arith.constant 0 : index
    %115 = vector.load %arg14[%c1_92, %c0_93, %c0_94] : memref<5x8x16xbf16, #tpu.memory_space<vmem>>, vector<1x8x16xbf16>
    %116 = vector.shape_cast %115 : vector<1x8x16xbf16> to vector<8x16xbf16>
    %cst_95 = arith.constant dense<0.000000e+00> : vector<8x256xf32>
    %117 = tpu.matmul %116, %111, %cst_95 {dimension_numbers = #tpu.dot_dimension_numbers<[1], [0], [0], [1], [0, 0, 1, 1], [], []>} : vector<8x16xbf16>, vector<16x256xbf16>, vector<8x256xf32> -> vector<8x256xf32>
    %c2_96 = arith.constant 2 : index
    %c0_97 = arith.constant 0 : index
    %c0_98 = arith.constant 0 : index
    %118 = vector.load %arg14[%c2_96, %c0_97, %c0_98] : memref<5x8x16xbf16, #tpu.memory_space<vmem>>, vector<1x8x16xbf16>
    %119 = vector.shape_cast %118 : vector<1x8x16xbf16> to vector<8x16xbf16>
    %cst_99 = arith.constant dense<0.000000e+00> : vector<8x256xf32>
    %120 = tpu.matmul %119, %111, %cst_99 {dimension_numbers = #tpu.dot_dimension_numbers<[1], [0], [0], [1], [0, 0, 1, 1], [], []>} : vector<8x16xbf16>, vector<16x256xbf16>, vector<8x256xf32> -> vector<8x256xf32>
    %c3_100 = arith.constant 3 : index
    %c0_101 = arith.constant 0 : index
    %c0_102 = arith.constant 0 : index
    %121 = vector.load %arg14[%c3_100, %c0_101, %c0_102] : memref<5x8x16xbf16, #tpu.memory_space<vmem>>, vector<1x8x16xbf16>
    %122 = vector.shape_cast %121 : vector<1x8x16xbf16> to vector<8x16xbf16>
    %cst_103 = arith.constant dense<0.000000e+00> : vector<8x256xf32>
    %123 = tpu.matmul %122, %111, %cst_103 {dimension_numbers = #tpu.dot_dimension_numbers<[1], [0], [0], [1], [0, 0, 1, 1], [], []>} : vector<8x16xbf16>, vector<16x256xbf16>, vector<8x256xf32> -> vector<8x256xf32>
    %c4_104 = arith.constant 4 : index
    %c0_105 = arith.constant 0 : index
    %c0_106 = arith.constant 0 : index
    %124 = vector.load %arg14[%c4_104, %c0_105, %c0_106] : memref<5x8x16xbf16, #tpu.memory_space<vmem>>, vector<1x8x16xbf16>
    %125 = vector.shape_cast %124 : vector<1x8x16xbf16> to vector<8x16xbf16>
    %cst_107 = arith.constant dense<0.000000e+00> : vector<8x256xf32>
    %126 = tpu.matmul %125, %111, %cst_107 {dimension_numbers = #tpu.dot_dimension_numbers<[1], [0], [0], [1], [0, 0, 1, 1], [], []>} : vector<8x16xbf16>, vector<16x256xbf16>, vector<8x256xf32> -> vector<8x256xf32>
    %127 = tpu.concatenate %114, %117, %120, %123, %126 in 1 : vector<8x256xf32>, vector<8x256xf32>, vector<8x256xf32>, vector<8x256xf32>, vector<8x256xf32> -> vector<8x1280xf32>
    %128 = arith.truncf %127 : vector<8x1280xf32> to vector<8x1280xbf16>
    %c0_108 = arith.constant 0 : index
    %c0_109 = arith.constant 0 : index
    %129 = vector.load %arg13[%c0_108, %c0_109] : memref<1280x128xbf16, #tpu.memory_space<vmem>>, vector<1280x128xbf16>
    %cst_110 = arith.constant dense<0.000000e+00> : vector<8x128xf32>
    %130 = tpu.matmul %128, %129, %cst_110 {dimension_numbers = #tpu.dot_dimension_numbers<[1], [0], [0], [1], [0, 0, 1, 1], [], []>} : vector<8x1280xbf16>, vector<1280x128xbf16>, vector<8x128xf32> -> vector<8x128xf32>
    %cst_111 = arith.constant dense<0.000000e+00> : vector<128xf32>
    %131 = vector.multi_reduction <add>, %130, %cst_111 [0] : vector<8x128xf32> to vector<128xf32>
    %132 = vector.shape_cast %131 : vector<128xf32> to vector<1x128xf32>
    %133 = arith.mulf %130, %130 : vector<8x128xf32>
    %cst_112 = arith.constant dense<0.000000e+00> : vector<128xf32>
    %134 = vector.multi_reduction <add>, %133, %cst_112 [0] : vector<8x128xf32> to vector<128xf32>
    %135 = vector.shape_cast %134 : vector<128xf32> to vector<1x128xf32>
    %c0_113 = arith.constant 0 : index
    %c0_114 = arith.constant 0 : index
    %136 = vector.load %arg15[%c0_113, %c0_114] : memref<128x128xf32, #tpu.memory_space<vmem>>, vector<128x128xf32>
    %cst_115 = arith.constant dense<0.000000e+00> : vector<1x128xf32>
    %137 = tpu.matmul %132, %136, %cst_115 {dimension_numbers = #tpu.dot_dimension_numbers<[1], [0], [0], [1], [0, 0, 1, 1], [], []>} : vector<1x128xf32>, vector<128x128xf32>, vector<1x128xf32> -> vector<1x128xf32>
    %c0_116 = arith.constant 0 : index
    %c0_117 = arith.constant 0 : index
    %138 = vector.load %arg15[%c0_116, %c0_117] : memref<128x128xf32, #tpu.memory_space<vmem>>, vector<128x128xf32>
    %cst_118 = arith.constant dense<0.000000e+00> : vector<1x128xf32>
    %139 = tpu.matmul %135, %138, %cst_118 {dimension_numbers = #tpu.dot_dimension_numbers<[1], [0], [0], [1], [0, 0, 1, 1], [], []>} : vector<1x128xf32>, vector<128x128xf32>, vector<1x128xf32> -> vector<1x128xf32>
    %cst_119 = arith.constant 1.250000e-01 : f32
    %140 = vector.broadcast %cst_119 : f32 to vector<1x128xf32>
    %141 = arith.mulf %137, %140 : vector<1x128xf32>
    %cst_120 = arith.constant 1.250000e-01 : f32
    %142 = vector.broadcast %cst_120 : f32 to vector<1x128xf32>
    %143 = arith.mulf %139, %142 : vector<1x128xf32>
    %144 = arith.mulf %141, %141 : vector<1x128xf32>
    %145 = arith.subf %143, %144 : vector<1x128xf32>
    %cst_121 = arith.constant 0.000000e+00 : f32
    %146 = vector.broadcast %cst_121 : f32 to vector<1x128xf32>
    %147 = arith.maximumf %145, %146 : vector<1x128xf32>
    %cst_122 = arith.constant 9.99999974E-6 : f32
    %148 = vector.broadcast %cst_122 : f32 to vector<1x128xf32>
    %149 = arith.addf %147, %148 : vector<1x128xf32>
    %150 = math.rsqrt %149 : vector<1x128xf32>
    %c0_123 = arith.constant 0 : index
    %c0_124 = arith.constant 0 : index
    %151 = vector.load %arg17[%c0_123, %c0_124] : memref<1x128xf32, #tpu.memory_space<vmem>>, vector<1x128xf32>
    %152 = arith.mulf %151, %150 : vector<1x128xf32>
    %c0_125 = arith.constant 0 : index
    %c0_126 = arith.constant 0 : index
    %153 = vector.load %arg18[%c0_125, %c0_126] : memref<1x128xf32, #tpu.memory_space<vmem>>, vector<1x128xf32>
    %154 = arith.mulf %141, %152 : vector<1x128xf32>
    %155 = arith.subf %153, %154 : vector<1x128xf32>
    %c0_127 = arith.constant 0 : index
    %c0_128 = arith.constant 0 : index
    %156 = vector.load %arg16[%c0_127, %c0_128] : memref<128x128xf32, #tpu.memory_space<vmem>>, vector<128x128xf32>
    %cst_129 = arith.constant dense<0.000000e+00> : vector<1x128xf32>
    %157 = tpu.matmul %152, %156, %cst_129 {dimension_numbers = #tpu.dot_dimension_numbers<[1], [0], [0], [1], [0, 0, 1, 1], [], []>} : vector<1x128xf32>, vector<128x128xf32>, vector<1x128xf32> -> vector<1x128xf32>
    %c0_130 = arith.constant 0 : index
    %c0_131 = arith.constant 0 : index
    %158 = vector.load %arg16[%c0_130, %c0_131] : memref<128x128xf32, #tpu.memory_space<vmem>>, vector<128x128xf32>
    %cst_132 = arith.constant dense<0.000000e+00> : vector<1x128xf32>
    %159 = tpu.matmul %155, %158, %cst_132 {dimension_numbers = #tpu.dot_dimension_numbers<[1], [0], [0], [1], [0, 0, 1, 1], [], []>} : vector<1x128xf32>, vector<128x128xf32>, vector<1x128xf32> -> vector<1x128xf32>
    %160 = vector.broadcast %157 : vector<1x128xf32> to vector<8x128xf32>
    %161 = arith.mulf %130, %160 : vector<8x128xf32>
    %162 = vector.broadcast %159 : vector<1x128xf32> to vector<8x128xf32>
    %163 = arith.addf %161, %162 : vector<8x128xf32>
    %cst_133 = arith.constant 0.000000e+00 : f32
    %164 = vector.broadcast %cst_133 : f32 to vector<8x128xf32>
    %165 = arith.maximumf %163, %164 : vector<8x128xf32>
    %166 = arith.truncf %165 : vector<8x128xf32> to vector<8x128xbf16>
    %c0_134 = arith.constant 0 : index
    %c0_135 = arith.constant 0 : index
    %c0_136 = arith.constant 0 : index
    %167 = vector.load %arg20[%c0_134, %c0_135, %c0_136] : memref<2x8x8xbf16, #tpu.memory_space<vmem>>, vector<1x8x8xbf16>
    %168 = vector.shape_cast %167 : vector<1x8x8xbf16> to vector<8x8xbf16>
    %cst_137 = arith.constant dense<0.000000e+00> : vector<8x128xf32>
    %169 = tpu.matmul %168, %166, %cst_137 {dimension_numbers = #tpu.dot_dimension_numbers<[1], [0], [0], [1], [0, 0, 1, 1], [], []>} : vector<8x8xbf16>, vector<8x128xbf16>, vector<8x128xf32> -> vector<8x128xf32>
    %c1_138 = arith.constant 1 : index
    %c0_139 = arith.constant 0 : index
    %c0_140 = arith.constant 0 : index
    %170 = vector.load %arg20[%c1_138, %c0_139, %c0_140] : memref<2x8x8xbf16, #tpu.memory_space<vmem>>, vector<1x8x8xbf16>
    %171 = vector.shape_cast %170 : vector<1x8x8xbf16> to vector<8x8xbf16>
    %cst_141 = arith.constant dense<0.000000e+00> : vector<8x128xf32>
    %172 = tpu.matmul %171, %166, %cst_141 {dimension_numbers = #tpu.dot_dimension_numbers<[1], [0], [0], [1], [0, 0, 1, 1], [], []>} : vector<8x8xbf16>, vector<8x128xbf16>, vector<8x128xf32> -> vector<8x128xf32>
    %173 = tpu.concatenate %169, %172 in 1 : vector<8x128xf32>, vector<8x128xf32> -> vector<8x256xf32>
    %174 = arith.truncf %173 : vector<8x256xf32> to vector<8x256xbf16>
    %c0_142 = arith.constant 0 : index
    %c0_143 = arith.constant 0 : index
    %175 = vector.load %arg19[%c0_142, %c0_143] : memref<256x128xbf16, #tpu.memory_space<vmem>>, vector<256x128xbf16>
    %cst_144 = arith.constant dense<0.000000e+00> : vector<8x128xf32>
    %176 = tpu.matmul %174, %175, %cst_144 {dimension_numbers = #tpu.dot_dimension_numbers<[1], [0], [0], [1], [0, 0, 1, 1], [], []>} : vector<8x256xbf16>, vector<256x128xbf16>, vector<8x128xf32> -> vector<8x128xf32>
    %c0_145 = arith.constant 0 : index
    %c0_146 = arith.constant 0 : index
    %177 = vector.load %arg21[%c0_145, %c0_146] : memref<1x128xf32, #tpu.memory_space<vmem>>, vector<1x128xf32>
    %178 = vector.broadcast %177 : vector<1x128xf32> to vector<8x128xf32>
    %179 = arith.addf %176, %178 : vector<8x128xf32>
    %c0_147 = arith.constant 0 : index
    %c0_148 = arith.constant 0 : index
    %180 = vector.load %arg22[%c0_147, %c0_148] : memref<8x128xf32, #tpu.memory_space<vmem>>, vector<8x128xf32>
    tpu.vector_store %arg22[%c0_147, %c0_148], %179 {strides = array<i32>} : memref<8x128xf32, #tpu.memory_space<vmem>>, vector<8x128xf32>,
    return
  }
}

</mosaic_0001>

<bundles_post_ra>
// kernel: cnn_forward.1
= control target key start
LH: loop header
LB: loop body
LE: loop exit
PB: predicated region body
PF: predicated region fallthrough
CT: control target
= control target key end

     0   :  { %s11376_s0 = inlined_call_operand.vmem [shape: f32[80,128], index: 0, kind: input, shape index: {}]   ;;  %s11377_s1 = inlined_call_operand.vmem [shape: bf16[640,384], index: 1, kind: input, shape index: {}]   ;;  %s11378_s2 = inlined_call_operand.hbm [shape: bf16[5,40,80], index: 2, kind: input, shape index: {}]   ;;  %s11379_s3 = inlined_call_operand.hbm [shape: f32[384,128], index: 3, kind: input, shape index: {}]   ;;  %s11380_s4 = inlined_call_operand.hbm [shape: f32[128,384], index: 4, kind: input, shape index: {}]   ;;  %s11381_s5 = inlined_call_operand.vmem [shape: f32[1,128], index: 5, kind: input, shape index: {}]   ;;  %s11382_s6 = inlined_call_operand.vmem [shape: f32[1,128], index: 6, kind: input, shape index: {}]   ;;  %s11383_s7 = inlined_call_operand.hbm [shape: bf16[1920,256], index: 7, kind: input, shape index: {}]   ;;  %s11384_s8 = inlined_call_operand.hbm [shape: bf16[5,16,40], index: 8, kind: input, shape index: {}]   ;;  %s11385_s9 = inlined_call_operand.hbm [shape: f32[256,128], index: 9, kind: input, shape index: {}]   ;;  %s11386_s10 = inlined_call_operand.vmem [shape: f32[128,256], index: 10, kind: input, shape index: {}]   ;;  %s11387_s11 = inlined_call_operand.hbm [shape: f32[1,128], index: 11, kind: input, shape index: {}]   ;;  %s11388_s12 = inlined_call_operand.hbm [shape: f32[1,128], index: 12, kind: input, shape index: {}]   ;;  %s11389_s13 = inlined_call_operand.hbm [shape: bf16[1280,128], index: 13, kind: input, shape index: {}]   ;;  %s11390_s14 = inlined_call_operand.hbm [shape: bf16[5,8,16], index: 14, kind: input, shape index: {}]   ;;  %s11391_s15 = inlined_call_operand.hbm [shape: f32[128,128], index: 15, kind: input, shape index: {}]   ;;  %s11392_s16 = inlined_call_operand.hbm [shape: f32[128,128], index: 16, kind: input, shape index: {}]   ;;  %s11393_s17 = inlined_call_operand.vmem [shape: f32[1,128], index: 17, kind: input, shape index: {}]   ;;  %s11394_s18 = inlined_call_operand.vmem [shape: f32[1,128], index: 18, kind: input, shape index: {}]   ;;  %s11395_s19 = inlined_call_operand.hbm [shape: bf16[256,128], index: 19, kind: input, shape index: {}]   ;;  %s11396_s20 = inlined_call_operand.vmem [shape: bf16[2,8,8], index: 20, kind: input, shape index: {}]   ;;  %s11397_s21 = inlined_call_operand.hbm [shape: f32[1,128], index: 21, kind: input, shape index: {}]   ;;  %s11398_s22 = inlined_call_operand.vmem [shape: f32[8,128], index: 22, kind: output, shape index: {}]  }
   0x1   :  { %11443 = sst [smem:[#allocation68_spill]] %s11376_s0 }
   0x2   :  { %11444 = sst [smem:[#allocation69_spill]] %s11377_s1 }
   0x3   :  { %11445 = sst [smem:[#allocation70_spill]] %s11378_s2 }
   0x4   :  { %11446 = sst [smem:[#allocation71_spill]] %s11379_s3 }
   0x5   :  { %11447 = sst [smem:[#allocation72_spill]] %s11380_s4 }
   0x6   :  { %11448 = sst [smem:[#allocation73_spill]] %s11381_s5 }
   0x7   :  { %11449 = sst [smem:[#allocation74_spill]] %s11382_s6 }
   0x8   :  { %27 = vsyncpa [#allocation3], 0 }
   0x9   :  { %28 = vsyncpa [#allocation5], 0 }
   0xa   :  { %29 = vsyncpa [#allocation8], 0 }
   0xb   :  { %30 = vsyncpa [#allocation11], 0 }
   0xc   :  { %31 = vsyncpa [#allocation14], 0 }
   0xd   :  { %32 = vsyncpa [#allocation17], 0 }
   0xe   :  { %33 = vsyncpa [#allocation20], 0 }
   0xf   :  { %34 = vsyncpa [#allocation23], 0  ;;  %s9603_s3 = smov [#allocation4]  }
  0x10   :  { %s56_s28 = sshll.u32 %s9603_s3, 4  ;;  %s57_s28 = int_to_ptr.vmem [resolvable:$true] %s56_s28 }
  0x11   :  { %s9315_s29 = scalar_lea.vmem %s57_s28, 6144  ;;  %p9320_p1 = scmp.lt.s32.totalorder %s57_s28, %s57_s28 }
  0x12   :  { %p9316_p0 = scmp.ne.s32.totalorder %s57_s28, %s9315_s29  ;;  %p9321_p2 = scmp.lt.s32.totalorder %s9315_s29, %s9315_s29 }
  0x14   :  { %p9322_p3 = por %p9321_p2, %p9320_p1 }
  0x16   :  { %p9323_p4 = pnand %p9322_p3, %p9316_p0 }
  0x18   :  { %9326 = shalt.err (!%p9323_p4)
}
  0x19   :  { %s9604_s30 = smov 128   ;;  %s9605_s4 = smov 8  }
  0x1a   :  { %s11450_s1 = sld [smem:[#allocation71_spill]]  ;;  %s9606_s5 = smov [#allocation7]  }
  0x1b   :  { %s84_s24 = sshll.u32 %s9606_s5, 4  ;;  %s9607_s6 = smov [#allocation10]   ;;  %s85_s24 = int_to_ptr.vmem [resolvable:$true] %s84_s24 }
  0x1c   :  { %s108_s25 = sshll.u32 %s9607_s6, 4  ;;  %s9335_s26 = scalar_lea.vmem %s85_s24, 30720  ;;  %s109_s25 = int_to_ptr.vmem [resolvable:$true] %s108_s25 }
  0x1d   :  { %p9336_p5 = scmp.ne.s32.totalorder %s85_s24, %s9335_s26  ;;  %p9340_p6 = scmp.lt.s32.totalorder %s85_s24, %s85_s24 }
  0x1e   :  { %p9341_p7 = scmp.lt.s32.totalorder %s9335_s26, %s9335_s26 }
  0x20   :  { %62 = dma.hbm_to_vmem [thread:$0]  %s11450_s1, 6144, %s57_s28, [#allocation5], %s9604_s30, %s9604_s30, %s9605_s4  }
  0x21   :  { %p9342_p8 = por %p9341_p7, %p9340_p6 }
  0x23   :  { %p9343_p9 = pnand %p9342_p8, %p9336_p5 }
  0x25   :  { %9346 = shalt.err (!%p9343_p9)
}
  0x26   :  { %90 = dma.hbm_to_vmem [thread:$0]  %s11383_s7, 30720, %s85_s24, [#allocation8], %s9604_s30, %s9604_s30, %s9605_s4  }
  0x27   :  { %s9355_s3 = scalar_lea.vmem %s109_s25, 4096  ;;  %p9360_p11 = scmp.lt.s32.totalorder %s109_s25, %s109_s25 }
  0x28   :  { %p9356_p10 = scmp.ne.s32.totalorder %s109_s25, %s9355_s3  ;;  %p9361_p12 = scmp.lt.s32.totalorder %s9355_s3, %s9355_s3 }
  0x2a   :  { %p9362_p13 = por %p9361_p12, %p9360_p11 }
  0x2c   :  { %p9363_p0 = pnand %p9362_p13, %p9356_p10 }
  0x2e   :  { %9366 = shalt.err (!%p9363_p0)
}
  0x2f   :  { %114 = dma.hbm_to_vmem [thread:$0]  %s11385_s9, 4096, %s109_s25, [#allocation11], %s9604_s30, %s9604_s30, %s9605_s4  }
  0x30   :  { %s9608_s0 = smov [#allocation13]  }
  0x31   :  { %s133_s23 = sshll.u32 %s9608_s0, 4  ;;  %s134_s23 = int_to_ptr.vmem [resolvable:$true] %s133_s23 }
  0x32   :  { %s9375_s1 = scalar_lea.vmem %s134_s23, 16  ;;  %s9379_s7 = scalar_lea.vmem %s134_s23, 32 }
  0x33   :  { %p9376_p1 = scmp.ne.s32.totalorder %s134_s23, %s9375_s1  ;;  %p9380_p2 = scmp.lt.s32.totalorder %s134_s23, %s134_s23 }
  0x34   :  { %p9381_p3 = scmp.lt.s32.totalorder %s9379_s7, %s9375_s1 }
  0x36   :  { %p9382_p4 = por %p9381_p3, %p9380_p2 }
  0x38   :  { %p9383_p5 = pnand %p9382_p4, %p9376_p1 }
  0x3a   :  { %9386 = shalt.err (!%p9383_p5)
}
  0x3b   :  { %136 = dma.hbm_to_vmem [thread:$0]  %s11388_s12, 16, %s134_s23, [#allocation14]  }
  0x3c   :  { %s9609_s6 = smov [#allocation16]   ;;  %s9610_s2 = smov [#allocation19]  }
  0x3d   :  { %s154_s26 = sshll.u32 %s9609_s6, 4  ;;  %s178_s27 = sshll.u32 %s9610_s2, 4  ;;  %s155_s26 = int_to_ptr.vmem [resolvable:$true] %s154_s26  ;;  %s179_s27 = int_to_ptr.vmem [resolvable:$true] %s178_s27 }
  0x3e   :  { %s9395_s9 = scalar_lea.vmem %s155_s26, 320  ;;  %p9400_p7 = scmp.lt.s32.totalorder %s155_s26, %s155_s26 }
  0x3f   :  { %p9396_p6 = scmp.ne.s32.totalorder %s155_s26, %s9395_s9  ;;  %p9401_p8 = scmp.lt.s32.totalorder %s9395_s9, %s9395_s9 }
  0x41   :  { %p9402_p9 = por %p9401_p8, %p9400_p7 }
  0x43   :  { %p9403_p10 = pnand %p9402_p9, %p9396_p6 }
  0x45   :  { %9406 = shalt.err (!%p9403_p10)
}
  0x46   :  { %s9611_s25 = smov 64   ;;  %s9612_s3 = smov 4  }
  0x47   :  { %160 = dma.hbm_to_vmem [thread:$0]  %s11390_s14, 320, %s155_s26, [#allocation17], %s9611_s25, %s9611_s25, %s9612_s3  }
  0x48   :  { %s9415_s29 = scalar_lea.vmem %s179_s27, 2048  ;;  %p9420_p12 = scmp.lt.s32.totalorder %s179_s27, %s179_s27 }
  0x49   :  { %p9416_p11 = scmp.ne.s32.totalorder %s179_s27, %s9415_s29  ;;  %p9421_p13 = scmp.lt.s32.totalorder %s9415_s29, %s9415_s29 }
  0x4b   :  { %p9422_p0 = por %p9421_p13, %p9420_p12 }
  0x4d   :  { %p9423_p1 = pnand %p9422_p0, %p9416_p11 }
  0x4f   :  { %9426 = shalt.err (!%p9423_p1)
}
  0x50   :  { %184 = dma.hbm_to_vmem [thread:$0]  %s11392_s16, 2048, %s179_s27, [#allocation20], %s9604_s30, %s9604_s30, %s9605_s4  }
  0x51   :  { %s9613_s1 = smov [#allocation2]   ;;  %s9614_s5 = smov [#allocation6]  }
  0x52   :  { %s44_s7 = sshll.u32 %s9613_s1, 4  ;;  %s68_s24 = sshll.u32 %s9614_s5, 4  ;;  %s45_s7 = int_to_ptr.vmem [resolvable:$true] %s44_s7  ;;  %s69_s24 = int_to_ptr.vmem [resolvable:$true] %s68_s24 }
  0x53   :  { %s9435_s14 = scalar_lea.vmem %s45_s7, 1600  ;;  %p9440_p3 = scmp.lt.s32.totalorder %s45_s7, %s45_s7 }
  0x54   :  { %p9436_p2 = scmp.ne.s32.totalorder %s45_s7, %s9435_s14  ;;  %p9441_p4 = scmp.lt.s32.totalorder %s9435_s14, %s9435_s14 }
  0x56   :  { %p9442_p5 = por %p9441_p4, %p9440_p3 }
  0x58   :  { %p9443_p6 = pnand %p9442_p5, %p9436_p2 }
  0x5a   :  { %9446 = shalt.err (!%p9443_p6)
}
  0x5b   :  { %s11451_s2 = sld [smem:[#allocation70_spill]]  ;;  %s9455_s16 = scalar_lea.vmem %s69_s24, 6144 }
  0x5c   :  { %p9456_p7 = scmp.ne.s32.totalorder %s69_s24, %s9455_s16  ;;  %p9460_p8 = scmp.lt.s32.totalorder %s69_s24, %s69_s24 }
  0x5d   :  { %p9461_p9 = scmp.lt.s32.totalorder %s9455_s16, %s9455_s16 }
  0x5f   :  { %p9462_p10 = por %p9461_p9, %p9460_p8 }
  0x61   :  { %50 = dma.hbm_to_vmem [thread:$0]  %s11451_s2, 1600, %s45_s7, [#allocation3], %s9611_s25, %s9611_s25, %s9612_s3  }
  0x62   :  { %p9463_p11 = pnand %p9462_p10, %p9456_p7 }
  0x64   :  { %9466 = shalt.err (!%p9463_p11)
}
  0x65   :  { %s9615_s27 = smov 384   ;;  %s9616_s9 = smov 24  }
  0x66   :  { %s11452_s29 = sld [smem:[#allocation72_spill]]  ;;  %s9617_s0 = smov [#allocation9]  }
  0x67   :  { %s96_s23 = sshll.u32 %s9617_s0, 4  ;;  %s9618_s1 = smov [#allocation12]   ;;  %s97_s23 = int_to_ptr.vmem [resolvable:$true] %s96_s23 }
  0x68   :  { %s123_s5 = sshll.u32 %s9618_s1, 4  ;;  %s9475_s7 = scalar_lea.vmem %s97_s23, 640  ;;  %s124_s5 = int_to_ptr.vmem [resolvable:$true] %s123_s5 }
  0x69   :  { %p9476_p12 = scmp.ne.s32.totalorder %s97_s23, %s9475_s7  ;;  %p9480_p13 = scmp.lt.s32.totalorder %s97_s23, %s97_s23 }
  0x6a   :  { %p9481_p0 = scmp.lt.s32.totalorder %s9475_s7, %s9475_s7 }
  0x6c   :  { %74 = dma.hbm_to_vmem [thread:$0]  %s11452_s29, 6144, %s69_s24, [#allocation5], %s9615_s27, %s9615_s27, %s9616_s9  }
  0x6d   :  { %p9482_p1 = por %p9481_p0, %p9480_p13 }
  0x6f   :  { %p9483_p2 = pnand %p9482_p1, %p9476_p12 }
  0x71   :  { %9486 = shalt.err (!%p9483_p2)
}
  0x72   :  { %102 = dma.hbm_to_vmem [thread:$0]  %s11384_s8, 640, %s97_s23, [#allocation8], %s9611_s25, %s9611_s25, %s9612_s3  }
  0x73   :  { %s9495_s24 = scalar_lea.vmem %s124_s5, 16  ;;  %s9499_s26 = scalar_lea.vmem %s124_s5, 32 }
  0x74   :  { %p9496_p3 = scmp.ne.s32.totalorder %s124_s5, %s9495_s24  ;;  %p9500_p4 = scmp.lt.s32.totalorder %s124_s5, %s124_s5 }
  0x75   :  { %p9501_p5 = scmp.lt.s32.totalorder %s9499_s26, %s9495_s24 }
  0x77   :  { %p9502_p6 = por %p9501_p5, %p9500_p4 }
  0x79   :  { %p9503_p7 = pnand %p9502_p6, %p9496_p3 }
  0x7b   :  { %9506 = shalt.err (!%p9503_p7)
}
  0x7c   :  { %126 = dma.hbm_to_vmem [thread:$0]  %s11387_s11, 16, %s124_s5, [#allocation11]  }
  0x7d   :  { %s9619_s27 = smov [#allocation15]   ;;  %s9620_s28 = smov [#allocation18]  }
  0x7e   :  { %s142_s9 = sshll.u32 %s9619_s27, 4  ;;  %s166_s12 = sshll.u32 %s9620_s28, 4  ;;  %s143_s9 = int_to_ptr.vmem [resolvable:$true] %s142_s9  ;;  %s167_s12 = int_to_ptr.vmem [resolvable:$true] %s166_s12 }
  0x7f   :  { %s9515_s29 = scalar_lea.vmem %s143_s9, 10240  ;;  %p9520_p9 = scmp.lt.s32.totalorder %s143_s9, %s143_s9 }
  0x80   :  { %p9516_p8 = scmp.ne.s32.totalorder %s143_s9, %s9515_s29  ;;  %p9521_p10 = scmp.lt.s32.totalorder %s9515_s29, %s9515_s29 }
  0x82   :  { %p9522_p11 = por %p9521_p10, %p9520_p9 }
  0x84   :  { %p9523_p12 = pnand %p9522_p11, %p9516_p8 }
  0x86   :  { %9526 = shalt.err (!%p9523_p12)
}
  0x87   :  { %148 = dma.hbm_to_vmem [thread:$0]  %s11389_s13, 10240, %s143_s9, [#allocation14], %s9611_s25, %s9611_s25, %s9612_s3  }
  0x88   :  { %s9535_s11 = scalar_lea.vmem %s167_s12, 2048  ;;  %p9540_p0 = scmp.lt.s32.totalorder %s167_s12, %s167_s12 }
  0x89   :  { %p9536_p13 = scmp.ne.s32.totalorder %s167_s12, %s9535_s11  ;;  %p9541_p1 = scmp.lt.s32.totalorder %s9535_s11, %s9535_s11 }
  0x8b   :  { %p9542_p2 = por %p9541_p1, %p9540_p0 }
  0x8d   :  { %p9543_p3 = pnand %p9542_p2, %p9536_p13 }
  0x8f   :  { %9546 = shalt.err (!%p9543_p3)
}
  0x90   :  { %172 = dma.hbm_to_vmem [thread:$0]  %s11391_s15, 2048, %s167_s12, [#allocation17], %s9604_s30, %s9604_s30, %s9605_s4  }
  0x91   :  { %s9621_s5 = smov [#allocation21]   ;;  %s9622_s14 = smov [#allocation22]  }
  0x92   :  { %s194_s7 = sshll.u32 %s9621_s5, 4  ;;  %s209_s6 = sshll.u32 %s9622_s14, 4  ;;  %s195_s7 = int_to_ptr.vmem [resolvable:$true] %s194_s7  ;;  %s210_s6 = int_to_ptr.vmem [resolvable:$true] %s209_s6 }
  0x93   :  { %s9555_s13 = scalar_lea.vmem %s195_s7, 2048  ;;  %p9560_p5 = scmp.lt.s32.totalorder %s195_s7, %s195_s7 }
  0x94   :  { %p9556_p4 = scmp.ne.s32.totalorder %s195_s7, %s9555_s13  ;;  %p9561_p6 = scmp.lt.s32.totalorder %s9555_s13, %s9555_s13 }
  0x96   :  { %p9562_p7 = por %p9561_p6, %p9560_p5 }
  0x98   :  { %p9563_p8 = pnand %p9562_p7, %p9556_p4 }
  0x9a   :  { %9566 = shalt.err (!%p9563_p8)
}
  0x9b   :  { %200 = dma.hbm_to_vmem [thread:$0]  %s11395_s19, 2048, %s195_s7, [#allocation20], %s9611_s25, %s9611_s25, %s9612_s3  }
  0x9c   :  { %s9575_s15 = scalar_lea.vmem %s210_s6, 16  ;;  %s9579_s30 = scalar_lea.vmem %s210_s6, 32 }
  0x9d   :  { %p9576_p9 = scmp.ne.s32.totalorder %s210_s6, %s9575_s15  ;;  %p9580_p10 = scmp.lt.s32.totalorder %s210_s6, %s210_s6 }
  0x9e   :  { %p9581_p11 = scmp.lt.s32.totalorder %s9579_s30, %s9575_s15 }
  0xa0   :  { %p9582_p12 = por %p9581_p11, %p9580_p10 }
  0xa2   :  { %p9583_p13 = pnand %p9582_p12, %p9576_p9 }
  0xa4   :  { %9586 = shalt.err (!%p9583_p13)
}
  0xa5   :  { %212 = dma.hbm_to_vmem [thread:$0]  %s11397_s21, 16, %s210_s6, [#allocation23]  }
  0xa6   :  { %9587 = dma.done.wait [#allocation3], 1600  }
  0xa7   :  { %9588 = vsyncadd [#allocation3], 4294965696 }
  0xa8   :  { %9589 = dma.done.wait [#allocation5], 12288  }
  0xa9   :  { %9590 = vsyncadd [#allocation5], 4294955008 }
  0xaa   :  { %9591 = dma.done.wait [#allocation8], 31360  }
  0xab   :  { %9592 = vsyncadd [#allocation8], 4294935936 }
  0xac   :  { %9593 = dma.done.wait [#allocation11], 4112  }
  0xad   :  { %9594 = vsyncadd [#allocation11], 4294963184 }
  0xae   :  { %9595 = dma.done.wait [#allocation14], 10256  }
  0xaf   :  { %9596 = vsyncadd [#allocation14], 4294957040 }
  0xb0   :  { %9597 = dma.done.wait [#allocation17], 2368  }
  0xb1   :  { %9598 = vsyncadd [#allocation17], 4294964928 }
  0xb2   :  { %9599 = dma.done.wait [#allocation20], 4096  }
  0xb3   :  { %9600 = vsyncadd [#allocation20], 4294963200 }
  0xb4   :  { %9601 = dma.done.wait [#allocation23], 16  }
  0xb5   :  { %9602 = vsyncadd [#allocation23], 4294967280  ;;  %v11406_v0 = vmov 0.0   ;;  %vm9624_vm0 = vmmov 0   ;;  %s11453_s25 = sld [smem:[#allocation68_spill]]  ;;  %v8665_v16 = vld [vmem:[#allocation2] sm:$0xff]  }
  0xb6   :  { %8162 = vmatprep.subr.bf16.mxu0 %v11406_v0  ;;  %8184 = vmatprep.subr.bf16.mxu1 %v11406_v0  ;;  %v8666_v17 = vld [vmem:[#allocation2 + $0x14] sm:$0xff]   ;;  %vm289_vm1 = vcmask 654336   ;;  %v8667_v18 = vld [vmem:[#allocation2 + $0x8] sm:$0xff]   ;;  %v8668_v19 = vld [vmem:[#allocation2 + $0x1c] sm:$0xff]   ;;  %s11454_s30 = sld [smem:[#allocation69_spill]]  ;;  %vm2691_vm2 = vcmask 1043456  }
  0xb7   :  { %8172 = vmatprep.mubr.msk.bf16.mxu0 %vm9624_vm0, %v11406_v0  ;;  %8194 = vmatprep.mubr.msk.bf16.mxu1 %vm9624_vm0, %v11406_v0  ;;  %v8669_v20 = vld [vmem:[#allocation2 + $0x10] ss:$0 sps:$4 sm:$0xff]   ;;  %v8670_v21 = vld [vmem:[#allocation2 + $0x24] ss:$0 sps:$4 sm:$0xff]   ;;  %v8671_v23 = vld [vmem:[#allocation2 + $0x28] sm:$0xff]   ;;  %s11515_s11 = sld [smem:[#allocation73_spill]] }
  0xb8   :  { %v8672_v24 = vld [vmem:[#allocation2 + $0x3c] sm:$0xff]   ;;  %v8673_v28 = vld [vmem:[#allocation2 + $0x30] sm:$0xff]   ;;  %v8674_v29 = vld [vmem:[#allocation2 + $0x44] sm:$0xff]   ;;  %s11516_s5 = sld [smem:[#allocation74_spill]]  ;;  %vm2687_vm3 = vcmask 326656   ;;  %vm5385_vm4 = vcmask 130048  }
  0xb9   :  { %v8675_v33 = vld [vmem:[#allocation2 + $0x38] ss:$0 sps:$4 sm:$0xff]   ;;  %v8676_v34 = vld [vmem:[#allocation2 + $0x4c] ss:$0 sps:$4 sm:$0xff]   ;;  %v8677_v40 = vld [vmem:[#allocation2 + $0x50] sm:$0xff]   ;;  %vm6814_vm5 = vcmask 64512  }
  0xba   :  { %v8678_v49 = vld [vmem:[#allocation2 + $0x58] sm:$0xff]   ;;  %v8679_v58 = vld [vmem:[#allocation2 + $0x60] ss:$0 sps:$4 sm:$0xff]  }
  0xbb   :  { %v264_v1 = vld [vmem:[%s11453_s25 + $0x40] sm:$0xff]  ;;  %v265_v2 = vld [vmem:[%s11453_s25 + $0x48] sm:$0xff]  ;;  %v262_v3 = vld [vmem:[%s11453_s25 + $0x30] sm:$0xff] }
  0xbc   :  { %v9828_v4 = vpack.c.bf16 %v265_v2, %v264_v1  ;;  %v263_v5 = vld [vmem:[%s11453_s25 + $0x38] sm:$0xff]  ;;  %v260_v7 = vld [vmem:[%s11453_s25 + $0x20] sm:$0xff]  ;;  %v261_v8 = vld [vmem:[%s11453_s25 + $0x28] sm:$0xff] }
  0xbd   :  { %v9835_v6 = vpack.c.bf16 %v263_v5, %v262_v3  ;;  %v9847_v9 = vpack.c.bf16 %v261_v8, %v260_v7  ;;  %v258_v10 = vld [vmem:[%s11453_s25 + $0x10] sm:$0xff]  ;;  %v259_v11 = vld [vmem:[%s11453_s25 + $0x18] sm:$0xff]  ;;  %v256_v13 = vld [vmem:[%s11453_s25] sm:$0xff] }
  0xbe   :  { %8163 = vmatpush3.bf16.msra.mxu0 %v9828_v4  ;;  %8185 = vmatpush3.bf16.msra.mxu1 %v9828_v4  ;;  %v9859_v12 = vpack.c.bf16 %v259_v11, %v258_v10  ;;  %v257_v14 = vld [vmem:[%s11453_s25 + $0x8] sm:$0xff]  ;;  %v8685_v26 = vld [vmem:[%s11454_s30 + $0x94] ss:$12 sps:$4 sm:$0xff]   ;;  %v8683_v27 = vld [vmem:[%s11454_s30 + $0x90] ss:$12 sps:$4 sm:$0xff]  }
  0xbf   :  { %8164 = vmatprep.subr.bf16.mxu0 %v11406_v0  ;;  %8186 = vmatprep.subr.bf16.mxu1 %v11406_v0  ;;  %v9871_v15 = vpack.c.bf16 %v257_v14, %v256_v13  ;;  %v8682_v22 = vld [vmem:[%s11454_s30 + $0xac] ss:$12 sps:$4 sm:$0xff]   ;;  %v8680_v25 = vld [vmem:[%s11454_s30 + $0xa8] ss:$12 sps:$4 sm:$0xff]   ;;  %v8691_v32 = vld [vmem:[%s11454_s30 + $0x64] ss:$12 sps:$4 sm:$0xff]  }
  0xc0   :  { %v8688_v30 = vld [vmem:[%s11454_s30 + $0x7c] ss:$12 sps:$4 sm:$0xff]   ;;  %v8686_v31 = vld [vmem:[%s11454_s30 + $0x78] ss:$12 sps:$4 sm:$0xff]   ;;  %v8689_v35 = vld [vmem:[%s11454_s30 + $0x60] ss:$12 sps:$4 sm:$0xff]  }
  0xc1   :  { %v8700_v36 = vld [vmem:[%s11454_s30 + $0x22c] ss:$12 sps:$4 sm:$0xff]   ;;  %v8692_v38 = vld [vmem:[%s11454_s30 + $0x48] ss:$12 sps:$4 sm:$0xff]   ;;  %v8695_v42 = vld [vmem:[%s11454_s30 + $0x30] ss:$12 sps:$4 sm:$0xff]  }
  0xc2   :  { %8165 = vmatpush3.bf16.msra.mxu0 %v9835_v6  ;;  %8187 = vmatpush3.bf16.msra.mxu1 %v9835_v6  ;;  %v8694_v37 = vld [vmem:[%s11454_s30 + $0x4c] ss:$12 sps:$4 sm:$0xff]   ;;  %v8697_v39 = vld [vmem:[%s11454_s30 + $0x34] ss:$12 sps:$4 sm:$0xff]   ;;  %v8703_v44 = vld [vmem:[%s11454_s30 + $0x1c] ss:$12 sps:$4 sm:$0xff]  }
  0xc3   :  { %8166 = vmatprep.subr.bf16.mxu0 %v11406_v0  ;;  %8188 = vmatprep.subr.bf16.mxu1 %v11406_v0  ;;  %v8698_v41 = vld [vmem:[%s11454_s30 + $0x228] ss:$12 sps:$4 sm:$0xff]   ;;  %v8704_v45 = vld [vmem:[%s11454_s30 + $0x210] ss:$12 sps:$4 sm:$0xff]   ;;  %v8701_v46 = vld [vmem:[%s11454_s30 + $0x18] ss:$12 sps:$4 sm:$0xff]  }
  0xc4   :  { %v8706_v43 = vld [vmem:[%s11454_s30 + $0x214] ss:$12 sps:$4 sm:$0xff]   ;;  %v8712_v47 = vld [vmem:[%s11454_s30 + $0x1fc] ss:$12 sps:$4 sm:$0xff]   ;;  %v8709_v48 = vld [vmem:[%s11454_s30 + $0x4] ss:$12 sps:$4 sm:$0xff]  }
  0xc5   :  { %v8710_v50 = vld [vmem:[%s11454_s30 + $0x1f8] ss:$12 sps:$4 sm:$0xff]   ;;  %v8707_v51 = vld [vmem:[%s11454_s30] ss:$12 sps:$4 sm:$0xff]   ;;  %v8713_v55 = vld [vmem:[%s11454_s30 + $0x168] ss:$12 sps:$4 sm:$0xff]  }
  0xc6   :  { %8167 = vmatpush3.bf16.msra.mxu0 %v9847_v9  ;;  %8189 = vmatpush3.bf16.msra.mxu1 %v9847_v9  ;;  %v8718_v52 = vld [vmem:[%s11454_s30 + $0x1e4] ss:$12 sps:$4 sm:$0xff]   ;;  %v8715_v53 = vld [vmem:[%s11454_s30 + $0x16c] ss:$12 sps:$4 sm:$0xff]   ;;  %v8721_v57 = vld [vmem:[%s11454_s30 + $0x154] ss:$12 sps:$4 sm:$0xff]  }
  0xc7   :  { %8168 = vmatprep.subr.bf16.mxu0 %v11406_v0  ;;  %8190 = vmatprep.subr.bf16.mxu1 %v11406_v0  ;;  %v8716_v54 = vld [vmem:[%s11454_s30 + $0x1e0] ss:$12 sps:$4 sm:$0xff]   ;;  %v8722_v59 = vld [vmem:[%s11454_s30 + $0x1c8] ss:$12 sps:$4 sm:$0xff]   ;;  %v8719_v60 = vld [vmem:[%s11454_s30 + $0x150] ss:$12 sps:$4 sm:$0xff]  }
  0xc8   :  { %v8724_v56 = vld [vmem:[%s11454_s30 + $0x1cc] ss:$12 sps:$4 sm:$0xff]   ;;  %v8730_v61 = vld [vmem:[%s11454_s30 + $0x1b4] ss:$12 sps:$4 sm:$0xff]   ;;  %v8727_v62 = vld [vmem:[%s11454_s30 + $0x13c] ss:$12 sps:$4 sm:$0xff]  }
  0xc9   :  { %v8725_v63 = vld [vmem:[%s11454_s30 + $0x138] ss:$12 sps:$4 sm:$0xff]   ;;  %v8728_v1 = vld [vmem:[%s11454_s30 + $0x1b0] ss:$12 sps:$4 sm:$0xff]   ;;  %v8731_v5 = vld [vmem:[%s11454_s30 + $0x120] ss:$12 sps:$4 sm:$0xff]  }
  0xca   :  { %8169 = vmatpush3.bf16.msra.mxu0 %v9859_v12  ;;  %8191 = vmatpush3.bf16.msra.mxu1 %v9859_v12  ;;  %v8733_v2 = vld [vmem:[%s11454_s30 + $0x124] ss:$12 sps:$4 sm:$0xff]   ;;  %v8736_v3 = vld [vmem:[%s11454_s30 + $0x19c] ss:$12 sps:$4 sm:$0xff]   ;;  %v8740_v8 = vld [vmem:[%s11454_s30 + $0x180] ss:$12 sps:$4 sm:$0xff]  }
  0xcb   :  { %8170 = vmatprep.subr.bf16.mxu0 %v11406_v0  ;;  %8192 = vmatprep.subr.bf16.mxu1 %v11406_v0  ;;  %v8742_v7 = vld [vmem:[%s11454_s30 + $0x184] ss:$12 sps:$4 sm:$0xff]   ;;  %v8745_v10 = vld [vmem:[%s11454_s30 + $0xf4] ss:$12 sps:$4 sm:$0xff]   ;;  %v8748_v11 = vld [vmem:[%s11454_s30 + $0x2ec] ss:$12 sps:$4 sm:$0xff]  }
  0xcc   :  { %v8743_v13 = vld [vmem:[%s11454_s30 + $0xf0] ss:$12 sps:$4 sm:$0xff]  }
  0xcd   :  { %v8751_v14 = vld [vmem:[%s11454_s30 + $0xdc] ss:$12 sps:$4 sm:$0xff]  }
  0xce   :  { %8171 = vmatpush3.bf16.msra.mxu0 %v9871_v15  ;;  %8193 = vmatpush3.bf16.msra.mxu1 %v9871_v15 }
  0xcf   :  { %8228 = vmatprep.subr.bf16.mxu1 %v11406_v0  ;;  %8206 = vmatprep.subr.bf16.mxu0 %v11406_v0 }
  0xd1   :  { %8173 = vmatmul.mubr.msk.bf16.vlgmr.msra.gmra.mxu0 %vm289_vm1, %v8665_v16  ;;  %8195 = vmatmul.mubr.msk.bf16.vlgmr.msra.gmra.mxu1 %vm289_vm1, %v8666_v17  ;;  %v8752_v16 = vld [vmem:[%s11454_s30 + $0x2d0] ss:$12 sps:$4 sm:$0xff]   ;;  %v8749_v17 = vld [vmem:[%s11454_s30 + $0xd8] ss:$12 sps:$4 sm:$0xff]  }
  0xd2   :  { %8229 = vmatpush3.bf16.msra.mxu1 %v9828_v4  ;;  %8207 = vmatpush3.bf16.msra.mxu0 %v9828_v4 }
  0xd3   :  { %8230 = vmatprep.subr.bf16.mxu1 %v11406_v0  ;;  %8208 = vmatprep.subr.bf16.mxu0 %v11406_v0 }
  0xd4   :  { %8176 = vmatprep.mubr.msk.bf16.mxu0 %vm9624_vm0, %v11406_v0  ;;  %8198 = vmatprep.mubr.msk.bf16.mxu1 %vm9624_vm0, %v11406_v0 }
  0xd6   :  { %8231 = vmatpush3.bf16.msra.mxu1 %v9835_v6  ;;  %8209 = vmatpush3.bf16.msra.mxu0 %v9835_v6 }
  0xd7   :  { %8232 = vmatprep.subr.bf16.mxu1 %v11406_v0  ;;  %8210 = vmatprep.subr.bf16.mxu0 %v11406_v0 }
  0xd9   :  { %8177 = vmatmul.mubr.msk.bf16.gmra.mxu0 %vm289_vm1, %v8667_v18  ;;  %8199 = vmatmul.mubr.msk.bf16.gmra.mxu1 %vm289_vm1, %v8668_v19  ;;  %v8757_v18 = vld [vmem:[%s11454_s30 + $0xc4] ss:$12 sps:$4 sm:$0xff]   ;;  %v8760_v19 = vld [vmem:[%s11454_s30 + $0x2bc] ss:$12 sps:$4 sm:$0xff]  }
  0xda   :  { %8233 = vmatpush3.bf16.msra.mxu1 %v9847_v9  ;;  %8211 = vmatpush3.bf16.msra.mxu0 %v9847_v9 }
  0xdb   :  { %8180 = vmatprep.mubr.msk.bf16.mxu0 %vm9624_vm0, %v11406_v0  ;;  %8202 = vmatprep.mubr.msk.bf16.mxu1 %vm9624_vm0, %v11406_v0 }
  0xdc   :  { %8234 = vmatprep.subr.bf16.mxu1 %v11406_v0  ;;  %8212 = vmatprep.subr.bf16.mxu0 %v11406_v0 }
  0xde   :  { %8235 = vmatpush3.bf16.msra.mxu1 %v9859_v12  ;;  %8213 = vmatpush3.bf16.msra.mxu0 %v9859_v12 }
  0xdf   :  { %8214 = vmatprep.subr.bf16.mxu0 %v11406_v0  ;;  %8236 = vmatprep.subr.bf16.mxu1 %v11406_v0 }
  0xe1   :  { %8181 = vmatmul.mubr.msk.bf16.gmra.mxu0 %vm289_vm1, %v8669_v20  ;;  %8203 = vmatmul.mubr.msk.bf16.gmra.mxu1 %vm289_vm1, %v8670_v21  ;;  %v8755_v20 = vld [vmem:[%s11454_s30 + $0xc0] ss:$12 sps:$4 sm:$0xff]   ;;  %v8758_v21 = vld [vmem:[%s11454_s30 + $0x2b8] ss:$12 sps:$4 sm:$0xff]  }
  0xe2   :  { %8215 = vmatpush3.bf16.msra.mxu0 %v9871_v15  ;;  %8237 = vmatpush3.bf16.msra.mxu1 %v9871_v15 }
  0xe3   :  { %8216 = vmatprep.mubr.msk.bf16.mxu0 %vm9624_vm0, %v11406_v0  ;;  %8238 = vmatprep.mubr.msk.bf16.mxu1 %vm9624_vm0, %v11406_v0 }
  0xe4   :  { %8250 = vmatprep.subr.bf16.mxu0 %v11406_v0  ;;  %1506 = vmatprep.subr.bf16.mxu1 %v8682_v22  ;;  %v8763_v22 = vld [vmem:[%s11454_s30 + $0x2a4] ss:$12 sps:$4 sm:$0xff]  }
  0xe9   :  { %8217 = vmatmul.mubr.msk.bf16.vlgmr.msra.gmra.mxu0 %vm289_vm1, %v8671_v23  ;;  %8239 = vmatmul.mubr.msk.bf16.vlgmr.msra.gmra.mxu1 %vm289_vm1, %v8672_v24  ;;  %v8772_v23 = vld [vmem:[%s11454_s30 + $0x3ac] ss:$12 sps:$4 sm:$0xff]  }
  0xea   :  { %8251 = vmatpush3.bf16.msra.mxu0 %v9828_v4  ;;  %8220 = vmatprep.mubr.msk.bf16.mxu0 %vm9624_vm0, %v11406_v0  ;;  %v8734_v4 = vld [vmem:[%s11454_s30 + $0x198] ss:$12 sps:$4 sm:$0xff]   ;;  %v8761_v24 = vld [vmem:[%s11454_s30 + $0x2a0] ss:$12 sps:$4 sm:$0xff]  }
  0xeb   :  { %8242 = vmatprep.mubr.msk.bf16.mxu1 %vm9624_vm0, %v11406_v0  ;;  %8252 = vmatprep.subr.bf16.mxu0 %v11406_v0 }
  0xec   :  { %1507 = vmatpush1.bf16.msra.mxu1 %v8680_v25  ;;  %v8766_v25 = vld [vmem:[%s11454_s30 + $0x28c] ss:$12 sps:$4 sm:$0xff]  }
  0xed   :  { %1508 = vmatprep.subr.bf16.mxu1 %v8685_v26  ;;  %v8764_v26 = vld [vmem:[%s11454_s30 + $0x288] ss:$12 sps:$4 sm:$0xff]  }
  0xee   :  { %8253 = vmatpush3.bf16.msra.mxu0 %v9835_v6  ;;  %v8739_v6 = vld [vmem:[%s11454_s30 + $0x10c] ss:$12 sps:$4 sm:$0xff]  }
  0xef   :  { %8254 = vmatprep.subr.bf16.mxu0 %v11406_v0 }
  0xf0   :  { %1509 = vmatpush1.bf16.msra.mxu1 %v8683_v27  ;;  %v8769_v27 = vld [vmem:[%s11454_s30 + $0x274] ss:$12 sps:$4 sm:$0xff]  }
  0xf1   :  { %8221 = vmatmul.mubr.msk.bf16.gmra.mxu0 %vm289_vm1, %v8673_v28  ;;  %8243 = vmatmul.mubr.msk.bf16.gmra.mxu1 %vm289_vm1, %v8674_v29  ;;  %v8767_v28 = vld [vmem:[%s11454_s30 + $0x270] ss:$12 sps:$4 sm:$0xff]  }
  0xf2   :  { %8255 = vmatpush3.bf16.msra.mxu0 %v9847_v9  ;;  %8224 = vmatprep.mubr.msk.bf16.mxu0 %vm9624_vm0, %v11406_v0  ;;  %v8737_v9 = vld [vmem:[%s11454_s30 + $0x108] ss:$12 sps:$4 sm:$0xff]  }
  0xf3   :  { %8256 = vmatprep.subr.bf16.mxu0 %v11406_v0  ;;  %8246 = vmatprep.mubr.msk.bf16.mxu1 %vm9624_vm0, %v11406_v0  ;;  %v8775_v29 = vld [vmem:[%s11454_s30 + $0x25c] ss:$12 sps:$4 sm:$0xff]  }
  0xf4   :  { %1510 = vmatprep.subr.bf16.mxu1 %v8688_v30  ;;  %v8773_v30 = vld [vmem:[%s11454_s30 + $0x258] ss:$12 sps:$4 sm:$0xff]  }
  0xf5   :  { %1511 = vmatpush1.bf16.msra.mxu1 %v8686_v31  ;;  %v8781_v31 = vld [vmem:[%s11454_s30 + $0x244] ss:$12 sps:$4 sm:$0xff]  }
  0xf6   :  { %8257 = vmatpush3.bf16.msra.mxu0 %v9859_v12  ;;  %1512 = vmatprep.subr.bf16.mxu1 %v8691_v32  ;;  %v8746_v12 = vld [vmem:[%s11454_s30 + $0x2e8] ss:$12 sps:$4 sm:$0xff]   ;;  %v8779_v32 = vld [vmem:[%s11454_s30 + $0x240] ss:$12 sps:$4 sm:$0xff]  }
  0xf7   :  { %8258 = vmatprep.subr.bf16.mxu0 %v11406_v0 }
  0xf9   :  { %8225 = vmatmul.mubr.msk.bf16.gmra.mxu0 %vm289_vm1, %v8675_v33  ;;  %8247 = vmatmul.mubr.msk.bf16.gmra.mxu1 %vm289_vm1, %v8676_v34  ;;  %v8785_v33 = vld [vmem:[%s11454_s30 + $0x170] ss:$12 sps:$4 sm:$0xff]  }
  0xfa   :  { %8259 = vmatpush3.bf16.msra.mxu0 %v9871_v15  ;;  %8260 = vmatprep.mubr.msk.bf16.mxu0 %vm9624_vm0, %v11406_v0  ;;  %v8754_v15 = vld [vmem:[%s11454_s30 + $0x2d4] ss:$12 sps:$4 sm:$0xff]  }
  0xfb   :  { %1513 = vmatpush1.bf16.msra.mxu1 %v8689_v35  ;;  %1567 = vmatprep.subr.bf16.mxu0 %v8700_v36 }
  0xfc   :  { %1514 = vmatprep.subr.bf16.mxu1 %v8694_v37 }
  0xff   :  { %1515 = vmatpush1.bf16.msra.mxu1 %v8692_v38  ;;  %v8770_v38 = vld [vmem:[%s11454_s30 + $0x3a8] ss:$12 sps:$4 sm:$0xff]  }
 0x100   :  { %1516 = vmatprep.subr.bf16.mxu1 %v8697_v39 }
 0x101   :  { %8261 = vmatmul.mubr.msk.bf16.vlgmr.msra.gmra.mxu0 %vm289_vm1, %v8677_v40 }
 0x102   :  { %8264 = vmatprep.mubr.msk.bf16.mxu0 %vm9624_vm0, %v11406_v0  ;;  %1568 = vmatpush1.bf16.msra.mxu0 %v8698_v41  ;;  %v8778_v41 = vld [vmem:[%s11454_s30 + $0x394] ss:$12 sps:$4 sm:$0xff]  }
 0x103   :  { %1517 = vmatpush1.bf16.msra.mxu1 %v8695_v42  ;;  %1569 = vmatprep.subr.bf16.mxu0 %v8706_v43 }
 0x104   :  { %1518 = vmatprep.subr.bf16.mxu1 %v8703_v44 }
 0x106   :  { %1570 = vmatpush1.bf16.msra.mxu0 %v8704_v45 }
 0x107   :  { %1519 = vmatpush1.bf16.msra.mxu1 %v8701_v46  ;;  %1571 = vmatprep.subr.bf16.mxu0 %v8712_v47  ;;  %v8776_v46 = vld [vmem:[%s11454_s30 + $0x390] ss:$12 sps:$4 sm:$0xff]  }
 0x108   :  { %1520 = vmatprep.subr.bf16.mxu1 %v8709_v48 }
 0x109   :  { %8265 = vmatmul.mubr.msk.bf16.gmra.mxu0 %vm289_vm1, %v8678_v49  ;;  %v8784_v49 = vld [vmem:[%s11454_s30 + $0x37c] ss:$12 sps:$4 sm:$0xff]  }
 0x10a   :  { %8268 = vmatprep.mubr.msk.bf16.mxu0 %vm9624_vm0, %v11406_v0  ;;  %1572 = vmatpush1.bf16.msra.mxu0 %v8710_v50 }
 0x10b   :  { %1521 = vmatpush1.bf16.msra.mxu1 %v8707_v51  ;;  %1573 = vmatprep.subr.bf16.mxu0 %v8718_v52  ;;  %v8782_v52 = vld [vmem:[%s11454_s30 + $0x378] ss:$12 sps:$4 sm:$0xff]  }
 0x10c   :  { %1522 = vmatprep.subr.bf16.mxu1 %v8715_v53 }
 0x10e   :  { %1574 = vmatpush1.bf16.msra.mxu0 %v8716_v54 }
 0x10f   :  { %1523 = vmatpush2.bf16.msra.mxu1 %v8713_v55  ;;  %1575 = vmatprep.subr.bf16.mxu0 %v8724_v56  ;;  %v8789_v55 = vld [vmem:[%s11454_s30 + $0x364] ss:$12 sps:$4 sm:$0xff]  }
 0x110   :  { %1524 = vmatprep.subr.bf16.mxu1 %v8721_v57 }
 0x111   :  { %8269 = vmatmul.mubr.msk.bf16.gmra.mxu0 %vm289_vm1, %v8679_v58 }
 0x112   :  { %1576 = vmatpush1.bf16.msra.mxu0 %v8722_v59 }
 0x113   :  { %1525 = vmatpush2.bf16.msra.mxu1 %v8719_v60  ;;  %1577 = vmatprep.subr.bf16.mxu0 %v8730_v61  ;;  %v8787_v60 = vld [vmem:[%s11454_s30 + $0x360] ss:$12 sps:$4 sm:$0xff]  }
 0x114   :  { %1526 = vmatprep.subr.bf16.mxu1 %v8727_v62 }
 0x116   :  { %1578 = vmatpush1.bf16.msra.mxu0 %v8728_v1 }
 0x117   :  { %1527 = vmatpush2.bf16.msra.mxu1 %v8725_v63  ;;  %1579 = vmatprep.subr.bf16.mxu0 %v8736_v3  ;;  %v8794_v63 = vld [vmem:[%s11454_s30 + $0x34c] ss:$12 sps:$4 sm:$0xff]  }
 0x118   :  { %1528 = vmatprep.subr.bf16.mxu1 %v8733_v2 }
 0x11a   :  { %1580 = vmatpush1.bf16.msra.mxu0 %v8734_v4  ;;  %v8792_v4 = vld [vmem:[%s11454_s30 + $0x348] ss:$12 sps:$4 sm:$0xff]  }
 0x11b   :  { %1529 = vmatpush2.bf16.msra.mxu1 %v8731_v5  ;;  %1581 = vmatprep.subr.bf16.mxu0 %v8742_v7  ;;  %v8799_v7 = vld [vmem:[%s11454_s30 + $0x334] ss:$12 sps:$4 sm:$0xff]  }
 0x11c   :  { %1530 = vmatprep.subr.bf16.mxu1 %v8739_v6 }
 0x11e   :  { %1582 = vmatpush1.bf16.msra.mxu0 %v8740_v8 }
 0x11f   :  { %1531 = vmatpush2.bf16.msra.mxu1 %v8737_v9  ;;  %1583 = vmatprep.subr.bf16.mxu0 %v8748_v11  ;;  %v8797_v11 = vld [vmem:[%s11454_s30 + $0x330] ss:$12 sps:$4 sm:$0xff]  }
 0x120   :  { %1532 = vmatprep.subr.bf16.mxu1 %v8745_v10 }
 0x122   :  { %1584 = vmatpush2.bf16.msra.mxu0 %v8746_v12 }
 0x123   :  { %1533 = vmatpush2.bf16.msra.mxu1 %v8743_v13  ;;  %1585 = vmatprep.subr.bf16.mxu0 %v8754_v15  ;;  %v11401_v15 = vmov 0  }
 0x124   :  { %1534 = vmatprep.subr.bf16.mxu1 %v8751_v14  ;;  %v8804_v14 = vld [vmem:[%s11454_s30 + $0x31c] ss:$12 sps:$4 sm:$0xff]  }
 0x126   :  { %1586 = vmatpush2.bf16.msra.mxu0 %v8752_v16 }
 0x127   :  { %1535 = vmatpush2.bf16.msra.mxu1 %v8749_v17  ;;  %1587 = vmatprep.subr.bf16.mxu0 %v8760_v19  ;;  %v8802_v19 = vld [vmem:[%s11454_s30 + $0x318] ss:$12 sps:$4 sm:$0xff]  }
 0x128   :  { %1536 = vmatprep.subr.bf16.mxu1 %v8757_v18  ;;  %v8786_v18 = vld [vmem:[%s11454_s30 + $0xb0] ss:$12 sps:$4 sm:$0xff]  }
 0x12a   :  { %1588 = vmatpush2.bf16.msra.mxu0 %v8758_v21 }
 0x12b   :  { %1537 = vmatpush2.bf16.msra.mxu1 %v8755_v20  ;;  %1589 = vmatprep.subr.bf16.mxu0 %v8763_v22  ;;  %v8790_v22 = vld [vmem:[%s11454_s30 + $0x158] ss:$12 sps:$4 sm:$0xff]  }
 0x12c   :  { %1628 = vmatprep.subr.bf16.mxu1 %v8772_v23  ;;  %v8809_v23 = vld [vmem:[%s11454_s30 + $0x304] ss:$12 sps:$4 sm:$0xff]  }
 0x12e   :  { %1590 = vmatpush2.bf16.msra.mxu0 %v8761_v24 }
 0x12f   :  { %1591 = vmatprep.subr.bf16.mxu0 %v8766_v25 }
 0x132   :  { %1592 = vmatpush2.bf16.msra.mxu0 %v8764_v26 }
 0x133   :  { %1593 = vmatprep.subr.bf16.mxu0 %v8769_v27 }
 0x136   :  { %1594 = vmatpush2.bf16.msra.mxu0 %v8767_v28  ;;  %v8791_v28 = vld [vmem:[%s11454_s30 + $0x98] ss:$12 sps:$4 sm:$0xff]  }
 0x137   :  { %1595 = vmatprep.subr.bf16.mxu0 %v8775_v29  ;;  %v8807_v29 = vld [vmem:[%s11454_s30 + $0x300] ss:$12 sps:$4 sm:$0xff]  }
 0x13a   :  { %1596 = vmatpush2.bf16.msra.mxu0 %v8773_v30 }
 0x13b   :  { %1597 = vmatprep.subr.bf16.mxu0 %v8781_v31 }
 0x13e   :  { %1598 = vmatpush2.bf16.msra.mxu0 %v8779_v32  ;;  %v8795_v32 = vld [vmem:[%s11454_s30 + $0x140] ss:$12 sps:$4 sm:$0xff]  }
 0x13f   :  { %7651 = vmatprep.subr.bf16.mxu0 %v8785_v33  ;;  %v8812_v33 = vld [vmem:[%s11454_s30 + $0x2f0] ss:$12 sps:$4 sm:$0xff]  }
 0x191   :  { %v333_v34 = vpop.f32.mrf.mxu0  ;;  %v417_v35 = vpop.f32.mrf.mxu1 }
 0x193   :  { %v8174_v36 = vpop.f32.mrf.mxu0  ;;  %v8196_v37 = vpop.f32.mrf.mxu1 }
 0x194   :  { %v8796_v36 = vld [vmem:[%s11454_s30 + $0x80] ss:$12 sps:$4 sm:$0xff]  }
 0x195   :  { %v336_v39 = vpop.f32.mrf.mxu0  ;;  %v420_v40 = vpop.f32.mrf.mxu1 }
 0x196   :  { %v10152_v42 = vpack.c.bf16 %v336_v39, %v333_v34  ;;  %v10154_v43 = vpack.c.bf16 %v420_v40, %v417_v35  ;;  %v8800_v39 = vld [vmem:[%s11454_s30 + $0x128] ss:$12 sps:$4 sm:$0xff]  }
 0x197   :  { %v8175_v44 = vpop.f32.mrf.mxu0  ;;  %v8197_v45 = vpop.f32.mrf.mxu1 }
 0x198   :  { %1538 = vmatprep.mubr.bf16.mxu1 %v10154_v43 }
 0x199   :  { %v341_v47 = vpop.f32.mrf.mxu0  ;;  %v425_v48 = vpop.f32.mrf.mxu1  ;;  %1539 = vmatmul.mubr.bf16.vlgmr.msra.gmra.mxu1 %v10152_v42 }
 0x19a   :  { %1629 = vmatpush1.bf16.msra.mxu1 %v8770_v38 }
 0x19b   :  { %v8178_v50 = vpop.f32.mrf.mxu0  ;;  %v8200_v51 = vpop.f32.mrf.mxu1  ;;  %1630 = vmatprep.subr.bf16.mxu1 %v8778_v41 }
 0x19d   :  { %v344_v53 = vpop.f32.mrf.mxu0  ;;  %v428_v54 = vpop.f32.mrf.mxu1 }
 0x19e   :  { %v10170_v56 = vpack.c.bf16 %v344_v53, %v341_v47  ;;  %v10172_v57 = vpack.c.bf16 %v428_v54, %v425_v48  ;;  %1631 = vmatpush1.bf16.msra.mxu1 %v8776_v46  ;;  %v8801_v46 = vld [vmem:[%s11454_s30 + $0x68] ss:$12 sps:$4 sm:$0xff]  }
 0x19f   :  { %v8179_v58 = vpop.f32.mrf.mxu0  ;;  %v8201_v59 = vpop.f32.mrf.mxu1  ;;  %1632 = vmatprep.subr.bf16.mxu1 %v8784_v49  ;;  %v8805_v49 = vld [vmem:[%s11454_s30 + $0x110] ss:$12 sps:$4 sm:$0xff]  }
 0x1a0   :  { %1548 = vmatprep.mubr.bf16.mxu1 %v10172_v57 }
 0x1a1   :  { %v349_v61 = vpop.f32.mrf.mxu0  ;;  %v433_v62 = vpop.f32.mrf.mxu1  ;;  %1549 = vmatmul.mubr.bf16.gmra.mxu1 %v10170_v56 }
 0x1a2   :  { %v10182_v1 = vpack.c.bf16 %v433_v62, %v433_v62  ;;  %1633 = vmatpush1.bf16.msra.mxu1 %v8782_v52  ;;  %v10191_v8 = vpack.c.bf16 %v349_v61, %v349_v61 }
 0x1a3   :  { %v8182_v2 = vpop.f32.mrf.mxu0  ;;  %v8204_v3 = vpop.f32.mrf.mxu1  ;;  %1634 = vmatprep.subr.bf16.mxu1 %v8789_v55  ;;  %v8806_v55 = vld [vmem:[%s11454_s30 + $0x50] ss:$12 sps:$4 sm:$0xff]  }
 0x1a4   :  { %1558 = vmatprep.mubr.bf16.mxu1 %v10182_v1  ;;  %v8813_v3 = vld [vmem:[%s11454_s30 + $0xe0] ss:$12 sps:$4 sm:$0xff]  }
 0x1a5   :  { %v352_v5 = vpop.f32.mrf.mxu0  ;;  %v436_v6 = vpop.f32.mrf.mxu1 }
 0x1a6   :  { %1635 = vmatpush1.bf16.msra.mxu1 %v8787_v60  ;;  %v8810_v60 = vld [vmem:[%s11454_s30 + $0xf8] ss:$12 sps:$4 sm:$0xff]   ;;  %v8814_v5 = vld [vmem:[%s11454_s30 + $0x230] ss:$12 sps:$4 sm:$0xff]  }
 0x1a7   :  { %v8183_v9 = vpop.f32.mrf.mxu0  ;;  %v8205_v10 = vpop.f32.mrf.mxu1  ;;  %1636 = vmatprep.subr.bf16.mxu1 %v8794_v63  ;;  %v8811_v63 = vld [vmem:[%s11454_s30 + $0x38] ss:$12 sps:$4 sm:$0xff]  }
 0x1a8   :  { %v8817_v10 = vld [vmem:[%s11454_s30 + $0xc8] ss:$12 sps:$4 sm:$0xff]  }
 0x1a9   :  { %v501_v12 = vpop.f32.mrf.mxu0  ;;  %v585_v13 = vpop.f32.mrf.mxu1  ;;  %1559 = vmatmul.mubr.bf16.gmra.mxu1 %v10191_v8 }
 0x1aa   :  { %1637 = vmatpush1.bf16.msra.mxu1 %v8792_v4  ;;  %1660 = vmatprep.mubr.bf16.mxu1 %v11401_v15 }
 0x1ab   :  { %v8218_v16 = vpop.f32.mrf.mxu0  ;;  %v8240_v17 = vpop.f32.mrf.mxu1  ;;  %1638 = vmatprep.subr.bf16.mxu1 %v8799_v7  ;;  %v8816_v7 = vld [vmem:[%s11454_s30 + $0x2d8] ss:$12 sps:$4 sm:$0xff]  }
 0x1ad   :  { %v504_v20 = vpop.f32.mrf.mxu0  ;;  %v588_v21 = vpop.f32.mrf.mxu1 }
 0x1ae   :  { %v10213_v24 = vpack.c.bf16 %v504_v20, %v501_v12  ;;  %v10215_v25 = vpack.c.bf16 %v588_v21, %v585_v13  ;;  %1639 = vmatpush1.bf16.msra.mxu1 %v8797_v11  ;;  %v8818_v12 = vld [vmem:[%s11454_s30 + $0x218] ss:$12 sps:$4 sm:$0xff]   ;;  %v8819_v13 = vld [vmem:[%s11454_s30 + $0x8] ss:$12 sps:$4 sm:$0xff]   ;;  %v8822_v20 = vld [vmem:[%s11454_s30 + $0x3b0] ss:$12 sps:$4 sm:$0xff]  }
 0x1af   :  { %v8219_v26 = vpop.f32.mrf.mxu0  ;;  %v8241_v27 = vpop.f32.mrf.mxu1  ;;  %1640 = vmatprep.subr.bf16.mxu1 %v8804_v14  ;;  %v8820_v14 = vld [vmem:[%s11454_s30 + $0x2c0] ss:$12 sps:$4 sm:$0xff]  }
 0x1b0   :  { %1599 = vmatprep.mubr.bf16.mxu0 %v10215_v25  ;;  %v8825_v27 = vld [vmem:[%s11454_s30 + $0x398] ss:$12 sps:$4 sm:$0xff]  }
 0x1b1   :  { %v509_v30 = vpop.f32.mrf.mxu0  ;;  %v593_v31 = vpop.f32.mrf.mxu1  ;;  %1600 = vmatmul.mubr.bf16.vlgmr.msra.gmra.mxu0 %v10213_v24 }
 0x1b2   :  { %7652 = vmatpush3.bf16.msra.mxu0 %v8786_v18  ;;  %1641 = vmatpush1.bf16.msra.mxu1 %v8802_v19  ;;  %v8821_v18 = vld [vmem:[%s11454_s30 + $0x200] ss:$12 sps:$4 sm:$0xff]  }
 0x1b3   :  { %v8222_v34 = vpop.f32.mrf.mxu0  ;;  %v8244_v35 = vpop.f32.mrf.mxu1  ;;  %7653 = vmatprep.subr.bf16.mxu0 %v8790_v22  ;;  %1642 = vmatprep.subr.bf16.mxu1 %v8809_v23  ;;  %v8823_v22 = vld [vmem:[%s11454_s30 + $0x2a8] ss:$12 sps:$4 sm:$0xff]  }
 0x1b4   :  { %v8824_v23 = vld [vmem:[%s11454_s30 + $0x1e8] ss:$12 sps:$4 sm:$0xff]   ;;  %v8830_v34 = vld [vmem:[%s11454_s30 + $0x1b8] ss:$12 sps:$4 sm:$0xff]   ;;  %v8832_v35 = vld [vmem:[%s11454_s30 + $0x260] ss:$12 sps:$4 sm:$0xff]  }
 0x1b5   :  { %v512_v37 = vpop.f32.mrf.mxu0  ;;  %v596_v38 = vpop.f32.mrf.mxu1 }
 0x1b6   :  { %v10237_v40 = vpack.c.bf16 %v512_v37, %v509_v30  ;;  %v10239_v41 = vpack.c.bf16 %v596_v38, %v593_v31  ;;  %7654 = vmatpush3.bf16.msra.mxu0 %v8791_v28  ;;  %1643 = vmatpush1.bf16.msra.mxu1 %v8807_v29  ;;  %v8826_v28 = vld [vmem:[%s11454_s30 + $0x290] ss:$12 sps:$4 sm:$0xff]   ;;  %v8828_v31 = vld [vmem:[%s11454_s30 + $0x380] ss:$12 sps:$4 sm:$0xff]   ;;  %v8836_v37 = vld [vmem:[%s11454_s30 + $0x188] ss:$12 sps:$4 sm:$0xff]  }
 0x1b7   :  { %v8223_v44 = vpop.f32.mrf.mxu0  ;;  %7655 = vmatprep.subr.bf16.mxu0 %v8795_v32  ;;  %v8245_v45 = vpop.f32.mrf.mxu1  ;;  %7685 = vmatprep.subr.bf16.mxu1 %v8812_v33  ;;  %v8829_v32 = vld [vmem:[%s11454_s30 + $0x278] ss:$12 sps:$4 sm:$0xff]  }
 0x1b8   :  { %1609 = vmatprep.mubr.bf16.mxu0 %v10239_v41  ;;  %v8837_v38 = vld [vmem:[%s11454_s30 + $0x338] ss:$12 sps:$4 sm:$0xff]   ;;  %v10396_v45 = vld [vmem:[#allocation4 + $0xe8] sm:$0xff] }
 0x1b9   :  { %v517_v47 = vpop.f32.mrf.mxu0  ;;  %1610 = vmatmul.mubr.bf16.gmra.mxu0 %v10237_v40  ;;  %v601_v48 = vpop.f32.mrf.mxu1  ;;  %v10393_v44 = vld [vmem:[#allocation4 + $0x70] sm:$0xff] }
 0x1ba   :  { %7656 = vmatpush3.bf16.msra.mxu0 %v8796_v36  ;;  %v10249_v50 = vpack.c.bf16 %v601_v48, %v601_v48  ;;  %v10255_v58 = vpack.c.bf16 %v517_v47, %v517_v47  ;;  %v8831_v36 = vld [vmem:[%s11454_s30 + $0x368] ss:$12 sps:$4 sm:$0xff]  }
 0x1bb   :  { %v8226_v51 = vpop.f32.mrf.mxu0  ;;  %7657 = vmatprep.subr.bf16.mxu0 %v8800_v39  ;;  %v8248_v52 = vpop.f32.mrf.mxu1  ;;  %v8839_v39 = vld [vmem:[%s11454_s30 + $0x308] ss:$12 sps:$4 sm:$0xff]  }
 0x1bc   :  { %1619 = vmatprep.mubr.bf16.mxu0 %v10249_v50  ;;  %v10402_v47 = vld [vmem:[#allocation4 + $0xe0] sm:$0xff]  ;;  %v10414_v51 = vld [vmem:[#allocation4 + $0xd0] sm:$0xff] }
 0x1bd   :  { %v520_v53 = vpop.f32.mrf.mxu0  ;;  %v604_v54 = vpop.f32.mrf.mxu1  ;;  %v10405_v48 = vld [vmem:[#allocation4 + $0x60] sm:$0xff]  ;;  %v10417_v52 = vld [vmem:[#allocation4 + $0x50] sm:$0xff] }
 0x1be   :  { %7658 = vmatpush3.bf16.msra.mxu0 %v8801_v46  ;;  %v10399_v46 = vld [vmem:[#allocation4 + $0x68] sm:$0xff] }
 0x1bf   :  { %v8227_v59 = vpop.f32.mrf.mxu0  ;;  %7659 = vmatprep.subr.bf16.mxu0 %v8805_v49  ;;  %v8249_v61 = vpop.f32.mrf.mxu1  ;;  %v10408_v49 = vld [vmem:[#allocation4 + $0xd8] sm:$0xff]  ;;  %v10420_v53 = vld [vmem:[#allocation4 + $0xc8] sm:$0xff] }
 0x1c0   :  { %v10423_v54 = vld [vmem:[#allocation4 + $0x48] sm:$0xff]  ;;  %v10432_v59 = vld [vmem:[#allocation4 + $0xb8] sm:$0xff]  ;;  %v10438_v61 = vld [vmem:[#allocation4 + $0xb0] sm:$0xff] }
 0x1c1   :  { %v669_v62 = vpop.f32.mrf.mxu0  ;;  %1620 = vmatmul.mubr.bf16.gmra.mxu0 %v10255_v58 }
 0x1c2   :  { %7660 = vmatpush3.bf16.msra.mxu0 %v8806_v55  ;;  %1721 = vmatprep.mubr.bf16.mxu0 %v10154_v43  ;;  %v8815_v43 = vld [vmem:[%s11454_s30 + $0x20] ss:$12 sps:$4 sm:$0xff]   ;;  %v10426_v55 = vld [vmem:[#allocation4 + $0xc0] sm:$0xff] }
 0x1c3   :  { %v8262_v2 = vpop.f32.mrf.mxu0  ;;  %7661 = vmatprep.subr.bf16.mxu0 %v8810_v60  ;;  %v10435_v60 = vld [vmem:[#allocation4 + $0x38] sm:$0xff] }
 0x1c4   :  { %v10447_v2 = vld [vmem:[#allocation4 + $0x28] sm:$0xff] }
 0x1c5   :  { %v672_v4 = vpop.f32.mrf.mxu0 }
 0x1c6   :  { %v10271_v6 = vpack.c.bf16 %v672_v4, %v669_v62  ;;  %7662 = vmatpush3.bf16.msra.mxu0 %v8811_v63  ;;  %v10441_v62 = vld [vmem:[#allocation4 + $0x30] sm:$0xff]  ;;  %v10444_v63 = vld [vmem:[#allocation4 + $0xa8] sm:$0xff]  ;;  %v10453_v4 = vld [vmem:[#allocation4 + $0x20] sm:$0xff] }
 0x1c7   :  { %v8263_v9 = vpop.f32.mrf.mxu0  ;;  %7663 = vmatprep.subr.bf16.mxu0 %v8813_v3  ;;  %v10450_v3 = vld [vmem:[#allocation4 + $0xa0] sm:$0xff] }
 0x1c8   :  { %1661 = vmatmul.mubr.bf16.vlgmr.msra.gmra.mxu1 %v10271_v6  ;;  %v10468_v9 = vld [vmem:[#allocation4 + $0x88] sm:$0xff] }
 0x1c9   :  { %7686 = vmatpush3.bf16.msra.mxu1 %v8814_v5  ;;  %v677_v11 = vpop.f32.mrf.mxu0  ;;  %1670 = vmatprep.mubr.bf16.mxu1 %v11401_v15  ;;  %v10456_v5 = vld [vmem:[#allocation4 + $0x98] sm:$0xff]  ;;  %11456 = vst [vmem:[#allocation33_spill] sm:$0xff] %v10468_v9 }
 0x1ca   :  { %7664 = vmatpush3.bf16.msra.mxu0 %v8815_v43  ;;  %7687 = vmatprep.subr.bf16.mxu1 %v8816_v7  ;;  %v10462_v43 = vld [vmem:[#allocation4 + $0x90] sm:$0xff] }
 0x1cb   :  { %v8266_v16 = vpop.f32.mrf.mxu0  ;;  %7665 = vmatprep.subr.bf16.mxu0 %v8817_v10  ;;  %v10465_v7 = vld [vmem:[#allocation4 + $0x10] sm:$0xff]  ;;  %v10470_v10 = vld [vmem:[#allocation4 + $0x8] sm:$0xff] }
 0x1cc   :  { %11455 = vst [vmem:[#allocation32_spill] sm:$0xff] %v10465_v7  ;;  %11457 = vst [vmem:[#allocation34_spill] sm:$0xff] %v10470_v10  ;;  %v10489_v16 = vld [vmem:[#allocation4 + $0x168] sm:$0xff] }
 0x1cd   :  { %7688 = vmatpush3.bf16.msra.mxu1 %v8818_v12  ;;  %v680_v17 = vpop.f32.mrf.mxu0  ;;  %v10477_v12 = vld [vmem:[#allocation4] sm:$0xff]  ;;  %11462 = vst [vmem:[#allocation39_spill] sm:$0xff] %v10489_v16 }
 0x1ce   :  { %v10296_v19 = vpack.c.bf16 %v680_v17, %v677_v11  ;;  %7666 = vmatpush3.bf16.msra.mxu0 %v8819_v13  ;;  %7689 = vmatprep.subr.bf16.mxu1 %v8820_v14  ;;  %v10474_v11 = vld [vmem:[#allocation4 + $0x80] sm:$0xff]  ;;  %11459 = vst [vmem:[#allocation36_spill] sm:$0xff] %v10477_v12  ;;  %v10481_v13 = vld [vmem:[#allocation4 + $0x178] sm:$0xff]  ;;  %v10485_v14 = vld [vmem:[#allocation4 + $0x170] sm:$0xff] }
 0x1cf   :  { %8272 = vmatprep.subr.bf16.mxu0 %v11406_v0  ;;  %v8267_v21 = vpop.f32.mrf.mxu0  ;;  %11458 = vst [vmem:[#allocation35_spill] sm:$0xff] %v10474_v11  ;;  %11460 = vst [vmem:[#allocation37_spill] sm:$0xff] %v10481_v13  ;;  %v10493_v17 = vld [vmem:[#allocation4 + $0x160] sm:$0xff] }
 0x1d0   :  { %1671 = vmatmul.mubr.bf16.gmra.mxu1 %v10296_v19  ;;  %11461 = vst [vmem:[#allocation38_spill] sm:$0xff] %v10485_v14  ;;  %11463 = vst [vmem:[#allocation40_spill] sm:$0xff] %v10493_v17  ;;  %v10509_v21 = vld [vmem:[#allocation4 + $0x140] sm:$0xff] }
 0x1d1   :  { %1722 = vmatmul.mubr.bf16.vlgmr.msra.gmra.mxu0 %v10152_v42  ;;  %7690 = vmatpush3.bf16.msra.mxu1 %v8821_v18  ;;  %v685_v26 = vpop.f32.mrf.mxu0  ;;  %v10497_v18 = vld [vmem:[#allocation4 + $0x158] sm:$0xff]  ;;  %11467 = vst [vmem:[#allocation44_spill] sm:$0xff] %v10509_v21 }
 0x1d2   :  { %1729 = vmatprep.mubr.bf16.mxu0 %v10172_v57  ;;  %8273 = vmatpush3.bf16.msra.mxu0 %v8822_v20  ;;  %v705_v29 = vpack.c.bf16 %v685_v26, %v685_v26  ;;  %v8827_v57 = vld [vmem:[%s11454_s30 + $0x1d0] ss:$12 sps:$4 sm:$0xff]   ;;  %11464 = vst [vmem:[#allocation41_spill] sm:$0xff] %v10497_v18 }
 0x1d3   :  { %7691 = vmatprep.subr.bf16.mxu1 %v8823_v22  ;;  %8274 = vmatprep.subr.bf16.mxu0 %v11406_v0  ;;  %v8270_v42 = vpop.f32.mrf.mxu0  ;;  %v10505_v20 = vld [vmem:[#allocation4 + $0x148] sm:$0xff]  ;;  %v10513_v22 = vld [vmem:[#allocation4 + $0x138] sm:$0xff] }
 0x1d4   :  { %1680 = vmatprep.mubr.bf16.mxu1 %v11401_v15  ;;  %11466 = vst [vmem:[#allocation43_spill] sm:$0xff] %v10505_v20  ;;  %11468 = vst [vmem:[#allocation45_spill] sm:$0xff] %v10513_v22  ;;  %v10521_v26 = vld [vmem:[#allocation4 + $0x128] sm:$0xff]  ;;  %v10533_v42 = vld [vmem:[#allocation4 + $0x110] sm:$0xff] }
 0x1d5   :  { %7692 = vmatpush3.bf16.msra.mxu1 %v8824_v23  ;;  %v688_v30 = vpop.f32.mrf.mxu0  ;;  %v10517_v23 = vld [vmem:[#allocation4 + $0x130] sm:$0xff]  ;;  %11470 = vst [vmem:[#allocation47_spill] sm:$0xff] %v10521_v26  ;;  %11473 = vst [vmem:[#allocation50_spill] sm:$0xff] %v10533_v42 }
 0x1d6   :  { %8275 = vmatpush3.bf16.msra.mxu0 %v8825_v27  ;;  %7693 = vmatprep.subr.bf16.mxu1 %v8826_v28  ;;  %11469 = vst [vmem:[#allocation46_spill] sm:$0xff] %v10517_v23  ;;  %v10525_v27 = vld [vmem:[#allocation4 + $0x120] sm:$0xff]  ;;  %v10529_v28 = vld [vmem:[#allocation4 + $0x118] sm:$0xff] }
 0x1d7   :  { %8276 = vmatprep.subr.bf16.mxu0 %v11406_v0  ;;  %v8271_v33 = vpop.f32.mrf.mxu0  ;;  %11471 = vst [vmem:[#allocation48_spill] sm:$0xff] %v10525_v27  ;;  %11472 = vst [vmem:[#allocation49_spill] sm:$0xff] %v10529_v28 }
 0x1d8   :  { %1681 = vmatmul.mubr.bf16.gmra.mxu1 %v705_v29 }
 0x1d9   :  { %1730 = vmatmul.mubr.bf16.gmra.mxu0 %v10170_v56  ;;  %7694 = vmatpush3.bf16.msra.mxu1 %v8827_v57  ;;  %v8833_v56 = vld [vmem:[%s11454_s30 + $0x1a0] ss:$12 sps:$4 sm:$0xff]   ;;  %v10541_v57 = vld [vmem:[#allocation4 + $0x100] sm:$0xff] }
 0x1da   :  { %1737 = vmatprep.mubr.bf16.mxu0 %v10182_v1  ;;  %1777 = vmatprep.mubr.bf16.mxu1 %v10215_v25  ;;  %v8835_v1 = vld [vmem:[%s11454_s30 + $0x248] ss:$12 sps:$4 sm:$0xff]   ;;  %v8834_v25 = vld [vmem:[%s11454_s30 + $0x350] ss:$12 sps:$4 sm:$0xff]   ;;  %11475 = vst [vmem:[#allocation52_spill] sm:$0xff] %v10541_v57 }
 0x1db   :  { %8277 = vmatpush3.bf16.msra.mxu0 %v8828_v31  ;;  %7695 = vmatprep.subr.bf16.mxu1 %v8829_v32 }
 0x1dc   :  { %8278 = vmatprep.subr.bf16.mxu0 %v11406_v0 }
 0x1dd   :  { %7696 = vmatpush3.bf16.msra.mxu1 %v8830_v34 }
 0x1de   :  { %7697 = vmatprep.subr.bf16.mxu1 %v8832_v35 }
 0x1df   :  { %8279 = vmatpush3.bf16.msra.mxu0 %v8831_v36 }
 0x1e0   :  { %8280 = vmatprep.subr.bf16.mxu0 %v11406_v0 }
 0x1e1   :  { %1738 = vmatmul.mubr.bf16.gmra.mxu0 %v10191_v8  ;;  %7698 = vmatpush3.bf16.msra.mxu1 %v8833_v56  ;;  %v8838_v8 = vld [vmem:[%s11454_s30 + $0x320] ss:$12 sps:$4 sm:$0xff]  }
 0x1e2   :  { %7699 = vmatprep.subr.bf16.mxu1 %v8835_v1  ;;  %8288 = vmatprep.mubr.msk.bf16.mxu0 %vm9624_vm0, %v11406_v0 }
 0x1e3   :  { %8281 = vmatpush3.bf16.msra.mxu0 %v8834_v25 }
 0x1e4   :  { %8282 = vmatprep.subr.bf16.mxu0 %v11406_v0 }
 0x1e5   :  { %7700 = vmatpush3.bf16.msra.mxu1 %v8836_v37 }
 0x1e7   :  { %8283 = vmatpush3.bf16.msra.mxu0 %v8837_v38 }
 0x1e8   :  { %1778 = vmatmul.mubr.bf16.vlgmr.msra.gmra.mxu1 %v10213_v24  ;;  %8284 = vmatprep.subr.bf16.mxu0 %v11406_v0  ;;  %v10384_v24 = vld [vmem:[#allocation4 + $0xf8] sm:$0xff] }
 0x1e9   :  { %1785 = vmatprep.mubr.bf16.mxu1 %v10239_v41  ;;  %7730 = vmatprep.subr.mxu1 %v10384_v24  ;;  %v10390_v41 = vld [vmem:[#allocation4 + $0xf0] sm:$0xff] }
 0x1eb   :  { %8285 = vmatpush3.bf16.msra.mxu0 %v8838_v8 }
 0x1ec   :  { %8286 = vmatprep.subr.bf16.mxu0 %v11406_v0 }
 0x1ef   :  { %8287 = vmatpush3.bf16.msra.mxu0 %v8839_v39 }
 0x1f0   :  { %1786 = vmatmul.mubr.bf16.gmra.mxu1 %v10237_v40  ;;  %8300 = vmatprep.subr.mxu0 %v11406_v0  ;;  %v10387_v40 = vld [vmem:[#allocation4 + $0x78] sm:$0xff] }
 0x1f1   :  { %1793 = vmatprep.mubr.bf16.mxu1 %v10249_v50  ;;  %7731 = vmatpush3.msra.mxu1 %v10387_v40  ;;  %v10411_v50 = vld [vmem:[#allocation4 + $0x58] sm:$0xff] }
 0x1f2   :  { %8289 = vmatmul.mubr.bf16.vlgmr.msra.gmra.mxu0 %v10271_v6  ;;  %7732 = vmatprep.subr.mxu1 %v10390_v41  ;;  %v10459_v6 = vld [vmem:[#allocation4 + $0x18] sm:$0xff] }
 0x1f3   :  { %8292 = vmatprep.mubr.msk.bf16.mxu0 %vm9624_vm0, %v11406_v0  ;;  %7733 = vmatpush3.msra.mxu1 %v10393_v44 }
 0x1f4   :  { %7734 = vmatprep.subr.mxu1 %v10396_v45  ;;  %8301 = vmatpush3.msra.mxu0 %v10481_v13 }
 0x1f5   :  { %7735 = vmatpush3.msra.mxu1 %v10399_v46  ;;  %8302 = vmatprep.subr.mxu0 %v11406_v0 }
 0x1f6   :  { %7736 = vmatprep.subr.mxu1 %v10402_v47  ;;  %8303 = vmatpush3.msra.mxu0 %v10485_v14 }
 0x1f7   :  { %7737 = vmatpush3.msra.mxu1 %v10405_v48  ;;  %8304 = vmatprep.subr.mxu0 %v11406_v0 }
 0x1f8   :  { %1794 = vmatmul.mubr.bf16.gmra.mxu1 %v10255_v58  ;;  %7738 = vmatprep.subr.mxu1 %v10408_v49  ;;  %v10429_v58 = vld [vmem:[#allocation4 + $0x40] sm:$0xff] }
 0x1f9   :  { %7739 = vmatpush3.msra.mxu1 %v10411_v50  ;;  %8305 = vmatpush3.msra.mxu0 %v10489_v16 }
 0x1fa   :  { %8293 = vmatmul.mubr.bf16.gmra.mxu0 %v10296_v19  ;;  %7740 = vmatprep.subr.mxu1 %v10414_v51  ;;  %v10501_v19 = vld [vmem:[#allocation4 + $0x150] sm:$0xff] }
 0x1fb   :  { %8296 = vmatprep.mubr.msk.bf16.mxu0 %vm9624_vm0, %v11406_v0  ;;  %7741 = vmatpush3.msra.mxu1 %v10417_v52  ;;  %11465 = vst [vmem:[#allocation42_spill] sm:$0xff] %v10501_v19 }
 0x1fc   :  { %7742 = vmatprep.subr.mxu1 %v10420_v53  ;;  %8306 = vmatprep.subr.mxu0 %v11406_v0 }
 0x1fd   :  { %7743 = vmatpush3.msra.mxu1 %v10423_v54  ;;  %8307 = vmatpush3.msra.mxu0 %v10493_v17 }
 0x1fe   :  { %7744 = vmatprep.subr.mxu1 %v10426_v55  ;;  %8308 = vmatprep.subr.mxu0 %v11406_v0 }
 0x1ff   :  { %7745 = vmatpush3.msra.mxu1 %v10429_v58  ;;  %8309 = vmatpush3.msra.mxu0 %v10497_v18 }
 0x200   :  { %7746 = vmatprep.subr.mxu1 %v10432_v59  ;;  %8310 = vmatprep.subr.mxu0 %v11406_v0 }
 0x201   :  { %7747 = vmatpush3.msra.mxu1 %v10435_v60  ;;  %8311 = vmatpush3.msra.mxu0 %v10501_v19 }
 0x202   :  { %8297 = vmatmul.mubr.bf16.gmra.mxu0 %v705_v29  ;;  %7748 = vmatprep.subr.mxu1 %v10438_v61  ;;  %v10537_v29 = vld [vmem:[#allocation4 + $0x108] sm:$0xff] }
 0x203   :  { %8332 = vmatprep.mubr.msk.f32.mxu0 %vm9624_vm0, %v11406_v0  ;;  %7749 = vmatpush3.msra.mxu1 %v10441_v62  ;;  %11474 = vst [vmem:[#allocation51_spill] sm:$0xff] %v10537_v29 }
 0x204   :  { %7750 = vmatprep.subr.mxu1 %v10444_v63  ;;  %8312 = vmatprep.subr.mxu0 %v11406_v0 }
 0x205   :  { %7751 = vmatpush3.msra.mxu1 %v10447_v2  ;;  %8313 = vmatpush3.msra.mxu0 %v10505_v20 }
 0x206   :  { %7752 = vmatprep.subr.mxu1 %v10450_v3  ;;  %8314 = vmatprep.subr.mxu0 %v11406_v0 }
 0x207   :  { %7753 = vmatpush3.msra.mxu1 %v10453_v4  ;;  %8315 = vmatpush3.msra.mxu0 %v10509_v21 }
 0x208   :  { %7754 = vmatprep.subr.mxu1 %v10456_v5  ;;  %8316 = vmatprep.subr.mxu0 %v11406_v0 }
 0x209   :  { %7755 = vmatpush3.msra.mxu1 %v10459_v6  ;;  %8317 = vmatpush3.msra.mxu0 %v10513_v22 }
 0x20a   :  { %7756 = vmatprep.subr.mxu1 %v10462_v43  ;;  %8318 = vmatprep.subr.mxu0 %v11406_v0 }
 0x20b   :  { %7757 = vmatpush3.msra.mxu1 %v10465_v7  ;;  %8319 = vmatpush3.msra.mxu0 %v10517_v23 }
 0x20c   :  { %7758 = vmatprep.subr.mxu1 %v10468_v9  ;;  %8320 = vmatprep.subr.mxu0 %v11406_v0 }
 0x20d   :  { %7759 = vmatpush3.msra.mxu1 %v10470_v10  ;;  %8321 = vmatpush3.msra.mxu0 %v10521_v26 }
 0x20e   :  { %7760 = vmatprep.subr.mxu1 %v10474_v11  ;;  %8322 = vmatprep.subr.mxu0 %v11406_v0 }
 0x20f   :  { %7761 = vmatpush3.msra.mxu1 %v10477_v12  ;;  %8323 = vmatpush3.msra.mxu0 %v10525_v27 }
 0x210   :  { %7782 = vmatprep.subr.mxu1 %v10384_v24  ;;  %8324 = vmatprep.subr.mxu0 %v11406_v0 }
 0x211   :  { %8325 = vmatpush3.msra.mxu0 %v10529_v28 }
 0x212   :  { %8326 = vmatprep.subr.mxu0 %v11406_v0 }
 0x213   :  { %8327 = vmatpush3.msra.mxu0 %v10533_v42 }
 0x214   :  { %8328 = vmatprep.subr.mxu0 %v11406_v0 }
 0x215   :  { %8329 = vmatpush3.msra.mxu0 %v10537_v29 }
 0x216   :  { %8330 = vmatprep.subr.mxu0 %v11406_v0 }
 0x217   :  { %8331 = vmatpush3.msra.mxu0 %v10541_v57 }
 0x218   :  { %8335 = vmatprep.subr.mxu0 %v11406_v0 }
 0x259   :  { %v1540_v30 = vpop.f32.mrf.mxu1 }
 0x25b   :  { %v1542_v31 = vpop.f32.mrf.mxu1 }
 0x25d   :  { %v1544_v32 = vpop.f32.mrf.mxu1 }
 0x25f   :  { %v1546_v33 = vpop.f32.mrf.mxu1 }
 0x261   :  { %v1550_v34 = vpop.f32.mrf.mxu1 }
 0x263   :  { %v1552_v35 = vpop.f32.mrf.mxu1 }
 0x265   :  { %v1554_v36 = vpop.f32.mrf.mxu1 }
 0x267   :  { %v1556_v56 = vpop.f32.mrf.mxu1 }
 0x269   :  { %v1560_v1 = vpop.f32.mrf.mxu1 }
 0x26b   :  { %v1562_v25 = vpop.f32.mrf.mxu1 }
 0x26d   :  { %v1564_v37 = vpop.f32.mrf.mxu1 }
 0x26f   :  { %v1565_v38 = vpop.f32.mrf.mxu1 }
 0x271   :  { %v1601_v8 = vpop.f32.mrf.mxu0 }
 0x272   :  { %v1602_v14 = vadd.f32 %v1601_v8, %v1540_v30 }
 0x273   :  { %v1603_v39 = vpop.f32.mrf.mxu0 }
 0x274   :  { %v1604_v37 = vadd.f32 %v1603_v39, %v1542_v31 }
 0x275   :  { %v1605_v24 = vpop.f32.mrf.mxu0 }
 0x276   :  { %v1606_v17 = vadd.f32 %v1605_v24, %v1544_v32 }
 0x277   :  { %v1607_v15 = vpop.f32.mrf.mxu0 }
 0x278   :  { %v1608_v19 = vadd.f32 %v1607_v15, %v1546_v33 }
 0x279   :  { %v1611_v29 = vpop.f32.mrf.mxu0 }
 0x27a   :  { %v1612_v13 = vadd.f32 %v1611_v29, %v1550_v34 }
 0x27b   :  { %v1613_v57 = vpop.f32.mrf.mxu0 }
 0x27c   :  { %v1614_v12 = vadd.f32 %v1613_v57, %v1552_v35 }
 0x27d   :  { %v1615_v42 = vpop.f32.mrf.mxu0 }
 0x27f   :  { %v1617_v0 = vpop.f32.mrf.mxu0 }
 0x281   :  { %v1621_v28 = vpop.f32.mrf.mxu0 }
 0x283   :  { %v1623_v27 = vpop.f32.mrf.mxu0 }
 0x284   :  { %v1624_v31 = vadd.f32 %v1623_v27, %v1562_v25 }
 0x285   :  { %v1625_v26 = vpop.f32.mrf.mxu0 }
 0x286   :  { %v1616_v26 = vadd.f32 %v1615_v42, %v1554_v36 }
 0x287   :  { %v1626_v23 = vpop.f32.mrf.mxu0 }
 0x288   :  { %v1662_v22 = vpop.f32.mrf.mxu1 }
 0x289   :  { %v10553_v7 = vadd.f32 %v1662_v22, %v1602_v14  ;;  %v1622_v14 = vadd.f32 %v1621_v28, %v1560_v1 }
 0x28a   :  { %v1664_v21 = vpop.f32.mrf.mxu1 }
 0x28b   :  { %v10551_v9 = vadd.f32 %v1664_v21, %v1604_v37  ;;  %11479 = vst [vmem:[#allocation56_spill] sm:$0xff] %v10553_v7 }
 0x28c   :  { %v1666_v20 = vpop.f32.mrf.mxu1 }
 0x28d   :  { %v10547_v11 = vadd.f32 %v1666_v20, %v1606_v17  ;;  %11478 = vst [vmem:[#allocation55_spill] sm:$0xff] %v10551_v9  ;;  %v1618_v17 = vadd.f32 %v1617_v0, %v1556_v56 }
 0x28e   :  { %v1668_v18 = vpop.f32.mrf.mxu1 }
 0x28f   :  { %v10545_v38 = vadd.f32 %v1668_v18, %v1608_v19  ;;  %11477 = vst [vmem:[#allocation54_spill] sm:$0xff] %v10547_v11  ;;  %v1857_v20 = vadd.f32 %v10547_v11, %v10553_v7 }
 0x290   :  { %v1672_v16 = vpop.f32.mrf.mxu1 }
 0x291   :  { %11476 = vst [vmem:[#allocation53_spill] sm:$0xff] %v10545_v38  ;;  %v10549_v10 = vpop.f32.mrf.mxu0  ;;  %v10555_v15 = vadd.f32 %v1672_v16, %v1612_v13  ;;  %v1891_v19 = vmul.f32 %v10545_v38, %v10545_v38  ;;  %v1888_v13 = vmul.f32 %v10551_v9, %v10551_v9  ;;  %v1867_v16 = vadd.f32 %v10545_v38, %v10551_v9 }
 0x292   :  { %v1674_v23 = vpop.f32.mrf.mxu1 }
 0x293   :  { %11480 = vst [vmem:[#allocation57_spill] sm:$0xff] %v10555_v15  ;;  %v10557_v32 = vadd.f32 %v1674_v23, %v1614_v12  ;;  %v10559_v18 = vpop.f32.mrf.mxu0  ;;  %v1858_v22 = vadd.f32 %v1857_v20, %v10555_v15  ;;  %v1912_v33 = vadd.f32 %v1891_v19, %v1888_v13 }
 0x294   :  { %v1676_v29 = vpop.f32.mrf.mxu1 }
 0x295   :  { %11481 = vst [vmem:[#allocation58_spill] sm:$0xff] %v10557_v32  ;;  %v10565_v21 = vadd.f32 %v1676_v29, %v1616_v26  ;;  %v10567_v57 = vpop.f32.mrf.mxu0  ;;  %v1894_v0 = vmul.f32 %v10557_v32, %v10557_v32  ;;  %v1868_v28 = vadd.f32 %v1867_v16, %v10557_v32 }
 0x296   :  { %v1678_v12 = vpop.f32.mrf.mxu1 }
 0x297   :  { %11482 = vst [vmem:[#allocation59_spill] sm:$0xff] %v10565_v21  ;;  %v10576_v42 = vadd.f32 %v1678_v12, %v1618_v17  ;;  %v10578_v30 = vpop.f32.mrf.mxu0  ;;  %v1859_v35 = vadd.f32 %v1858_v22, %v10565_v21  ;;  %v1913_v39 = vadd.f32 %v1912_v33, %v1894_v0 }
 0x298   :  { %v1682_v34 = vpop.f32.mrf.mxu1 }
 0x299   :  { %11483 = vst [vmem:[#allocation60_spill] sm:$0xff] %v10576_v42  ;;  %v1897_v36 = vmul.f32 %v10576_v42, %v10576_v42  ;;  %v10584_v56 = vadd.f32 %v1682_v34, %v1622_v14  ;;  %v10586_v1 = vpop.f32.mrf.mxu0  ;;  %v1869_v24 = vadd.f32 %v1868_v28, %v10576_v42 }
 0x29a   :  { %v1684_v8 = vpop.f32.mrf.mxu1 }
 0x29b   :  { %11484 = vst [vmem:[#allocation61_spill] sm:$0xff] %v10584_v56  ;;  %v1860_v37 = vadd.f32 %v1859_v35, %v10584_v56  ;;  %v10590_v27 = vadd.f32 %v1684_v8, %v1624_v31  ;;  %v10592_v25 = vpop.f32.mrf.mxu0  ;;  %v1914_v26 = vadd.f32 %v1913_v39, %v1897_v36 }
 0x29c   :  { %v1686_v23 = vpop.f32.mrf.mxu1 }
 0x29d   :  { %11485 = vst [vmem:[#allocation62_spill] sm:$0xff] %v10590_v27  ;;  %v1861_v19 = vrot.slane %v1860_v37, 4  ;;  %v1870_v29 = vadd.f32 %v1869_v24, %v10590_v27  ;;  %v1900_v17 = vmul.f32 %v10590_v27, %v10590_v27  ;;  %v10597_v20 = vpop.f32.mrf.mxu0 }
 0x29e   :  { %v1687_v14 = vpop.f32.mrf.mxu1 }
 0x29f   :  { %v1862_v13 = vadd.f32 %v1861_v19, %v1860_v37  ;;  %v1871_v12 = vrot.slane %v1870_v29, 4  ;;  %v1915_v16 = vadd.f32 %v1914_v26, %v1900_v17  ;;  %v10599_v22 = vpop.f32.mrf.mxu0  ;;  %v1890_v26 = vmul.f32 %v10547_v11, %v10547_v11 }
 0x2a1   :  { %v1863_v0 = vrot.slane %v1862_v13, 2  ;;  %v1872_v31 = vadd.f32 %v1871_v12, %v1870_v29  ;;  %v1916_v33 = vrot.slane %v1915_v16, 4  ;;  %v10601_v34 = vpop.f32.mrf.mxu0 }
 0x2a3   :  { %v1864_v28 = vadd.f32 %v1863_v0, %v1862_v13  ;;  %v10603_v35 = vpop.f32.mrf.mxu0  ;;  %v1873_v36 = vrot.slane %v1872_v31, 2  ;;  %v1917_v8 = vadd.f32 %v1916_v33, %v1915_v16  ;;  %v1887_v13 = vmul.f32 %v10553_v7, %v10553_v7 }
 0x2a4   :  { %v1893_v0 = vmul.f32 %v10555_v15, %v10555_v15 }
 0x2a5   :  { %v7682_v39 = vpop.f32.mrf.mxu0  ;;  %v1874_v24 = vadd.f32 %v1873_v36, %v1872_v31  ;;  %v1918_v23 = vrot.slane %v1917_v8, 2  ;;  %v1865_v38 = vrot.slane %v1864_v28, 1  ;;  %v1902_v36 = vadd.f32 %v1890_v26, %v1887_v13 }
 0x2a7   :  { %v7683_v14 = vpop.f32.mrf.mxu0  ;;  %v1875_v37 = vrot.slane %v1874_v24, 1  ;;  %v1919_v19 = vadd.f32 %v1918_v23, %v1917_v8  ;;  %v1866_v16 = vadd.f32 %v1865_v38, %v1864_v28  ;;  %v1896_v8 = vmul.f32 %v10565_v21, %v10565_v21 }
 0x2a8   :  { %v7701_v17 = vpop.f32.mrf.mxu1  ;;  %v1899_v23 = vmul.f32 %v10584_v56, %v10584_v56 }
 0x2a9   :  { %v1876_v29 = vadd.f32 %v1875_v37, %v1874_v24  ;;  %v1920_v12 = vrot.slane %v1919_v19, 1  ;;  %v1903_v24 = vadd.f32 %v1902_v36, %v1893_v0 }
 0x2aa   :  { %v7702_v33 = vpop.f32.mrf.mxu1 }
 0x2ab   :  { %2044 = vmatprep.mubr.f32.mxu1 %v1876_v29  ;;  %v1921_v31 = vadd.f32 %v1920_v12, %v1919_v19  ;;  %v1904_v38 = vadd.f32 %v1903_v24, %v1896_v8 }
 0x2ac   :  { %v7704_v39 = vpop.f32.mrf.mxu1  ;;  %2045 = vmatmul.mubr.f32.vlgmr.msra.gmra.mxu1 %v1866_v16 }
 0x2ad   :  { %7783 = vmatpush3.msra.mxu1 %v10387_v40  ;;  %2184 = vmatprep.mubr.f32.mxu1 %v1921_v31  ;;  %v1905_v37 = vadd.f32 %v1904_v38, %v1899_v23 }
 0x2ae   :  { %v7705_v14 = vpop.f32.mrf.mxu1  ;;  %7784 = vmatprep.subr.mxu1 %v10390_v41 }
 0x2af   :  { %7785 = vmatpush3.msra.mxu1 %v10393_v44  ;;  %v7706_v41 = vadd.f32 %v7705_v14, %v7704_v39  ;;  %v1906_v44 = vrot.slane %v1905_v37, 4 }
 0x2b0   :  { %v7707_v28 = vpop.f32.mrf.mxu1  ;;  %7786 = vmatprep.subr.mxu1 %v10396_v45  ;;  %v7672_v45 = vadd.f32 %v10578_v30, %v10567_v57 }
 0x2b1   :  { %7787 = vmatpush3.msra.mxu1 %v10399_v46  ;;  %v7703_v46 = vadd.f32 %v7702_v33, %v7701_v17 }
 0x2b2   :  { %v1835_v19 = vpop.f32.mrf.mxu0  ;;  %v7708_v26 = vpop.f32.mrf.mxu1  ;;  %7788 = vmatprep.subr.mxu1 %v10402_v47  ;;  %v1783_v16 = vadd.f32 %v7706_v41, %v7672_v45  ;;  %v11496_v41 = vmov 0.0  }
 0x2b3   :  { %7789 = vmatpush3.msra.mxu1 %v10405_v48  ;;  %v7709_v0 = vadd.f32 %v7708_v26, %v7707_v28  ;;  %v11493_v26 = vld [vmem:[#allocation34_spill] sm:$0xff] }
 0x2b4   :  { %v8290_v40 = vpop.f32.mrf.mxu0  ;;  %v7710_v29 = vpop.f32.mrf.mxu1  ;;  %7790 = vmatprep.subr.mxu1 %v10408_v49  ;;  %v7669_v49 = vadd.f32 %v10559_v18, %v10549_v10 }
 0x2b5   :  { %7791 = vmatpush3.msra.mxu1 %v10411_v50  ;;  %v7675_v50 = vadd.f32 %v10592_v25, %v10586_v1 }
 0x2b6   :  { %v1838_v12 = vpop.f32.mrf.mxu0  ;;  %v7711_v13 = vpop.f32.mrf.mxu1  ;;  %7792 = vmatprep.subr.mxu1 %v10414_v51  ;;  %v1907_v51 = vadd.f32 %v1906_v44, %v1905_v37  ;;  %v1780_v17 = vadd.f32 %v7703_v46, %v7669_v49  ;;  %v11492_v37 = vld [vmem:[#allocation33_spill] sm:$0xff] }
 0x2b7   :  { %7793 = vmatpush3.msra.mxu1 %v10417_v52  ;;  %v7712_v31 = vadd.f32 %v7711_v13, %v7710_v29  ;;  %v7678_v52 = vadd.f32 %v10599_v22, %v10597_v20  ;;  %v1788_v33 = vadd.f32 %v7709_v0, %v7675_v50  ;;  %v11495_v29 = vld [vmem:[#allocation36_spill] sm:$0xff]  ;;  %v11498_v50 = vld [vmem:[#allocation38_spill] sm:$0xff] }
 0x2b8   :  { %v8291_v47 = vpop.f32.mrf.mxu0  ;;  %v7713_v48 = vpop.f32.mrf.mxu1  ;;  %7794 = vmatprep.subr.mxu1 %v10420_v53  ;;  %v10637_v53 = vadd.f32 %v1838_v12, %v1783_v16  ;;  %v10641_v1 = vadd.f32 %v1835_v19, %v1780_v17  ;;  %v11502_v17 = vld [vmem:[#allocation42_spill] sm:$0xff] }
 0x2b9   :  { %7795 = vmatpush3.msra.mxu1 %v10423_v54  ;;  %v1791_v36 = vadd.f32 %v7712_v31, %v7678_v52  ;;  %v11497_v47 = vld [vmem:[#allocation37_spill] sm:$0xff]  ;;  %v11499_v31 = vld [vmem:[#allocation39_spill] sm:$0xff] }
 0x2ba   :  { %v1843_v57 = vpop.f32.mrf.mxu0  ;;  %v7714_v30 = vpop.f32.mrf.mxu1  ;;  %7796 = vmatprep.subr.mxu1 %v10426_v55  ;;  %11486 = vst [vmem:[#allocation63_spill] sm:$0xff] %v10637_v53  ;;  %11487 = vst [vmem:[#allocation64_spill] sm:$0xff] %v10641_v1  ;;  %v1908_v55 = vrot.slane %v1907_v51, 2  ;;  %v1877_v8 = vadd.f32 %v10637_v53, %v10641_v1  ;;  %v1889_v12 = vmul.f32 %v10641_v1, %v10641_v1 }
 0x2bb   :  { %7797 = vmatpush3.msra.mxu1 %v10429_v58  ;;  %v10643_v54 = vadd.f32 %v1843_v57, %v1788_v33  ;;  %v7715_v25 = vadd.f32 %v7714_v30, %v7713_v48  ;;  %v7681_v58 = vadd.f32 %v10603_v35, %v10601_v34  ;;  %v11500_v57 = vld [vmem:[#allocation40_spill] sm:$0xff]  ;;  %v11501_v30 = vld [vmem:[#allocation41_spill] sm:$0xff]  ;;  %v11503_v33 = vld [vmem:[#allocation43_spill] sm:$0xff] }
 0x2bc   :  { %v8294_v10 = vpop.f32.mrf.mxu0  ;;  %v7716_v18 = vpop.f32.mrf.mxu1  ;;  %7798 = vmatprep.subr.mxu1 %v10432_v59 }
 0x2bd   :  { %11488 = vst [vmem:[#allocation65_spill] sm:$0xff] %v10643_v54  ;;  %7799 = vmatpush3.msra.mxu1 %v10435_v60  ;;  %v1878_v60 = vadd.f32 %v1877_v8, %v10643_v54  ;;  %v1796_v24 = vadd.f32 %v7715_v25, %v7681_v58  ;;  %v1895_v13 = vmul.f32 %v10643_v54, %v10643_v54  ;;  %v11504_v18 = vld [vmem:[#allocation44_spill] sm:$0xff]  ;;  %v11505_v25 = vld [vmem:[#allocation45_spill] sm:$0xff] }
 0x2be   :  { %v1846_v20 = vpop.f32.mrf.mxu0  ;;  %v7717_v22 = vpop.f32.mrf.mxu1  ;;  %7800 = vmatprep.subr.mxu1 %v10438_v61  ;;  %v1909_v61 = vadd.f32 %v1908_v55, %v1907_v51  ;;  %v11506_v55 = vld [vmem:[#allocation46_spill] sm:$0xff]  ;;  %v11508_v58 = vld [vmem:[#allocation48_spill] sm:$0xff]  ;;  %v11509_v8 = vld [vmem:[#allocation49_spill] sm:$0xff] }
 0x2bf   :  { %v10651_v59 = vadd.f32 %v1846_v20, %v1791_v36  ;;  %7801 = vmatpush3.msra.mxu1 %v10441_v62  ;;  %v11507_v20 = vld [vmem:[#allocation47_spill] sm:$0xff] }
 0x2c0   :  { %v8295_v39 = vpop.f32.mrf.mxu0  ;;  %7802 = vmatprep.subr.mxu1 %v10444_v63 }
 0x2c1   :  { %11489 = vst [vmem:[#allocation66_spill] sm:$0xff] %v10651_v59  ;;  %7803 = vmatpush3.msra.mxu1 %v10447_v2  ;;  %v1879_v34 = vadd.f32 %v1878_v60, %v10651_v59  ;;  %v1910_v2 = vrot.slane %v1909_v61, 1  ;;  %v1898_v0 = vmul.f32 %v10651_v59, %v10651_v59  ;;  %v11510_v60 = vld [vmem:[#allocation50_spill] sm:$0xff] }
 0x2c2   :  { %v1851_v23 = vpop.f32.mrf.mxu0  ;;  %7804 = vmatprep.subr.mxu1 %v10450_v3  ;;  %v11491_v3 = vld [vmem:[#allocation32_spill] sm:$0xff] }
 0x2c3   :  { %v10659_v35 = vadd.f32 %v1851_v23, %v1796_v24  ;;  %7805 = vmatpush3.msra.mxu1 %v10453_v4  ;;  %v11494_v4 = vld [vmem:[#allocation35_spill] sm:$0xff] }
 0x2c4   :  { %v8298_v14 = vpop.f32.mrf.mxu0  ;;  %7806 = vmatprep.subr.mxu1 %v10456_v5  ;;  %v1911_v5 = vadd.f32 %v1910_v2, %v1909_v61  ;;  %v11511_v24 = vld [vmem:[#allocation51_spill] sm:$0xff]  ;;  %v11512_v61 = vld [vmem:[#allocation52_spill] sm:$0xff]  ;;  %v10728_v2 = vld [vmem:[#allocation6 + $0x150] sm:$0xff] }
 0x2c5   :  { %11490 = vst [vmem:[#allocation67_spill] sm:$0xff] %v10659_v35  ;;  %v1880_v62 = vadd.f32 %v1879_v34, %v10659_v35  ;;  %7807 = vmatpush3.msra.mxu1 %v10459_v6  ;;  %v1901_v49 = vmul.f32 %v10659_v35, %v10659_v35  ;;  %v10718_v34 = vld [vmem:[#allocation6 + $0x170] sm:$0xff]  ;;  %v10720_v14 = vld [vmem:[#allocation6 + $0x168] sm:$0xff] }
 0x2c6   :  { %v1854_v63 = vpop.f32.mrf.mxu0  ;;  %7808 = vmatprep.subr.mxu1 %v10462_v43  ;;  %v1892_v43 = vmul.f32 %v10637_v53, %v10637_v53 }
 0x2c7   :  { %v1881_v38 = vrot.slane %v1880_v62, 4  ;;  %7809 = vmatpush3.msra.mxu1 %v11491_v3  ;;  %v10726_v63 = vld [vmem:[#allocation6 + $0x158] sm:$0xff]  ;;  %v10734_v3 = vld [vmem:[#allocation6 + $0x140] sm:$0xff] }
 0x2c8   :  { %v8299_v28 = vpop.f32.mrf.mxu0  ;;  %7810 = vmatprep.subr.mxu1 %v11492_v37  ;;  %v1922_v46 = vadd.f32 %v1892_v43, %v1889_v12  ;;  %v10740_v37 = vld [vmem:[#allocation6 + $0x138] sm:$0xff]  ;;  %v10771_v43 = vld [vmem:[#allocation6 + $0xf0] sm:$0xff]  ;;  %v10777_v12 = vld [vmem:[#allocation6 + $0xe0] sm:$0xff] }
 0x2c9   :  { %v1882_v19 = vadd.f32 %v1881_v38, %v1880_v62  ;;  %7811 = vmatpush3.msra.mxu1 %v11493_v26  ;;  %v10722_v62 = vld [vmem:[#allocation6 + $0x178] sm:$0xff]  ;;  %v10730_v38 = vld [vmem:[#allocation6 + $0x160] sm:$0xff]  ;;  %v10736_v28 = vld [vmem:[#allocation6 + $0x148] sm:$0xff] }
 0x2ca   :  { %7812 = vmatprep.subr.mxu1 %v11494_v4  ;;  %v1923_v48 = vadd.f32 %v1922_v46, %v1895_v13  ;;  %v10751_v26 = vld [vmem:[#allocation6 + $0x120] sm:$0xff]  ;;  %v10753_v4 = vld [vmem:[#allocation6 + $0x130] sm:$0xff]  ;;  %v10781_v13 = vld [vmem:[#allocation6 + $0xd8] sm:$0xff] }
 0x2cb   :  { %v1883_v40 = vrot.slane %v1882_v19, 2  ;;  %7813 = vmatpush3.msra.mxu1 %v11495_v29  ;;  %v10763_v29 = vld [vmem:[#allocation6 + $0x118] sm:$0xff]  ;;  %v10787_v46 = vld [vmem:[#allocation6 + $0xc8] sm:$0xff] }
 0x2cc   :  { %2185 = vmatmul.mubr.f32.vlgmr.msra.gmra.mxu1 %v1911_v5  ;;  %v1924_v16 = vadd.f32 %v1923_v48, %v1898_v0  ;;  %2320 = vmatprep.subr.mxu1 %v10718_v34  ;;  %v10757_v5 = vld [vmem:[#allocation6 + $0x110] sm:$0xff]  ;;  %v10791_v0 = vld [vmem:[#allocation6 + $0xc0] sm:$0xff] }
 0x2cd   :  { %v1884_v6 = vadd.f32 %v1883_v40, %v1882_v19  ;;  %2384 = vmatprep.mubr.f32.mxu1 %v11496_v41  ;;  %2321 = vmatpush1.msra.mxu1 %v10720_v14  ;;  %v10748_v19 = vld [vmem:[#allocation6 + $0x128] sm:$0xff]  ;;  %v10797_v48 = vld [vmem:[#allocation6 + $0xb0] sm:$0xff] }
 0x2ce   :  { %v1925_v51 = vadd.f32 %v1924_v16, %v1901_v49  ;;  %2322 = vmatprep.subr.mxu1 %v10726_v63  ;;  %v10761_v40 = vld [vmem:[#allocation6 + $0x108] sm:$0xff]  ;;  %v10807_v16 = vld [vmem:[#allocation6 + $0x98] sm:$0xff] }
 0x2cf   :  { %v1885_v44 = vrot.slane %v1884_v6, 1  ;;  %2323 = vmatpush1.msra.mxu1 %v10728_v2  ;;  %v10801_v49 = vld [vmem:[#allocation6 + $0xa8] sm:$0xff] }
 0x2d0   :  { %v1926_v52 = vrot.slane %v1925_v51, 4  ;;  %2324 = vmatprep.subr.mxu1 %v10734_v3 }
 0x2d1   :  { %v1886_v45 = vadd.f32 %v1885_v44, %v1884_v6  ;;  %2325 = vmatpush1.msra.mxu1 %v10740_v37  ;;  %v10767_v6 = vld [vmem:[#allocation6 + $0xf8] sm:$0xff]  ;;  %v10773_v44 = vld [vmem:[#allocation6 + $0x100] sm:$0xff] }
 0x2d2   :  { %v1927_v10 = vadd.f32 %v1926_v52, %v1925_v51  ;;  %2326 = vmatprep.subr.mxu1 %v10748_v19  ;;  %v10811_v51 = vld [vmem:[#allocation6 + $0xa0] sm:$0xff]  ;;  %v10819_v52 = vld [vmem:[#allocation6 + $0x88] sm:$0xff] }
 0x2d3   :  { %8333 = vmatmul.mubr.f32.vlgmr.msra.gmra.mxu0 %v1886_v45  ;;  %2327 = vmatpush1.msra.mxu1 %v10751_v26  ;;  %v10783_v45 = vld [vmem:[#allocation6 + $0xe8] sm:$0xff] }
 0x2d4   :  { %8336 = vmatpush3.msra.mxu0 %v11497_v47  ;;  %8367 = vmatprep.mubr.msk.f32.mxu0 %vm9624_vm0, %v11496_v41  ;;  %v1928_v36 = vrot.slane %v1927_v10, 2  ;;  %v10793_v47 = vld [vmem:[#allocation6 + $0xd0] sm:$0xff] }
 0x2d5   :  { %8337 = vmatprep.subr.mxu0 %v11496_v41  ;;  %2328 = vmatprep.subr.mxu1 %v10757_v5 }
 0x2d6   :  { %8338 = vmatpush3.msra.mxu0 %v11498_v50  ;;  %v1929_v22 = vadd.f32 %v1928_v36, %v1927_v10  ;;  %2329 = vmatpush1.msra.mxu1 %v10761_v40  ;;  %v10803_v50 = vld [vmem:[#allocation6 + $0xb8] sm:$0xff]  ;;  %v10829_v10 = vld [vmem:[#allocation6 + $0x70] sm:$0xff] }
 0x2d7   :  { %8339 = vmatprep.subr.mxu0 %v11496_v41  ;;  %2330 = vmatprep.subr.mxu1 %v10767_v6  ;;  %v10839_v36 = vld [vmem:[#allocation6 + $0x58] sm:$0xff] }
 0x2d8   :  { %8340 = vmatpush3.msra.mxu0 %v11499_v31  ;;  %v1930_v39 = vrot.slane %v1929_v22, 1  ;;  %2331 = vmatpush1.msra.mxu1 %v10771_v43  ;;  %v10809_v31 = vld [vmem:[#allocation6 + $0x90] sm:$0xff] }
 0x2d9   :  { %8341 = vmatprep.subr.mxu0 %v11496_v41  ;;  %2332 = vmatprep.subr.mxu1 %v10777_v12 }
 0x2da   :  { %8342 = vmatpush3.msra.mxu0 %v11500_v57  ;;  %v1931_v23 = vadd.f32 %v1930_v39, %v1929_v22  ;;  %2333 = vmatpush1.msra.mxu1 %v10781_v13  ;;  %v10815_v57 = vld [vmem:[#allocation6 + $0x80] sm:$0xff]  ;;  %v10859_v39 = vld [vmem:[#allocation6 + $0x28] sm:$0xff] }
 0x2db   :  { %8343 = vmatprep.subr.mxu0 %v11496_v41  ;;  %2334 = vmatprep.subr.mxu1 %v10787_v46  ;;  %v10849_v22 = vld [vmem:[#allocation6 + $0x40] sm:$0xff] }
 0x2dc   :  { %8344 = vmatpush3.msra.mxu0 %v11501_v30  ;;  %2335 = vmatpush1.msra.mxu1 %v10791_v0  ;;  %v10817_v30 = vld [vmem:[#allocation6 + $0x78] sm:$0xff] }
 0x2dd   :  { %8345 = vmatprep.subr.mxu0 %v11496_v41  ;;  %2336 = vmatprep.subr.mxu1 %v10797_v48 }
 0x2de   :  { %8346 = vmatpush3.msra.mxu0 %v11502_v17  ;;  %2337 = vmatpush1.msra.mxu1 %v10801_v49  ;;  %v10823_v17 = vld [vmem:[#allocation6 + $0x68] sm:$0xff] }
 0x2df   :  { %8347 = vmatprep.subr.mxu0 %v11496_v41  ;;  %2338 = vmatprep.subr.mxu1 %v10807_v16 }
 0x2e0   :  { %8348 = vmatpush3.msra.mxu0 %v11503_v33  ;;  %2339 = vmatpush1.msra.mxu1 %v10809_v31  ;;  %v10827_v33 = vld [vmem:[#allocation6 + $0x60] sm:$0xff] }
 0x2e1   :  { %8349 = vmatprep.subr.mxu0 %v11496_v41  ;;  %2340 = vmatprep.subr.mxu1 %v10815_v57 }
 0x2e2   :  { %8350 = vmatpush3.msra.mxu0 %v11504_v18  ;;  %2341 = vmatpush1.msra.mxu1 %v10817_v30  ;;  %v10833_v18 = vld [vmem:[#allocation6 + $0x50] sm:$0xff] }
 0x2e3   :  { %8351 = vmatprep.subr.mxu0 %v11496_v41  ;;  %2342 = vmatprep.subr.mxu1 %v10823_v17 }
 0x2e4   :  { %8352 = vmatpush3.msra.mxu0 %v11505_v25  ;;  %v10837_v25 = vld [vmem:[#allocation6 + $0x48] sm:$0xff]  ;;  %2343 = vmatpush1.msra.mxu1 %v10827_v33 }
 0x2e5   :  { %8353 = vmatprep.subr.mxu0 %v11496_v41  ;;  %2344 = vmatprep.subr.mxu1 %v10833_v18 }
 0x2e6   :  { %8354 = vmatpush3.msra.mxu0 %v11506_v55  ;;  %v10843_v55 = vld [vmem:[#allocation6 + $0x38] sm:$0xff]  ;;  %2345 = vmatpush1.msra.mxu1 %v10837_v25 }
 0x2e7   :  { %8355 = vmatprep.subr.mxu0 %v11496_v41  ;;  %2346 = vmatprep.subr.mxu1 %v10843_v55 }
 0x2e8   :  { %8356 = vmatpush3.msra.mxu0 %v11507_v20  ;;  %v10847_v20 = vld [vmem:[#allocation6 + $0x30] sm:$0xff] }
 0x2e9   :  { %8357 = vmatprep.subr.mxu0 %v11496_v41  ;;  %2347 = vmatpush1.msra.mxu1 %v10847_v20 }
 0x2ea   :  { %8358 = vmatpush3.msra.mxu0 %v11508_v58  ;;  %v10853_v58 = vld [vmem:[#allocation6 + $0x20] sm:$0xff] }
 0x2eb   :  { %8359 = vmatprep.subr.mxu0 %v11496_v41  ;;  %2348 = vmatprep.subr.mxu1 %v10853_v58 }
 0x2ec   :  { %8360 = vmatpush3.msra.mxu0 %v11509_v8  ;;  %v10857_v8 = vld [vmem:[#allocation6 + $0x18] sm:$0xff] }
 0x2ed   :  { %8361 = vmatprep.subr.mxu0 %v11496_v41  ;;  %2349 = vmatpush1.msra.mxu1 %v10857_v8 }
 0x2ee   :  { %8362 = vmatpush3.msra.mxu0 %v11510_v60  ;;  %v10863_v60 = vld [vmem:[#allocation6 + $0x8] sm:$0xff] }
 0x2ef   :  { %8363 = vmatprep.subr.mxu0 %v11496_v41  ;;  %2350 = vmatprep.subr.mxu1 %v10863_v60 }
 0x2f0   :  { %8364 = vmatpush3.msra.mxu0 %v11511_v24  ;;  %v10867_v24 = vld [vmem:[#allocation6] sm:$0xff] }
 0x2f1   :  { %8365 = vmatprep.subr.mxu0 %v11496_v41  ;;  %11513 = vst [vmem:[#allocation32_spill] sm:$0xff] %v10867_v24  ;;  %2351 = vmatpush1.msra.mxu1 %v10867_v24 }
 0x2f2   :  { %8366 = vmatpush3.msra.mxu0 %v11512_v61  ;;  %2461 = vmatprep.subr.mxu1 %v10718_v34 }
 0x2f3   :  { %8368 = vmatmul.mubr.f32.vlgmr.msra.gmra.mxu0 %v1931_v23  ;;  %8370 = vmatprep.subr.mxu0 %v11496_v41  ;;  %v10869_v23 = vld [vmem:[#allocation6 + $0x10] sm:$0xff] }
 0x2f4   :  { %8402 = vmatprep.mubr.msk.f32.mxu0 %vm9624_vm0, %v11496_v41  ;;  %8371 = vmatpush3.msra.mxu0 %v10722_v62  ;;  %11514 = vst [vmem:[#allocation33_spill] sm:$0xff] %v10869_v23 }
 0x2f5   :  { %8372 = vmatprep.subr.mxu0 %v11496_v41 }
 0x2f6   :  { %8373 = vmatpush3.msra.mxu0 %v10730_v38 }
 0x2f7   :  { %8374 = vmatprep.subr.mxu0 %v11496_v41 }
 0x2f8   :  { %8375 = vmatpush3.msra.mxu0 %v10736_v28 }
 0x2f9   :  { %8376 = vmatprep.subr.mxu0 %v11496_v41 }
 0x2fa   :  { %8377 = vmatpush3.msra.mxu0 %v10753_v4 }
 0x2fb   :  { %8378 = vmatprep.subr.mxu0 %v11496_v41 }
 0x2fc   :  { %8379 = vmatpush3.msra.mxu0 %v10763_v29 }
 0x2fd   :  { %8380 = vmatprep.subr.mxu0 %v11496_v41 }
 0x2fe   :  { %8381 = vmatpush3.msra.mxu0 %v10773_v44 }
 0x2ff   :  { %8382 = vmatprep.subr.mxu0 %v11496_v41 }
 0x300   :  { %8383 = vmatpush3.msra.mxu0 %v10783_v45 }
 0x301   :  { %8384 = vmatprep.subr.mxu0 %v11496_v41 }
 0x302   :  { %8385 = vmatpush3.msra.mxu0 %v10793_v47 }
 0x303   :  { %8386 = vmatprep.subr.mxu0 %v11496_v41 }
 0x304   :  { %8387 = vmatpush3.msra.mxu0 %v10803_v50 }
 0x305   :  { %8388 = vmatprep.subr.mxu0 %v11496_v41 }
 0x306   :  { %8389 = vmatpush3.msra.mxu0 %v10811_v51 }
 0x307   :  { %8390 = vmatprep.subr.mxu0 %v11496_v41 }
 0x308   :  { %8391 = vmatpush3.msra.mxu0 %v10819_v52 }
 0x309   :  { %8392 = vmatprep.subr.mxu0 %v11496_v41 }
 0x30a   :  { %8393 = vmatpush3.msra.mxu0 %v10829_v10 }
 0x30b   :  { %8394 = vmatprep.subr.mxu0 %v11496_v41 }
 0x30c   :  { %8395 = vmatpush3.msra.mxu0 %v10839_v36 }
 0x30d   :  { %8396 = vmatprep.subr.mxu0 %v11496_v41 }
 0x30e   :  { %8397 = vmatpush3.msra.mxu0 %v10849_v22 }
 0x30f   :  { %8398 = vmatprep.subr.mxu0 %v11496_v41 }
 0x310   :  { %8399 = vmatpush3.msra.mxu0 %v10859_v39 }
 0x311   :  { %8400 = vmatprep.subr.mxu0 %v11496_v41 }
 0x312   :  { %8401 = vmatpush3.msra.mxu0 %v10869_v23 }
 0x313   :  { %8405 = vmatprep.subr.mxu0 %v11496_v41 }
 0x36c   :  { %v7762_v1 = vpop.f32.mrf.mxu1 }
 0x36e   :  { %v7763_v59 = vpop.f32.mrf.mxu1 }
 0x36f   :  { %v7764_v35 = vadd.f32 %v7763_v59, %v7762_v1 }
 0x38c   :  { %v7814_v54 = vpop.f32.mrf.mxu1 }
 0x38e   :  { %v7815_v7 = vpop.f32.mrf.mxu1 }
 0x38f   :  { %v7816_v9 = vadd.f32 %v7815_v7, %v7814_v54 }
 0x393   :  { %v2116_v61 = vpop.f32.mrf.mxu0 }
 0x394   :  { %v2117_v11 = vadd.f32 %v7764_v35, %v2116_v61 }
 0x395   :  { %v8334_v53 = vpop.f32.mrf.mxu0 }
 0x396   :  { %v10879_v27 = vmul.f32 0.0015432099, %v2117_v11  ;;  %v2267_v53 = vld [vmem:[%s11515_s11] sm:$0x1]  ;;  %v11517_v11 = vld [vmem:[#allocation32_spill] sm:$0xff] }
 0x398   :  { %v2262_v32 = vmul.f32 %v10879_v27, %v10879_v27 }
 0x3b3   :  { %v2256_v21 = vpop.f32.mrf.mxu0 }
 0x3b4   :  { %v2257_v15 = vadd.f32 %v7816_v9, %v2256_v21  ;;  %v2269_v9 = vld [vmem:[%s11516_s5] sm:$0x1]  ;;  %v11519_v21 = vmov 0  }
 0x3b5   :  { %v8369_v42 = vpop.f32.mrf.mxu0 }
 0x3b6   :  { %v2261_v34 = vmul.f32 0.0015432099, %v2257_v15 }
 0x3b8   :  { %v2263_v56 = vsub.f32 %v2261_v34, %v2262_v32  ;;  %v11518_v32 = vld [vmem:[#allocation33_spill] sm:$0xff] }
 0x3ba   :  { %v2264_v23 = vmax.f32 %v2263_v56, 0.0 }
 0x3bc   :  { %v2265_v24 = vadd.f32 1e-05, %v2264_v23 }
 0x3be   :  { %9301 = vrsqrt.f32 %v2265_v24  ;;  %v11530_v24 = vld [vmem:[#allocation67_spill] sm:$0xff] }
 0x3cb   :  { %v9302_v1 = vpop.eup %9301 }
 0x3cc   :  { %v2268_v59 = vmul.f32 %v9302_v1, %v2267_v53 }
 0x3ce   :  { %2385 = vmatmul.mubr.f32.vlgmr.msra.gmra.mxu1 %v2268_v59  ;;  %8403 = vmatmul.mubr.f32.vlgmr.msra.gmra.mxu0 %v2268_v59  ;;  %v2270_v7 = vmul.f32 %v2268_v59, %v10879_v27  ;;  %v2602_v27 = vlaneseq }
 0x3cf   :  { %2462 = vmatpush1.msra.mxu1 %v10720_v14  ;;  %8406 = vmatpush3.msra.mxu0 %v10722_v62 }
 0x3d0   :  { %2463 = vmatprep.subr.mxu1 %v10726_v63  ;;  %8407 = vmatprep.subr.mxu0 %v11496_v41  ;;  %v2271_v15 = vsub.f32 %v2269_v9, %v2270_v7  ;;  %v2603_v54 = vshrl.u32 %v2602_v27, 7 }
 0x3d1   :  { %2464 = vmatpush1.msra.mxu1 %v10728_v2  ;;  %8408 = vmatpush3.msra.mxu0 %v10730_v38 }
 0x3d2   :  { %2465 = vmatprep.subr.mxu1 %v10734_v3  ;;  %8409 = vmatprep.subr.mxu0 %v11496_v41  ;;  %v10957_v14 = vsub.s32 0, %v2603_v54 }
 0x3d3   :  { %2466 = vmatpush1.msra.mxu1 %v10740_v37  ;;  %8410 = vmatpush3.msra.mxu0 %v10736_v28 }
 0x3d4   :  { %2467 = vmatprep.subr.mxu1 %v10748_v19  ;;  %8411 = vmatprep.subr.mxu0 %v11496_v41 }
 0x3d5   :  { %2468 = vmatpush1.msra.mxu1 %v10751_v26  ;;  %8412 = vmatpush3.msra.mxu0 %v10753_v4  ;;  %v11520_v26 = vld [vmem:[#allocation61_spill] sm:$0xff] }
 0x3d6   :  { %2469 = vmatprep.subr.mxu1 %v10757_v5  ;;  %8413 = vmatprep.subr.mxu0 %v11496_v41  ;;  %v11521_v5 = vld [vmem:[#allocation58_spill] sm:$0xff] }
 0x3d7   :  { %2470 = vmatpush1.msra.mxu1 %v10761_v40  ;;  %8414 = vmatpush3.msra.mxu0 %v10763_v29  ;;  %v11522_v29 = vld [vmem:[#allocation60_spill] sm:$0xff] }
 0x3d8   :  { %2471 = vmatprep.subr.mxu1 %v10767_v6  ;;  %8415 = vmatprep.subr.mxu0 %v11496_v41 }
 0x3d9   :  { %2472 = vmatpush1.msra.mxu1 %v10771_v43  ;;  %8416 = vmatpush3.msra.mxu0 %v10773_v44 }
 0x3da   :  { %2473 = vmatprep.subr.mxu1 %v10777_v12  ;;  %8417 = vmatprep.subr.mxu0 %v11496_v41  ;;  %v11523_v12 = vld [vmem:[#allocation57_spill] sm:$0xff] }
 0x3db   :  { %2474 = vmatpush1.msra.mxu1 %v10781_v13  ;;  %8418 = vmatpush3.msra.mxu0 %v10783_v45  ;;  %v11524_v45 = vld [vmem:[#allocation59_spill] sm:$0xff] }
 0x3dc   :  { %2475 = vmatprep.subr.mxu1 %v10787_v46  ;;  %8419 = vmatprep.subr.mxu0 %v11496_v41 }
 0x3dd   :  { %2476 = vmatpush1.msra.mxu1 %v10791_v0  ;;  %8420 = vmatpush3.msra.mxu0 %v10793_v47  ;;  %v11525_v47 = vld [vmem:[#allocation62_spill] sm:$0xff] }
 0x3de   :  { %2477 = vmatprep.subr.mxu1 %v10797_v48  ;;  %8421 = vmatprep.subr.mxu0 %v11496_v41 }
 0x3df   :  { %2478 = vmatpush1.msra.mxu1 %v10801_v49  ;;  %8422 = vmatpush3.msra.mxu0 %v10803_v50  ;;  %v11526_v49 = vld [vmem:[#allocation55_spill] sm:$0xff] }
 0x3e0   :  { %2479 = vmatprep.subr.mxu1 %v10807_v16  ;;  %8423 = vmatprep.subr.mxu0 %v11496_v41  ;;  %v11527_v16 = vld [vmem:[#allocation53_spill] sm:$0xff] }
 0x3e1   :  { %2480 = vmatpush1.msra.mxu1 %v10809_v31  ;;  %8424 = vmatpush3.msra.mxu0 %v10811_v51 }
 0x3e2   :  { %2481 = vmatprep.subr.mxu1 %v10815_v57  ;;  %8425 = vmatprep.subr.mxu0 %v11496_v41 }
 0x3e3   :  { %2482 = vmatpush1.msra.mxu1 %v10817_v30  ;;  %8426 = vmatpush3.msra.mxu0 %v10819_v52  ;;  %v11528_v30 = vld [vmem:[#allocation56_spill] sm:$0xff] }
 0x3e4   :  { %2483 = vmatprep.subr.mxu1 %v10823_v17  ;;  %8427 = vmatprep.subr.mxu0 %v11496_v41 }
 0x3e5   :  { %2484 = vmatpush1.msra.mxu1 %v10827_v33  ;;  %8428 = vmatpush3.msra.mxu0 %v10829_v10 }
 0x3e6   :  { %2485 = vmatprep.subr.mxu1 %v10833_v18  ;;  %8429 = vmatprep.subr.mxu0 %v11496_v41 }
 0x3e7   :  { %2486 = vmatpush1.msra.mxu1 %v10837_v25  ;;  %8430 = vmatpush3.msra.mxu0 %v10839_v36 }
 0x3e8   :  { %2487 = vmatprep.subr.mxu1 %v10843_v55  ;;  %8431 = vmatprep.subr.mxu0 %v11496_v41 }
 0x3e9   :  { %2488 = vmatpush1.msra.mxu1 %v10847_v20  ;;  %8432 = vmatpush3.msra.mxu0 %v10849_v22 }
 0x3ea   :  { %2489 = vmatprep.subr.mxu1 %v10853_v58  ;;  %8433 = vmatprep.subr.mxu0 %v11496_v41 }
 0x3eb   :  { %2490 = vmatpush1.msra.mxu1 %v10857_v8  ;;  %8434 = vmatpush3.msra.mxu0 %v10859_v39  ;;  %v11529_v39 = vld [vmem:[#allocation54_spill] sm:$0xff] }
 0x3ec   :  { %2491 = vmatprep.subr.mxu1 %v10863_v60  ;;  %8435 = vmatprep.subr.mxu0 %v11496_v41 }
 0x3ed   :  { %2492 = vmatpush1.msra.mxu1 %v11517_v11  ;;  %2525 = vmatprep.mubr.f32.mxu1 %v11496_v41 }
 0x3ee   :  { %8436 = vmatpush3.msra.mxu0 %v11518_v32  ;;  %8437 = vmatprep.mubr.msk.f32.mxu0 %vm9624_vm0, %v11496_v41 }
 0x3ef   :  { %2526 = vmatmul.mubr.f32.vlgmr.msra.gmra.mxu1 %v2271_v15  ;;  %8438 = vmatmul.mubr.f32.vlgmr.msra.gmra.mxu0 %v2271_v15 }
 0x3f0   :  { %2733 = vmatprep.mubr.bf16.mxu1 %v11519_v21  ;;  %2923 = vmatprep.mubr.bf16.mxu0 %v11519_v21 }
 0x48e   :  { %v2457_v42 = vpop.f32.mrf.mxu0  ;;  %v2386_v35 = vpop.f32.mrf.mxu1 }
 0x48f   :  { %v2605_v38 = vrot.slane %v2386_v35, %v10957_v14  ;;  %v2613_v0 = vrot.slane %v2457_v42, %v10957_v14 }
 0x490   :  { %v8404_v56 = vpop.f32.mrf.mxu0  ;;  %v2388_v62 = vpop.f32.mrf.mxu1 }
 0x491   :  { %v2609_v28 = vrot.slane %v2388_v62, %v10957_v14  ;;  %v2626_v4 = vmul.f32 %v2605_v38, %v11520_v26  ;;  %v2620_v13 = vmul.f32 %v2605_v38, %v11523_v12  ;;  %v2623_v46 = vmul.f32 %v2605_v38, %v11524_v45  ;;  %v11531_v62 = vld [vmem:[#allocation65_spill] sm:$0xff] }
 0x492   :  { %v2614_v52 = vmul.f32 %v2605_v38, %v11528_v30  ;;  %v2617_v60 = vmul.f32 %v2605_v38, %v11529_v39  ;;  %v2628_v23 = vmul.f32 %v2613_v0, %v11530_v24  ;;  %v8848_v30 = vld [vmem:[#allocation7 + $0x60] ss:$8 sps:$4 sm:$0xff]   ;;  %v8880_v39 = vld [vmem:[#allocation7 + $0xf4] ss:$8 sps:$4 sm:$0xff]   ;;  %v8886_v24 = vld [vmem:[#allocation7 + $0xe4] ss:$8 sps:$4 sm:$0xff]  }
 0x493   :  { %v2621_v40 = vmul.f32 %v2609_v28, %v11521_v5  ;;  %v2624_v6 = vmul.f32 %v2609_v28, %v11522_v29  ;;  %v2627_v48 = vmul.f32 %v2609_v28, %v11525_v47  ;;  %v2615_v50 = vmul.f32 %v2609_v28, %v11526_v49  ;;  %v11533_v5 = vld [vmem:[#allocation64_spill] sm:$0xff]  ;;  %v11534_v29 = vld [vmem:[#allocation63_spill] sm:$0xff] }
 0x494   :  { %v2618_v31 = vmul.f32 %v2609_v28, %v11527_v16  ;;  %v11009_v49 = vld [vmem:[#allocation9 + $0x18] sm:$0xff]   ;;  %v8843_v16 = vld [vmem:[#allocation9 + $0x8] sm:$0xff]  }
 0x4af   :  { %v2527_v63 = vpop.f32.mrf.mxu1  ;;  %v2598_v2 = vpop.f32.mrf.mxu0 }
 0x4b0   :  { %v2632_v37 = vrot.slane %v2527_v63, %v10957_v14  ;;  %v2640_v17 = vrot.slane %v2598_v2, %v10957_v14  ;;  %v2622_v63 = vmul.f32 %v2613_v0, %v11531_v62  ;;  %v11532_v2 = vld [vmem:[#allocation66_spill] sm:$0xff]  ;;  %v8883_v62 = vld [vmem:[#allocation7 + $0x144] ss:$8 sps:$4 sm:$0xff]  }
 0x4b1   :  { %v8439_v3 = vpop.f32.mrf.mxu0  ;;  %v2529_v19 = vpop.f32.mrf.mxu1  ;;  %v2625_v38 = vmul.f32 %v2613_v0, %v11532_v2  ;;  %v8922_v2 = vld [vmem:[#allocation7 + $0x84] ss:$8 sps:$4 sm:$0xff]  }
 0x4b2   :  { %v2636_v43 = vrot.slane %v2529_v19, %v10957_v14  ;;  %v2653_v44 = vadd.f32 %v2632_v37, %v2626_v4  ;;  %v2647_v18 = vadd.f32 %v2632_v37, %v2620_v13  ;;  %v2650_v25 = vadd.f32 %v2632_v37, %v2623_v46  ;;  %v8840_v19 = vld [vmem:[#allocation9] sm:$0xff]   ;;  %v10985_v4 = vld [vmem:[#allocation9 + $0x10] sm:$0xff]  }
 0x4b3   :  { %v2641_v61 = vadd.f32 %v2632_v37, %v2614_v52  ;;  %v2644_v53 = vadd.f32 %v2632_v37, %v2617_v60  ;;  %v2655_v7 = vadd.f32 %v2640_v17, %v2628_v23  ;;  %v2649_v3 = vadd.f32 %v2640_v17, %v2622_v63  ;;  %v8853_v52 = vld [vmem:[#allocation7 + $0x54] ss:$8 sps:$4 sm:$0xff]   ;;  %v8878_v60 = vld [vmem:[#allocation7 + $0xf0] ss:$8 sps:$4 sm:$0xff]   ;;  %v8884_v23 = vld [vmem:[#allocation7 + $0xe0] ss:$8 sps:$4 sm:$0xff]  }
 0x4b4   :  { %v2648_v51 = vadd.f32 %v2636_v43, %v2621_v40  ;;  %v2651_v57 = vadd.f32 %v2636_v43, %v2624_v6  ;;  %v2654_v33 = vadd.f32 %v2636_v43, %v2627_v48  ;;  %v2668_v10 = vmax.f32 %v2653_v44, 0.0  ;;  %v8914_v63 = vld [vmem:[#allocation7 + $0x90] ss:$8 sps:$4 sm:$0xff]  }
 0x4b5   :  { %v2642_v36 = vadd.f32 %v2636_v43, %v2615_v50  ;;  %v2645_v55 = vadd.f32 %v2636_v43, %v2618_v31  ;;  %v2662_v1 = vmax.f32 %v2647_v18, 0.0  ;;  %v2665_v59 = vmax.f32 %v2650_v25, 0.0  ;;  %v8847_v50 = vld [vmem:[#allocation7 + $0x74] ss:$8 sps:$4 sm:$0xff]   ;;  %v11021_v31 = vld [vmem:[#allocation9 + $0x20] sm:$0xff]  }
 0x4b6   :  { %v2663_v20 = vmax.f32 %v2648_v51, 0.0  ;;  %v2666_v22 = vmax.f32 %v2651_v57, 0.0  ;;  %v2669_v58 = vmax.f32 %v2654_v33, 0.0  ;;  %v2677_v8 = vpack.c.bf16 %v2668_v10, %v2668_v10  ;;  %v8845_v51 = vld [vmem:[#allocation7 + $0x70] ss:$8 sps:$4 sm:$0xff]  }
 0x4b7   :  { %v2657_v9 = vmax.f32 %v2642_v36, 0.0  ;;  %v2660_v11 = vmax.f32 %v2645_v55, 0.0  ;;  %v2656_v42 = vmax.f32 %v2641_v61, 0.0  ;;  %v2659_v56 = vmax.f32 %v2644_v53, 0.0  ;;  %v8850_v57 = vld [vmem:[#allocation7 + $0x64] ss:$8 sps:$4 sm:$0xff]  }
 0x4b8   :  { %v10976_v34 = vpack.c.bf16 %v2669_v58, %v2669_v58  ;;  %v2693_v15 = vsel %vm2691_vm2, %v2677_v8, 0  ;;  %v2675_v32 = vpack.c.bf16 %v2666_v22, %v2663_v20  ;;  %v2674_v27 = vpack.c.bf16 %v2665_v59, %v2662_v1  ;;  %v8856_v33 = vld [vmem:[#allocation7 + $0x44] ss:$8 sps:$4 sm:$0xff]   ;;  %v8854_v10 = vld [vmem:[#allocation7 + $0x40] ss:$8 sps:$4 sm:$0xff]  }
 0x4b9   :  { %v2672_v54 = vpack.c.bf16 %v2660_v11, %v2657_v9  ;;  %v2670_v35 = vmax.f32 %v2655_v7, 0.0  ;;  %v2652_v28 = vadd.f32 %v2640_v17, %v2625_v38  ;;  %v2671_v37 = vpack.c.bf16 %v2659_v56, %v2656_v42  ;;  %v8859_v18 = vld [vmem:[#allocation7 + $0x34] ss:$8 sps:$4 sm:$0xff]   ;;  %v8857_v25 = vld [vmem:[#allocation7 + $0x30] ss:$8 sps:$4 sm:$0xff]  }
 0x4ba   :  { %7247 = vmatprep.subr.msk.bf16.mxu1 %vm2691_vm2, %v10976_v34  ;;  %7255 = vmatprep.subr.msk.bf16.mxu0 %vm2691_vm2, %v10976_v34  ;;  %v2616_v40 = vmul.f32 %v2613_v0, %v11533_v5  ;;  %v2619_v6 = vmul.f32 %v2613_v0, %v11534_v29  ;;  %v2664_v12 = vmax.f32 %v2649_v3, 0.0  ;;  %v8862_v36 = vld [vmem:[#allocation7 + $0x24] ss:$8 sps:$4 sm:$0xff]   ;;  %v8860_v55 = vld [vmem:[#allocation7 + $0x20] ss:$8 sps:$4 sm:$0xff]  }
 0x4bb   :  { %2712 = vmatpush1.bf16.msra.mxu1 %v2693_v15  ;;  %2902 = vmatpush1.bf16.msra.mxu0 %v2693_v15  ;;  %v2679_v26 = vpack.c.bf16 %v2670_v35, %v2670_v35  ;;  %v2667_v13 = vmax.f32 %v2652_v28, 0.0  ;;  %v8868_v20 = vld [vmem:[#allocation7 + $0x14] ss:$8 sps:$4 sm:$0xff]   ;;  %v8866_v22 = vld [vmem:[#allocation7 + $0x10] ss:$8 sps:$4 sm:$0xff]  }
 0x4bc   :  { %2713 = vmatprep.subr.bf16.mxu1 %v2675_v32  ;;  %2903 = vmatprep.subr.bf16.mxu0 %v2675_v32  ;;  %v2643_v43 = vadd.f32 %v2640_v17, %v2616_v40  ;;  %v2646_v44 = vadd.f32 %v2640_v17, %v2619_v6  ;;  %v8851_v17 = vld [vmem:[#allocation7 + $0x50] ss:$8 sps:$4 sm:$0xff]   ;;  %v8874_v58 = vld [vmem:[#allocation7 + $0x4] ss:$8 sps:$4 sm:$0xff]   ;;  %v8872_v8 = vld [vmem:[#allocation7] ss:$8 sps:$4 sm:$0xff]  }
 0x4bd   :  { %v10994_v45 = vsel %vm2691_vm2, %v2679_v26, 0  ;;  %v11000_v47 = vpack.c.bf16 %v2667_v13, %v2664_v12  ;;  %v8892_v61 = vld [vmem:[#allocation7 + $0xd4] ss:$8 sps:$4 sm:$0xff]   ;;  %v8898_v53 = vld [vmem:[#allocation7 + $0xc4] ss:$8 sps:$4 sm:$0xff]  }
 0x4be   :  { %v2658_v46 = vmax.f32 %v2643_v43, 0.0  ;;  %v2661_v0 = vmax.f32 %v2646_v44, 0.0  ;;  %v8865_v1 = vld [vmem:[#allocation7 + $0x174] ss:$8 sps:$4 sm:$0xff]   ;;  %v8896_v59 = vld [vmem:[#allocation7 + $0xc0] ss:$8 sps:$4 sm:$0xff]  }
 0x4bf   :  { %2714 = vmatpush1.bf16.msra.mxu1 %v2674_v27  ;;  %2904 = vmatpush1.bf16.msra.mxu0 %v2674_v27  ;;  %v8904_v7 = vld [vmem:[#allocation7 + $0xb4] ss:$8 sps:$4 sm:$0xff]   ;;  %v8863_v9 = vld [vmem:[#allocation7 + $0x170] ss:$8 sps:$4 sm:$0xff]   ;;  %v8871_v11 = vld [vmem:[#allocation7 + $0x164] ss:$8 sps:$4 sm:$0xff]  }
 0x4c0   :  { %2715 = vmatprep.subr.bf16.mxu1 %v2672_v54  ;;  %2905 = vmatprep.subr.bf16.mxu0 %v2672_v54  ;;  %v11007_v48 = vpack.c.bf16 %v2661_v0, %v2658_v46  ;;  %v8869_v42 = vld [vmem:[#allocation7 + $0x160] ss:$8 sps:$4 sm:$0xff]   ;;  %v8877_v56 = vld [vmem:[#allocation7 + $0x154] ss:$8 sps:$4 sm:$0xff]   ;;  %v8875_v35 = vld [vmem:[#allocation7 + $0x150] ss:$8 sps:$4 sm:$0xff]  }
 0x4c1   :  { %v8881_v38 = vld [vmem:[#allocation7 + $0x140] ss:$8 sps:$4 sm:$0xff]   ;;  %v8889_v3 = vld [vmem:[#allocation7 + $0x134] ss:$8 sps:$4 sm:$0xff]   ;;  %v8895_v26 = vld [vmem:[#allocation7 + $0x124] ss:$8 sps:$4 sm:$0xff]  }
 0x4c2   :  { %v8920_v28 = vld [vmem:[#allocation7 + $0x80] ss:$8 sps:$4 sm:$0xff]   ;;  %v8901_v5 = vld [vmem:[#allocation7 + $0x114] ss:$8 sps:$4 sm:$0xff]   ;;  %v8899_v40 = vld [vmem:[#allocation7 + $0x110] ss:$8 sps:$4 sm:$0xff]  }
 0x4c3   :  { %2716 = vmatpush1.bf16.msra.mxu1 %v2671_v37  ;;  %2906 = vmatpush1.bf16.msra.mxu0 %v2671_v37  ;;  %v8907_v29 = vld [vmem:[#allocation7 + $0x104] ss:$8 sps:$4 sm:$0xff]   ;;  %v8905_v6 = vld [vmem:[#allocation7 + $0x100] ss:$8 sps:$4 sm:$0xff]   ;;  %v8913_v43 = vld [vmem:[#allocation7 + $0x1f4] ss:$8 sps:$4 sm:$0xff]  }
 0x4c4   :  { %7259 = vmatprep.subr.msk.bf16.mxu0 %vm2691_vm2, %v10976_v34  ;;  %8440 = vmatprep.subr.bf16.mxu1 %v11496_v41  ;;  %v8911_v44 = vld [vmem:[#allocation7 + $0x1f0] ss:$8 sps:$4 sm:$0xff]   ;;  %v8919_v12 = vld [vmem:[#allocation7 + $0x1e4] ss:$8 sps:$4 sm:$0xff]   ;;  %v8917_v13 = vld [vmem:[#allocation7 + $0x1e0] ss:$8 sps:$4 sm:$0xff]  }
 0x4c5   :  { %v8923_v46 = vld [vmem:[#allocation7 + $0x1d0] ss:$8 sps:$4 sm:$0xff]   ;;  %v8931_v0 = vld [vmem:[#allocation7 + $0x1c4] ss:$8 sps:$4 sm:$0xff]  }
 0x4c6   :  { %7248 = vmatmul.mubr.msk.bf16.vlgmr.msra.gmra.mxu1 %vm2687_vm3, %v8840_v19  ;;  %7256 = vmatmul.mubr.msk.bf16.vlgmr.msra.gmra.mxu0 %vm2687_vm3, %v10985_v4 }
 0x4c7   :  { %8441 = vmatpush3.bf16.msra.mxu1 %v10994_v45  ;;  %2997 = vmatpush1.bf16.msra.mxu0 %v2693_v15 }
 0x4c8   :  { %2998 = vmatprep.subr.bf16.mxu0 %v2675_v32  ;;  %8442 = vmatprep.subr.bf16.mxu1 %v11496_v41 }
 0x4c9   :  { %8446 = vmatprep.mubr.msk.bf16.mxu1 %vm9624_vm0, %v11496_v41  ;;  %3018 = vmatprep.mubr.bf16.mxu0 %v11519_v21 }
 0x4cb   :  { %8443 = vmatpush3.bf16.msra.mxu1 %v11000_v47  ;;  %2999 = vmatpush1.bf16.msra.mxu0 %v2674_v27 }
 0x4cc   :  { %3000 = vmatprep.subr.bf16.mxu0 %v2672_v54  ;;  %8444 = vmatprep.subr.bf16.mxu1 %v11496_v41 }
 0x4cf   :  { %8445 = vmatpush3.bf16.msra.mxu1 %v11007_v48  ;;  %3001 = vmatpush1.bf16.msra.mxu0 %v2671_v37 }
 0x4d0   :  { %7251 = vmatprep.subr.msk.bf16.mxu1 %vm2691_vm2, %v10976_v34  ;;  %7263 = vmatprep.subr.msk.bf16.mxu0 %vm2691_vm2, %v10976_v34  ;;  %v8890_v34 = vld [vmem:[#allocation7 + $0xd0] ss:$8 sps:$4 sm:$0xff]  }
 0x4d2   :  { %8447 = vmatmul.mubr.msk.bf16.vlgmr.msra.gmra.mxu1 %vm2687_vm3, %v8840_v19  ;;  %7260 = vmatmul.mubr.msk.bf16.vlgmr.msra.gmra.mxu0 %vm2687_vm3, %v11009_v49  ;;  %v8887_v19 = vld [vmem:[#allocation7 + $0x130] ss:$8 sps:$4 sm:$0xff]  }
 0x4d3   :  { %2807 = vmatpush1.bf16.msra.mxu1 %v2693_v15  ;;  %3092 = vmatpush1.bf16.msra.mxu0 %v2693_v15  ;;  %v8902_v15 = vld [vmem:[#allocation7 + $0xb0] ss:$8 sps:$4 sm:$0xff]  }
 0x4d4   :  { %2808 = vmatprep.subr.bf16.mxu1 %v2675_v32  ;;  %3093 = vmatprep.subr.bf16.mxu0 %v2675_v32  ;;  %v8910_v32 = vld [vmem:[#allocation7 + $0xa4] ss:$8 sps:$4 sm:$0xff]  }
 0x4d5   :  { %2828 = vmatprep.mubr.bf16.mxu1 %v11519_v21  ;;  %3113 = vmatprep.mubr.bf16.mxu0 %v11519_v21 }
 0x4d7   :  { %2809 = vmatpush1.bf16.msra.mxu1 %v2674_v27  ;;  %3094 = vmatpush1.bf16.msra.mxu0 %v2674_v27  ;;  %v8908_v27 = vld [vmem:[#allocation7 + $0xa0] ss:$8 sps:$4 sm:$0xff]  }
 0x4d8   :  { %2810 = vmatprep.subr.bf16.mxu1 %v2672_v54  ;;  %3095 = vmatprep.subr.bf16.mxu0 %v2672_v54  ;;  %v8916_v54 = vld [vmem:[#allocation7 + $0x94] ss:$8 sps:$4 sm:$0xff]  }
 0x4db   :  { %2811 = vmatpush1.bf16.msra.mxu1 %v2671_v37  ;;  %3096 = vmatpush1.bf16.msra.mxu0 %v2671_v37  ;;  %v8928_v37 = vld [vmem:[#allocation7 + $0x274] ss:$8 sps:$4 sm:$0xff]  }
 0x4dc   :  { %8450 = vmatprep.subr.bf16.mxu1 %v11496_v41  ;;  %4620 = vmatprep.subr.bf16.mxu0 %v8847_v50  ;;  %v8943_v50 = vld [vmem:[#allocation7 + $0x1a4] ss:$8 sps:$4 sm:$0xff]  }
 0x4de   :  { %7252 = vmatmul.mubr.msk.bf16.vlgmr.msra.gmra.mxu1 %vm2687_vm3, %v8843_v16  ;;  %7264 = vmatmul.mubr.msk.bf16.vlgmr.msra.gmra.mxu0 %vm2687_vm3, %v11021_v31 }
 0x4df   :  { %8451 = vmatpush3.bf16.msra.mxu1 %v10994_v45  ;;  %8456 = vmatprep.mubr.msk.bf16.mxu1 %vm9624_vm0, %v11496_v41 }
 0x4e0   :  { %8452 = vmatprep.subr.bf16.mxu1 %v11496_v41  ;;  %4621 = vmatpush1.bf16.msra.mxu0 %v8845_v51  ;;  %v8947_v51 = vld [vmem:[#allocation7 + $0x190] ss:$8 sps:$4 sm:$0xff]  }
 0x4e1   :  { %4622 = vmatprep.subr.bf16.mxu0 %v8850_v57  ;;  %v8955_v57 = vld [vmem:[#allocation7 + $0x184] ss:$8 sps:$4 sm:$0xff]  }
 0x4e3   :  { %8453 = vmatpush3.bf16.msra.mxu1 %v11000_v47 }
 0x4e4   :  { %8454 = vmatprep.subr.bf16.mxu1 %v11496_v41  ;;  %4623 = vmatpush1.bf16.msra.mxu0 %v8848_v30  ;;  %v8953_v30 = vld [vmem:[#allocation7 + $0x180] ss:$8 sps:$4 sm:$0xff]  }
 0x4e5   :  { %4624 = vmatprep.subr.bf16.mxu0 %v8853_v52  ;;  %v8961_v52 = vld [vmem:[#allocation7 + $0x374] ss:$8 sps:$4 sm:$0xff]  }
 0x4e7   :  { %8455 = vmatpush3.bf16.msra.mxu1 %v11007_v48 }
 0x4e8   :  { %8460 = vmatprep.subr.bf16.mxu1 %v11496_v41  ;;  %4625 = vmatpush1.bf16.msra.mxu0 %v8851_v17 }
 0x4e9   :  { %4626 = vmatprep.subr.bf16.mxu0 %v8856_v33 }
 0x4ea   :  { %8457 = vmatmul.mubr.msk.bf16.vlgmr.msra.gmra.mxu1 %vm2687_vm3, %v8843_v16  ;;  %v8941_v16 = vld [vmem:[#allocation7 + $0x1a0] ss:$8 sps:$4 sm:$0xff]  }
 0x4eb   :  { %8461 = vmatpush3.bf16.msra.mxu1 %v10994_v45  ;;  %8466 = vmatprep.mubr.msk.bf16.mxu1 %vm9624_vm0, %v11496_v41 }
 0x4ec   :  { %8462 = vmatprep.subr.bf16.mxu1 %v11496_v41  ;;  %4627 = vmatpush1.bf16.msra.mxu0 %v8854_v10 }
 0x4ed   :  { %4628 = vmatprep.subr.bf16.mxu0 %v8859_v18 }
 0x4ef   :  { %8463 = vmatpush3.bf16.msra.mxu1 %v11000_v47 }
 0x4f0   :  { %8464 = vmatprep.subr.bf16.mxu1 %v11496_v41  ;;  %4629 = vmatpush1.bf16.msra.mxu0 %v8857_v25 }
 0x4f1   :  { %4630 = vmatprep.subr.bf16.mxu0 %v8862_v36 }
 0x4f3   :  { %8465 = vmatpush3.bf16.msra.mxu1 %v11007_v48 }
 0x4f4   :  { %8470 = vmatprep.subr.bf16.mxu1 %v11496_v41  ;;  %4631 = vmatpush1.bf16.msra.mxu0 %v8860_v55 }
 0x4f5   :  { %4632 = vmatprep.subr.bf16.mxu0 %v8868_v20 }
 0x4f6   :  { %8467 = vmatmul.mubr.msk.bf16.vlgmr.msra.gmra.mxu1 %vm2687_vm3, %v10985_v4  ;;  %v8893_v4 = vld [vmem:[#allocation7 + $0x120] ss:$8 sps:$4 sm:$0xff]  }
 0x4f7   :  { %8471 = vmatpush3.bf16.msra.mxu1 %v10994_v45  ;;  %8476 = vmatprep.mubr.msk.bf16.mxu1 %vm9624_vm0, %v11496_v41 }
 0x4f8   :  { %8472 = vmatprep.subr.bf16.mxu1 %v11496_v41  ;;  %4633 = vmatpush1.bf16.msra.mxu0 %v8866_v22 }
 0x4f9   :  { %4634 = vmatprep.subr.bf16.mxu0 %v8874_v58  ;;  %v8926_v58 = vld [vmem:[#allocation7 + $0x270] ss:$8 sps:$4 sm:$0xff]  }
 0x4fb   :  { %8473 = vmatpush3.bf16.msra.mxu1 %v11000_v47 }
 0x4fc   :  { %8474 = vmatprep.subr.bf16.mxu1 %v11496_v41  ;;  %4635 = vmatpush1.bf16.msra.mxu0 %v8872_v8 }
 0x4fd   :  { %4636 = vmatprep.subr.bf16.mxu0 %v8880_v39  ;;  %v8934_v39 = vld [vmem:[#allocation7 + $0x264] ss:$8 sps:$4 sm:$0xff]  }
 0x4ff   :  { %8475 = vmatpush3.bf16.msra.mxu1 %v11007_v48 }
 0x500   :  { %8480 = vmatprep.subr.bf16.mxu1 %v11496_v41  ;;  %4637 = vmatpush2.bf16.msra.mxu0 %v8878_v60 }
 0x501   :  { %4638 = vmatprep.subr.bf16.mxu0 %v8886_v24  ;;  %v8932_v24 = vld [vmem:[#allocation7 + $0x260] ss:$8 sps:$4 sm:$0xff]  }
 0x502   :  { %8477 = vmatmul.mubr.msk.bf16.vlgmr.msra.gmra.mxu1 %vm2687_vm3, %v11009_v49  ;;  %v8935_v49 = vld [vmem:[#allocation7 + $0x1b0] ss:$8 sps:$4 sm:$0xff]  }
 0x503   :  { %8481 = vmatpush3.bf16.msra.mxu1 %v10994_v45  ;;  %8486 = vmatprep.mubr.msk.bf16.mxu1 %vm9624_vm0, %v11496_v41  ;;  %v8925_v45 = vld [vmem:[#allocation7 + $0x1d4] ss:$8 sps:$4 sm:$0xff]  }
 0x504   :  { %8482 = vmatprep.subr.bf16.mxu1 %v11496_v41  ;;  %4639 = vmatpush2.bf16.msra.mxu0 %v8884_v23 }
 0x505   :  { %4640 = vmatprep.subr.bf16.mxu0 %v8892_v61  ;;  %v8940_v61 = vld [vmem:[#allocation7 + $0x254] ss:$8 sps:$4 sm:$0xff]  }
 0x507   :  { %8483 = vmatpush3.bf16.msra.mxu1 %v11000_v47  ;;  %v8929_v47 = vld [vmem:[#allocation7 + $0x1c0] ss:$8 sps:$4 sm:$0xff]  }
 0x508   :  { %8484 = vmatprep.subr.bf16.mxu1 %v11496_v41  ;;  %4641 = vmatpush2.bf16.msra.mxu0 %v8890_v34 }
 0x509   :  { %4642 = vmatprep.subr.bf16.mxu0 %v8898_v53 }
 0x50b   :  { %8485 = vmatpush3.bf16.msra.mxu1 %v11007_v48  ;;  %v8937_v48 = vld [vmem:[#allocation7 + $0x1b4] ss:$8 sps:$4 sm:$0xff]  }
 0x50c   :  { %4663 = vmatprep.subr.bf16.mxu1 %v8865_v1  ;;  %4643 = vmatpush2.bf16.msra.mxu0 %v8896_v59  ;;  %v8938_v59 = vld [vmem:[#allocation7 + $0x250] ss:$8 sps:$4 sm:$0xff]  }
 0x50d   :  { %4644 = vmatprep.subr.bf16.mxu0 %v8904_v7 }
 0x50e   :  { %8487 = vmatmul.mubr.msk.bf16.vlgmr.msra.gmra.mxu1 %vm2687_vm3, %v11021_v31  ;;  %v8949_v31 = vld [vmem:[#allocation7 + $0x194] ss:$8 sps:$4 sm:$0xff]  }
 0x50f   :  { %4664 = vmatpush1.bf16.msra.mxu1 %v8863_v9  ;;  %v8946_v9 = vld [vmem:[#allocation7 + $0x244] ss:$8 sps:$4 sm:$0xff]  }
 0x510   :  { %4665 = vmatprep.subr.bf16.mxu1 %v8871_v11  ;;  %4645 = vmatpush2.bf16.msra.mxu0 %v8902_v15 }
 0x511   :  { %4646 = vmatprep.subr.bf16.mxu0 %v8910_v32  ;;  %v8944_v32 = vld [vmem:[#allocation7 + $0x240] ss:$8 sps:$4 sm:$0xff]  }
 0x513   :  { %4666 = vmatpush1.bf16.msra.mxu1 %v8869_v42  ;;  %v8952_v42 = vld [vmem:[#allocation7 + $0x234] ss:$8 sps:$4 sm:$0xff]  }
 0x514   :  { %4667 = vmatprep.subr.bf16.mxu1 %v8877_v56  ;;  %4647 = vmatpush2.bf16.msra.mxu0 %v8908_v27  ;;  %v8950_v27 = vld [vmem:[#allocation7 + $0x230] ss:$8 sps:$4 sm:$0xff]  }
 0x515   :  { %4648 = vmatprep.subr.bf16.mxu0 %v8916_v54 }
 0x517   :  { %4668 = vmatpush1.bf16.msra.mxu1 %v8875_v35  ;;  %v8958_v35 = vld [vmem:[#allocation7 + $0x224] ss:$8 sps:$4 sm:$0xff]  }
 0x518   :  { %4669 = vmatprep.subr.bf16.mxu1 %v8883_v62  ;;  %4649 = vmatpush2.bf16.msra.mxu0 %v8914_v63 }
 0x519   :  { %4650 = vmatprep.subr.bf16.mxu0 %v8922_v2 }
 0x51b   :  { %4670 = vmatpush1.bf16.msra.mxu1 %v8881_v38  ;;  %v8956_v38 = vld [vmem:[#allocation7 + $0x220] ss:$8 sps:$4 sm:$0xff]  }
 0x51c   :  { %4671 = vmatprep.subr.bf16.mxu1 %v8889_v3  ;;  %4651 = vmatpush2.bf16.msra.mxu0 %v8920_v28  ;;  %v8964_v28 = vld [vmem:[#allocation7 + $0x214] ss:$8 sps:$4 sm:$0xff]  }
 0x51d   :  { %4706 = vmatprep.subr.bf16.mxu0 %v8928_v37 }
 0x51f   :  { %4672 = vmatpush1.bf16.msra.mxu1 %v8887_v19 }
 0x520   :  { %4673 = vmatprep.subr.bf16.mxu1 %v8895_v26  ;;  %v8959_v26 = vld [vmem:[#allocation7 + $0x370] ss:$8 sps:$4 sm:$0xff]  }
 0x523   :  { %4674 = vmatpush1.bf16.msra.mxu1 %v8893_v4 }
 0x524   :  { %4675 = vmatprep.subr.bf16.mxu1 %v8901_v5 }
 0x527   :  { %4676 = vmatpush1.bf16.msra.mxu1 %v8899_v40 }
 0x528   :  { %4677 = vmatprep.subr.bf16.mxu1 %v8907_v29  ;;  %v8967_v29 = vld [vmem:[#allocation7 + $0x364] ss:$8 sps:$4 sm:$0xff]  }
 0x52b   :  { %4678 = vmatpush1.bf16.msra.mxu1 %v8905_v6  ;;  %v8962_v6 = vld [vmem:[#allocation7 + $0x210] ss:$8 sps:$4 sm:$0xff]  }
 0x52c   :  { %4679 = vmatprep.subr.bf16.mxu1 %v8913_v43  ;;  %v8970_v43 = vld [vmem:[#allocation7 + $0x204] ss:$8 sps:$4 sm:$0xff]  }
 0x52f   :  { %4680 = vmatpush2.bf16.msra.mxu1 %v8911_v44  ;;  %v8965_v44 = vld [vmem:[#allocation7 + $0x360] ss:$8 sps:$4 sm:$0xff]  }
 0x530   :  { %4681 = vmatprep.subr.bf16.mxu1 %v8919_v12 }
 0x533   :  { %4682 = vmatpush2.bf16.msra.mxu1 %v8917_v13  ;;  %v8973_v13 = vld [vmem:[#allocation7 + $0x354] ss:$8 sps:$4 sm:$0xff]  }
 0x534   :  { %4683 = vmatprep.subr.bf16.mxu1 %v8925_v45  ;;  %v8968_v45 = vld [vmem:[#allocation7 + $0x200] ss:$8 sps:$4 sm:$0xff]  }
 0x537   :  { %4684 = vmatpush2.bf16.msra.mxu1 %v8923_v46  ;;  %v8976_v46 = vld [vmem:[#allocation7 + $0x2f4] ss:$8 sps:$4 sm:$0xff]  }
 0x538   :  { %4685 = vmatprep.subr.bf16.mxu1 %v8931_v0 }
 0x53b   :  { %4686 = vmatpush2.bf16.msra.mxu1 %v8929_v47  ;;  %v8971_v47 = vld [vmem:[#allocation7 + $0x350] ss:$8 sps:$4 sm:$0xff]  }
 0x53c   :  { %4687 = vmatprep.subr.bf16.mxu1 %v8937_v48  ;;  %v8979_v48 = vld [vmem:[#allocation7 + $0x344] ss:$8 sps:$4 sm:$0xff]  }
 0x53f   :  { %4688 = vmatpush2.bf16.msra.mxu1 %v8935_v49 }
 0x540   :  { %4689 = vmatprep.subr.bf16.mxu1 %v8943_v50  ;;  %v8974_v50 = vld [vmem:[#allocation7 + $0x2f0] ss:$8 sps:$4 sm:$0xff]  }
 0x543   :  { %4690 = vmatpush2.bf16.msra.mxu1 %v8941_v16  ;;  %v8982_v16 = vld [vmem:[#allocation7 + $0x2e4] ss:$8 sps:$4 sm:$0xff]  }
 0x544   :  { %4691 = vmatprep.subr.bf16.mxu1 %v8949_v31 }
 0x547   :  { %4692 = vmatpush2.bf16.msra.mxu1 %v8947_v51  ;;  %v8977_v51 = vld [vmem:[#allocation7 + $0x340] ss:$8 sps:$4 sm:$0xff]  }
 0x548   :  { %4693 = vmatprep.subr.bf16.mxu1 %v8955_v57 }
 0x54b   :  { %4694 = vmatpush2.bf16.msra.mxu1 %v8953_v30  ;;  %v8985_v30 = vld [vmem:[#allocation7 + $0x334] ss:$8 sps:$4 sm:$0xff]  }
 0x54c   :  { %4749 = vmatprep.subr.bf16.mxu1 %v8961_v52 }
 0x586   :  { %v2735_v17 = vpop.f32.mrf.mxu1  ;;  %v11065_v33 = vpop.f32.mrf.mxu0 }
 0x588   :  { %v2737_v10 = vpop.f32.mrf.mxu1  ;;  %v2927_v18 = vpop.f32.mrf.mxu0 }
 0x58a   :  { %v2739_v25 = vpop.f32.mrf.mxu1  ;;  %v11067_v36 = vpop.f32.mrf.mxu0 }
 0x58b   :  { %v3171_v55 = vpack.c.bf16 %v11067_v36, %v11065_v33  ;;  %v3165_v8 = vpack.c.bf16 %v2739_v25, %v2735_v17  ;;  %v8980_v17 = vld [vmem:[#allocation7 + $0x2e0] ss:$8 sps:$4 sm:$0xff]   ;;  %v8991_v25 = vld [vmem:[#allocation7 + $0x324] ss:$8 sps:$4 sm:$0xff]  }
 0x58c   :  { %v2741_v20 = vpop.f32.mrf.mxu1  ;;  %v2931_v60 = vpop.f32.mrf.mxu0  ;;  %v9078_v33 = vld [vmem:[#allocation7 + $0x4e4] ss:$8 sps:$4 sm:$0xff]   ;;  %v9073_v36 = vld [vmem:[#allocation7 + $0x540] ss:$8 sps:$4 sm:$0xff]  }
 0x58d   :  { %v3166_v22 = vpack.c.bf16 %v2741_v20, %v2737_v10  ;;  %v3172_v4 = vpack.c.bf16 %v2931_v60, %v2927_v18  ;;  %v8988_v10 = vld [vmem:[#allocation7 + $0x2d4] ss:$8 sps:$4 sm:$0xff]   ;;  %v8983_v18 = vld [vmem:[#allocation7 + $0x330] ss:$8 sps:$4 sm:$0xff]  }
 0x58e   :  { %v8986_v20 = vld [vmem:[#allocation7 + $0x2d0] ss:$8 sps:$4 sm:$0xff]  }
 0x58f   :  { %4652 = vmatprep.mubr.bf16.mxu0 %v3166_v22  ;;  %v8994_v22 = vld [vmem:[#allocation7 + $0x2c4] ss:$8 sps:$4 sm:$0xff]  }
 0x590   :  { %4653 = vmatmul.mubr.bf16.vlgmr.msra.gmra.mxu0 %v3165_v8  ;;  %v8989_v8 = vld [vmem:[#allocation7 + $0x320] ss:$8 sps:$4 sm:$0xff]  }
 0x591   :  { %4707 = vmatpush1.bf16.msra.mxu0 %v8926_v58 }
 0x592   :  { %4708 = vmatprep.subr.bf16.mxu0 %v8934_v39  ;;  %v2778_v23 = vpop.f32.mrf.mxu1  ;;  %v11071_v34 = vpop.f32.mrf.mxu0  ;;  %v8997_v39 = vld [vmem:[#allocation7 + $0x314] ss:$8 sps:$4 sm:$0xff]  }
 0x594   :  { %v8448_v53 = vpop.f32.mrf.mxu1  ;;  %v11073_v1 = vpop.f32.mrf.mxu0 }
 0x595   :  { %4709 = vmatpush1.bf16.msra.mxu0 %v8932_v24  ;;  %v8992_v24 = vld [vmem:[#allocation7 + $0x2c0] ss:$8 sps:$4 sm:$0xff]   ;;  %v8995_v53 = vld [vmem:[#allocation7 + $0x310] ss:$8 sps:$4 sm:$0xff]  }
 0x596   :  { %4710 = vmatprep.subr.bf16.mxu0 %v8940_v61  ;;  %v2781_v7 = vpop.f32.mrf.mxu1  ;;  %v11075_v15 = vpop.f32.mrf.mxu0 }
 0x597   :  { %v3167_v40 = vpack.c.bf16 %v2781_v7, %v2778_v23  ;;  %v9000_v23 = vld [vmem:[#allocation7 + $0x2b4] ss:$8 sps:$4 sm:$0xff]   ;;  %v9003_v7 = vld [vmem:[#allocation7 + $0x304] ss:$8 sps:$4 sm:$0xff]  }
 0x598   :  { %v8449_v11 = vpop.f32.mrf.mxu1  ;;  %v11077_v56 = vpop.f32.mrf.mxu0 }
 0x599   :  { %4711 = vmatpush1.bf16.msra.mxu0 %v8938_v59  ;;  %v8998_v11 = vld [vmem:[#allocation7 + $0x2b0] ss:$8 sps:$4 sm:$0xff]  }
 0x59a   :  { %4712 = vmatprep.subr.bf16.mxu0 %v8946_v9 }
 0x59d   :  { %4713 = vmatpush1.bf16.msra.mxu0 %v8944_v32  ;;  %v9006_v32 = vld [vmem:[#allocation7 + $0x2a4] ss:$8 sps:$4 sm:$0xff]  }
 0x59e   :  { %v2830_v54 = vpop.f32.mrf.mxu1  ;;  %4714 = vmatprep.subr.bf16.mxu0 %v8952_v42  ;;  %v11079_v62 = vpop.f32.mrf.mxu0  ;;  %v9001_v42 = vld [vmem:[#allocation7 + $0x300] ss:$8 sps:$4 sm:$0xff]  }
 0x5a0   :  { %v11081_v63 = vpop.f32.mrf.mxu1  ;;  %v11083_v2 = vpop.f32.mrf.mxu0 }
 0x5a1   :  { %4715 = vmatpush1.bf16.msra.mxu0 %v8950_v27  ;;  %v9009_v27 = vld [vmem:[#allocation7 + $0x3f4] ss:$8 sps:$4 sm:$0xff]  }
 0x5a2   :  { %v2834_v3 = vpop.f32.mrf.mxu1  ;;  %4716 = vmatprep.subr.bf16.mxu0 %v8958_v35  ;;  %v11085_v37 = vpop.f32.mrf.mxu0  ;;  %v9012_v35 = vld [vmem:[#allocation7 + $0x294] ss:$8 sps:$4 sm:$0xff]  }
 0x5a3   :  { %v3168_v19 = vpack.c.bf16 %v2834_v3, %v2830_v54  ;;  %v3177_v5 = vpack.c.bf16 %v11085_v37, %v11079_v62  ;;  %v9004_v54 = vld [vmem:[#allocation7 + $0x2a0] ss:$8 sps:$4 sm:$0xff]   ;;  %v9007_v3 = vld [vmem:[#allocation7 + $0x3f0] ss:$8 sps:$4 sm:$0xff]  }
 0x5a4   :  { %v11089_v12 = vpop.f32.mrf.mxu1  ;;  %v5008_v62 = vld [vmem:[#allocation10 + $0x60] sm:$0xff]  ;;  %v5023_v37 = vld [vmem:[#allocation10 + $0xd8] sm:$0xff] }
 0x5a5   :  { %4717 = vmatpush1.bf16.msra.mxu0 %v8956_v38  ;;  %4695 = vmatprep.mubr.bf16.mxu1 %v3168_v19 }
 0x5a6   :  { %4696 = vmatmul.mubr.bf16.vlgmr.msra.gmra.mxu1 %v3167_v40  ;;  %4718 = vmatprep.subr.bf16.mxu0 %v8964_v28  ;;  %v9015_v28 = vld [vmem:[#allocation7 + $0x3e4] ss:$8 sps:$4 sm:$0xff]  }
 0x5a7   :  { %4750 = vmatpush1.bf16.msra.mxu1 %v8959_v26  ;;  %4781 = vmatprep.mubr.bf16.mxu1 %v3172_v4  ;;  %v9010_v26 = vld [vmem:[#allocation7 + $0x290] ss:$8 sps:$4 sm:$0xff]   ;;  %v9018_v4 = vld [vmem:[#allocation7 + $0x284] ss:$8 sps:$4 sm:$0xff]  }
 0x5a8   :  { %4751 = vmatprep.subr.bf16.mxu1 %v8967_v29  ;;  %v9013_v29 = vld [vmem:[#allocation7 + $0x3e0] ss:$8 sps:$4 sm:$0xff]  }
 0x5a9   :  { %4719 = vmatpush1.bf16.msra.mxu0 %v8962_v6  ;;  %v9021_v6 = vld [vmem:[#allocation7 + $0x3d4] ss:$8 sps:$4 sm:$0xff]  }
 0x5aa   :  { %4720 = vmatprep.subr.bf16.mxu0 %v8970_v43  ;;  %v2873_v0 = vpop.f32.mrf.mxu1 }
 0x5ab   :  { %4752 = vmatpush1.bf16.msra.mxu1 %v8965_v44  ;;  %v9016_v44 = vld [vmem:[#allocation7 + $0x280] ss:$8 sps:$4 sm:$0xff]  }
 0x5ac   :  { %4753 = vmatprep.subr.bf16.mxu1 %v8973_v13  ;;  %v8458_v49 = vpop.f32.mrf.mxu1  ;;  %v9024_v13 = vld [vmem:[#allocation7 + $0x474] ss:$8 sps:$4 sm:$0xff]  }
 0x5ad   :  { %4721 = vmatpush1.bf16.msra.mxu0 %v8968_v45  ;;  %v9019_v45 = vld [vmem:[#allocation7 + $0x3d0] ss:$8 sps:$4 sm:$0xff]   ;;  %v9030_v49 = vld [vmem:[#allocation7 + $0x464] ss:$8 sps:$4 sm:$0xff]  }
 0x5ae   :  { %4722 = vmatprep.subr.bf16.mxu0 %v8976_v46  ;;  %v2876_v31 = vpop.f32.mrf.mxu1  ;;  %v9027_v46 = vld [vmem:[#allocation7 + $0x3c4] ss:$8 sps:$4 sm:$0xff]  }
 0x5af   :  { %4754 = vmatpush1.bf16.msra.mxu1 %v8971_v47  ;;  %v3170_v57 = vpack.c.bf16 %v2876_v31, %v2873_v0  ;;  %v9022_v0 = vld [vmem:[#allocation7 + $0x470] ss:$8 sps:$4 sm:$0xff]   ;;  %v3174_v47 = vpack.c.bf16 %v11075_v15, %v11071_v34  ;;  %v9033_v31 = vld [vmem:[#allocation7 + $0x3b4] ss:$8 sps:$4 sm:$0xff]  }
 0x5b0   :  { %4755 = vmatprep.subr.bf16.mxu1 %v8979_v48  ;;  %v8459_v52 = vpop.f32.mrf.mxu1  ;;  %v3169_v48 = vpack.c.bf16 %v11089_v12, %v11081_v63  ;;  %v9031_v34 = vld [vmem:[#allocation7 + $0x3b0] ss:$8 sps:$4 sm:$0xff]   ;;  %v9039_v63 = vld [vmem:[#allocation7 + $0x3a4] ss:$8 sps:$4 sm:$0xff]  }
 0x5b1   :  { %4723 = vmatpush2.bf16.msra.mxu0 %v8974_v50  ;;  %4738 = vmatprep.mubr.bf16.mxu0 %v3170_v57  ;;  %v9028_v57 = vld [vmem:[#allocation7 + $0x460] ss:$8 sps:$4 sm:$0xff]  }
 0x5b2   :  { %4724 = vmatprep.subr.bf16.mxu0 %v8982_v16  ;;  %v9025_v16 = vld [vmem:[#allocation7 + $0x3c0] ss:$8 sps:$4 sm:$0xff]  }
 0x5b3   :  { %4756 = vmatpush1.bf16.msra.mxu1 %v8977_v51 }
 0x5b4   :  { %4757 = vmatprep.subr.bf16.mxu1 %v8985_v30  ;;  %v9036_v30 = vld [vmem:[#allocation7 + $0x454] ss:$8 sps:$4 sm:$0xff]  }
 0x5b5   :  { %4725 = vmatpush2.bf16.msra.mxu0 %v8980_v17  ;;  %v9034_v17 = vld [vmem:[#allocation7 + $0x450] ss:$8 sps:$4 sm:$0xff]  }
 0x5b6   :  { %4726 = vmatprep.subr.bf16.mxu0 %v8988_v10  ;;  %v11091_v58 = vpop.f32.mrf.mxu1  ;;  %v9042_v10 = vld [vmem:[#allocation7 + $0x444] ss:$8 sps:$4 sm:$0xff]  }
 0x5b7   :  { %4758 = vmatpush1.bf16.msra.mxu1 %v8983_v18  ;;  %v9037_v18 = vld [vmem:[#allocation7 + $0x3a0] ss:$8 sps:$4 sm:$0xff]  }
 0x5b8   :  { %4759 = vmatprep.subr.bf16.mxu1 %v8991_v25  ;;  %v8468_v60 = vpop.f32.mrf.mxu1  ;;  %v9045_v25 = vld [vmem:[#allocation7 + $0x394] ss:$8 sps:$4 sm:$0xff]  }
 0x5b9   :  { %4727 = vmatpush2.bf16.msra.mxu0 %v8986_v20  ;;  %v9040_v20 = vld [vmem:[#allocation7 + $0x440] ss:$8 sps:$4 sm:$0xff]   ;;  %v9046_v60 = vld [vmem:[#allocation7 + $0x430] ss:$8 sps:$4 sm:$0xff]  }
 0x5ba   :  { %4728 = vmatprep.subr.bf16.mxu0 %v8994_v22  ;;  %v11093_v61 = vpop.f32.mrf.mxu1  ;;  %v9048_v22 = vld [vmem:[#allocation7 + $0x434] ss:$8 sps:$4 sm:$0xff]  }
 0x5bb   :  { %4760 = vmatpush1.bf16.msra.mxu1 %v8989_v8  ;;  %v3173_v59 = vpack.c.bf16 %v11093_v61, %v11091_v58  ;;  %v9043_v8 = vld [vmem:[#allocation7 + $0x390] ss:$8 sps:$4 sm:$0xff]   ;;  %v9141_v58 = vld [vmem:[#allocation7 + $0x594] ss:$8 sps:$4 sm:$0xff]   ;;  %v9136_v61 = vld [vmem:[#allocation7 + $0x640] ss:$8 sps:$4 sm:$0xff]  }
 0x5bc   :  { %4761 = vmatprep.subr.bf16.mxu1 %v8997_v39  ;;  %v8469_v9 = vpop.f32.mrf.mxu1  ;;  %v9051_v39 = vld [vmem:[#allocation7 + $0x384] ss:$8 sps:$4 sm:$0xff]  }
 0x5bd   :  { %4729 = vmatpush2.bf16.msra.mxu0 %v8992_v24  ;;  %v9054_v24 = vld [vmem:[#allocation7 + $0x424] ss:$8 sps:$4 sm:$0xff]   ;;  %v9060_v9 = vld [vmem:[#allocation7 + $0x414] ss:$8 sps:$4 sm:$0xff]  }
 0x5be   :  { %4730 = vmatprep.subr.bf16.mxu0 %v9000_v23  ;;  %v9049_v23 = vld [vmem:[#allocation7 + $0x380] ss:$8 sps:$4 sm:$0xff]  }
 0x5bf   :  { %4762 = vmatpush1.bf16.msra.mxu1 %v8995_v53  ;;  %v9057_v53 = vld [vmem:[#allocation7 + $0x574] ss:$8 sps:$4 sm:$0xff]  }
 0x5c0   :  { %4763 = vmatprep.subr.bf16.mxu1 %v9003_v7  ;;  %v9052_v7 = vld [vmem:[#allocation7 + $0x420] ss:$8 sps:$4 sm:$0xff]  }
 0x5c1   :  { %4731 = vmatpush2.bf16.msra.mxu0 %v8998_v11  ;;  %v9055_v11 = vld [vmem:[#allocation7 + $0x570] ss:$8 sps:$4 sm:$0xff]  }
 0x5c2   :  { %4732 = vmatprep.subr.bf16.mxu0 %v9006_v32  ;;  %v11097_v38 = vpop.f32.mrf.mxu1 }
 0x5c3   :  { %4764 = vmatpush1.bf16.msra.mxu1 %v9001_v42  ;;  %v9063_v42 = vld [vmem:[#allocation7 + $0x564] ss:$8 sps:$4 sm:$0xff]  }
 0x5c4   :  { %4765 = vmatprep.subr.bf16.mxu1 %v9009_v27  ;;  %v8478_v19 = vpop.f32.mrf.mxu1  ;;  %v9058_v27 = vld [vmem:[#allocation7 + $0x410] ss:$8 sps:$4 sm:$0xff]  }
 0x5c5   :  { %4733 = vmatpush2.bf16.msra.mxu0 %v9004_v54  ;;  %v9066_v54 = vld [vmem:[#allocation7 + $0x404] ss:$8 sps:$4 sm:$0xff]   ;;  %v9072_v19 = vld [vmem:[#allocation7 + $0x4f4] ss:$8 sps:$4 sm:$0xff]  }
 0x5c6   :  { %4734 = vmatprep.subr.bf16.mxu0 %v9012_v35  ;;  %v11099_v40 = vpop.f32.mrf.mxu1  ;;  %v9061_v35 = vld [vmem:[#allocation7 + $0x560] ss:$8 sps:$4 sm:$0xff]  }
 0x5c7   :  { %4766 = vmatpush2.bf16.msra.mxu1 %v9007_v3  ;;  %v3176_v32 = vpack.c.bf16 %v11099_v40, %v11097_v38  ;;  %v9069_v3 = vld [vmem:[#allocation7 + $0x554] ss:$8 sps:$4 sm:$0xff]   ;;  %v9067_v38 = vld [vmem:[#allocation7 + $0x550] ss:$8 sps:$4 sm:$0xff]   ;;  %v9076_v40 = vld [vmem:[#allocation7 + $0x4e0] ss:$8 sps:$4 sm:$0xff]  }
 0x5c8   :  { %4767 = vmatprep.subr.bf16.mxu1 %v9015_v28  ;;  %v8479_v43 = vpop.f32.mrf.mxu1  ;;  %v9064_v28 = vld [vmem:[#allocation7 + $0x400] ss:$8 sps:$4 sm:$0xff]  }
 0x5c9   :  { %4735 = vmatpush2.bf16.msra.mxu0 %v9010_v26  ;;  %v9075_v26 = vld [vmem:[#allocation7 + $0x544] ss:$8 sps:$4 sm:$0xff]  }
 0x5ca   :  { %4736 = vmatprep.subr.bf16.mxu0 %v9018_v4  ;;  %v9070_v4 = vld [vmem:[#allocation7 + $0x4f0] ss:$8 sps:$4 sm:$0xff]   ;;  %v9087_v43 = vld [vmem:[#allocation7 + $0x524] ss:$8 sps:$4 sm:$0xff]  }
 0x5cb   :  { %4768 = vmatpush2.bf16.msra.mxu1 %v9013_v29  ;;  %v9084_v29 = vld [vmem:[#allocation7 + $0x4d4] ss:$8 sps:$4 sm:$0xff]  }
 0x5cc   :  { %4769 = vmatprep.subr.bf16.mxu1 %v9021_v6  ;;  %v9079_v6 = vld [vmem:[#allocation7 + $0x530] ss:$8 sps:$4 sm:$0xff]  }
 0x5cd   :  { %4737 = vmatpush2.bf16.msra.mxu0 %v9016_v44  ;;  %v9082_v44 = vld [vmem:[#allocation7 + $0x4d0] ss:$8 sps:$4 sm:$0xff]  }
 0x5ce   :  { %4792 = vmatprep.subr.bf16.mxu0 %v9024_v13  ;;  %v11105_v50 = vpop.f32.mrf.mxu1  ;;  %v9090_v13 = vld [vmem:[#allocation7 + $0x4c4] ss:$8 sps:$4 sm:$0xff]  }
 0x5cf   :  { %4770 = vmatpush2.bf16.msra.mxu1 %v9019_v45  ;;  %v9085_v45 = vld [vmem:[#allocation7 + $0x520] ss:$8 sps:$4 sm:$0xff]  }
 0x5d0   :  { %4739 = vmatmul.mubr.bf16.vlgmr.msra.gmra.mxu0 %v3169_v48  ;;  %4771 = vmatprep.subr.bf16.mxu1 %v9027_v46  ;;  %v8488_v51 = vpop.f32.mrf.mxu1  ;;  %v9093_v46 = vld [vmem:[#allocation7 + $0x514] ss:$8 sps:$4 sm:$0xff]   ;;  %v9091_v48 = vld [vmem:[#allocation7 + $0x510] ss:$8 sps:$4 sm:$0xff]  }
 0x5d1   :  { %4793 = vmatpush1.bf16.msra.mxu0 %v9022_v0  ;;  %4824 = vmatprep.mubr.bf16.mxu0 %v3174_v47  ;;  %v9088_v0 = vld [vmem:[#allocation7 + $0x4c0] ss:$8 sps:$4 sm:$0xff]   ;;  %v9096_v47 = vld [vmem:[#allocation7 + $0x4b4] ss:$8 sps:$4 sm:$0xff]  }
 0x5d2   :  { %4794 = vmatprep.subr.bf16.mxu0 %v9030_v49  ;;  %v11107_v52 = vpop.f32.mrf.mxu1  ;;  %v9099_v49 = vld [vmem:[#allocation7 + $0x504] ss:$8 sps:$4 sm:$0xff]   ;;  %v9097_v51 = vld [vmem:[#allocation7 + $0x500] ss:$8 sps:$4 sm:$0xff]  }
 0x5d3   :  { %4772 = vmatpush2.bf16.msra.mxu1 %v9025_v16  ;;  %v3179_v15 = vpack.c.bf16 %v11107_v52, %v11105_v50  ;;  %v9094_v16 = vld [vmem:[#allocation7 + $0x4b0] ss:$8 sps:$4 sm:$0xff]  }
 0x5d4   :  { %4773 = vmatprep.subr.bf16.mxu1 %v9033_v31  ;;  %v8489_v12 = vpop.f32.mrf.mxu1  ;;  %v9102_v31 = vld [vmem:[#allocation7 + $0x4a4] ss:$8 sps:$4 sm:$0xff]   ;;  %v5010_v50 = vld [vmem:[#allocation10 + $0x70] sm:$0xff]  ;;  %v5025_v52 = vld [vmem:[#allocation10 + $0xe8] sm:$0xff] }
 0x5d5   :  { %4795 = vmatpush1.bf16.msra.mxu0 %v9028_v57  ;;  %v9105_v57 = vld [vmem:[#allocation7 + $0x5f4] ss:$8 sps:$4 sm:$0xff]   ;;  %v9111_v12 = vld [vmem:[#allocation7 + $0x5e4] ss:$8 sps:$4 sm:$0xff]  }
 0x5d6   :  { %4796 = vmatprep.subr.bf16.mxu0 %v9036_v30  ;;  %v9100_v30 = vld [vmem:[#allocation7 + $0x4a0] ss:$8 sps:$4 sm:$0xff]  }
 0x5d7   :  { %4774 = vmatpush2.bf16.msra.mxu1 %v9031_v34  ;;  %v9108_v34 = vld [vmem:[#allocation7 + $0x494] ss:$8 sps:$4 sm:$0xff]  }
 0x5d8   :  { %4775 = vmatprep.subr.bf16.mxu1 %v9039_v63  ;;  %v9103_v63 = vld [vmem:[#allocation7 + $0x5f0] ss:$8 sps:$4 sm:$0xff]  }
 0x5d9   :  { %4797 = vmatpush1.bf16.msra.mxu0 %v9034_v17  ;;  %v9106_v17 = vld [vmem:[#allocation7 + $0x490] ss:$8 sps:$4 sm:$0xff]  }
 0x5da   :  { %4798 = vmatprep.subr.bf16.mxu0 %v9042_v10  ;;  %v9114_v10 = vld [vmem:[#allocation7 + $0x484] ss:$8 sps:$4 sm:$0xff]  }
 0x5db   :  { %4776 = vmatpush2.bf16.msra.mxu1 %v9037_v18  ;;  %v9109_v18 = vld [vmem:[#allocation7 + $0x5e0] ss:$8 sps:$4 sm:$0xff]  }
 0x5dc   :  { %4777 = vmatprep.subr.bf16.mxu1 %v9045_v25  ;;  %v9117_v25 = vld [vmem:[#allocation7 + $0x5d4] ss:$8 sps:$4 sm:$0xff]  }
 0x5dd   :  { %4799 = vmatpush1.bf16.msra.mxu0 %v9040_v20  ;;  %v9112_v20 = vld [vmem:[#allocation7 + $0x480] ss:$8 sps:$4 sm:$0xff]  }
 0x5de   :  { %4800 = vmatprep.subr.bf16.mxu0 %v9048_v22  ;;  %v9120_v22 = vld [vmem:[#allocation7 + $0x674] ss:$8 sps:$4 sm:$0xff]  }
 0x5df   :  { %4778 = vmatpush2.bf16.msra.mxu1 %v9043_v8  ;;  %v3121_v8 = vpop.f32.mrf.mxu0 }
 0x5e0   :  { %4779 = vmatprep.subr.bf16.mxu1 %v9051_v39  ;;  %v9115_v39 = vld [vmem:[#allocation7 + $0x5d0] ss:$8 sps:$4 sm:$0xff]  }
 0x5e1   :  { %4801 = vmatpush1.bf16.msra.mxu0 %v9046_v60  ;;  %v9123_v60 = vld [vmem:[#allocation7 + $0x5c4] ss:$8 sps:$4 sm:$0xff]  }
 0x5e2   :  { %4802 = vmatprep.subr.bf16.mxu0 %v9054_v24  ;;  %v9118_v24 = vld [vmem:[#allocation7 + $0x670] ss:$8 sps:$4 sm:$0xff]  }
 0x5e3   :  { %4780 = vmatpush2.bf16.msra.mxu1 %v9049_v23  ;;  %v3178_v23 = vpack.c.bf16 %v3121_v8, %v11083_v2  ;;  %v9130_v2 = vld [vmem:[#allocation7 + $0x650] ss:$8 sps:$4 sm:$0xff]   ;;  %v9193_v8 = vld [vmem:[#allocation7 + $0x700] ss:$8 sps:$4 sm:$0xff]  }
 0x5e4   :  { %4835 = vmatprep.subr.bf16.mxu1 %v9057_v53  ;;  %v9126_v53 = vld [vmem:[#allocation7 + $0x664] ss:$8 sps:$4 sm:$0xff]  }
 0x5e5   :  { %4803 = vmatpush1.bf16.msra.mxu0 %v9052_v7  ;;  %v9121_v7 = vld [vmem:[#allocation7 + $0x5c0] ss:$8 sps:$4 sm:$0xff]  }
 0x5e6   :  { %4782 = vmatmul.mubr.bf16.vlgmr.msra.gmra.mxu1 %v3171_v55  ;;  %4804 = vmatprep.subr.bf16.mxu0 %v9060_v9  ;;  %v9081_v55 = vld [vmem:[#allocation7 + $0x534] ss:$8 sps:$4 sm:$0xff]  }
 0x5e7   :  { %4836 = vmatpush1.bf16.msra.mxu1 %v9055_v11  ;;  %4867 = vmatprep.mubr.bf16.mxu1 %v3176_v32  ;;  %v9129_v9 = vld [vmem:[#allocation7 + $0x5b4] ss:$8 sps:$4 sm:$0xff]   ;;  %v9124_v11 = vld [vmem:[#allocation7 + $0x660] ss:$8 sps:$4 sm:$0xff]  }
 0x5e8   :  { %4837 = vmatprep.subr.bf16.mxu1 %v9063_v42  ;;  %v9132_v32 = vld [vmem:[#allocation7 + $0x654] ss:$8 sps:$4 sm:$0xff]   ;;  %v9127_v42 = vld [vmem:[#allocation7 + $0x5b0] ss:$8 sps:$4 sm:$0xff]  }
 0x5e9   :  { %4805 = vmatpush1.bf16.msra.mxu0 %v9058_v27  ;;  %v9135_v27 = vld [vmem:[#allocation7 + $0x5a4] ss:$8 sps:$4 sm:$0xff]  }
 0x5ea   :  { %4806 = vmatprep.subr.bf16.mxu0 %v9066_v54  ;;  %v9138_v54 = vld [vmem:[#allocation7 + $0x644] ss:$8 sps:$4 sm:$0xff]  }
 0x5eb   :  { %4838 = vmatpush1.bf16.msra.mxu1 %v9061_v35  ;;  %v9133_v35 = vld [vmem:[#allocation7 + $0x5a0] ss:$8 sps:$4 sm:$0xff]  }
 0x5ec   :  { %4839 = vmatprep.subr.bf16.mxu1 %v9069_v3  ;;  %v9139_v3 = vld [vmem:[#allocation7 + $0x590] ss:$8 sps:$4 sm:$0xff]  }
 0x5ed   :  { %4807 = vmatpush1.bf16.msra.mxu0 %v9064_v28  ;;  %v9147_v28 = vld [vmem:[#allocation7 + $0x584] ss:$8 sps:$4 sm:$0xff]  }
 0x5ee   :  { %4808 = vmatprep.subr.bf16.mxu0 %v9072_v19  ;;  %v9142_v19 = vld [vmem:[#allocation7 + $0x630] ss:$8 sps:$4 sm:$0xff]  }
 0x5ef   :  { %4840 = vmatpush1.bf16.msra.mxu1 %v9067_v38  ;;  %v9150_v38 = vld [vmem:[#allocation7 + $0x624] ss:$8 sps:$4 sm:$0xff]  }
 0x5f0   :  { %4841 = vmatprep.subr.bf16.mxu1 %v9075_v26  ;;  %v9145_v26 = vld [vmem:[#allocation7 + $0x580] ss:$8 sps:$4 sm:$0xff]  }
 0x5f1   :  { %4809 = vmatpush2.bf16.msra.mxu0 %v9070_v4  ;;  %v9153_v4 = vld [vmem:[#allocation7 + $0x774] ss:$8 sps:$4 sm:$0xff]  }
 0x5f2   :  { %4810 = vmatprep.subr.bf16.mxu0 %v9078_v33  ;;  %v9148_v33 = vld [vmem:[#allocation7 + $0x620] ss:$8 sps:$4 sm:$0xff]  }
 0x5f3   :  { %4842 = vmatpush1.bf16.msra.mxu1 %v9073_v36  ;;  %v9156_v36 = vld [vmem:[#allocation7 + $0x614] ss:$8 sps:$4 sm:$0xff]  }
 0x5f4   :  { %4843 = vmatprep.subr.bf16.mxu1 %v9081_v55  ;;  %v9151_v55 = vld [vmem:[#allocation7 + $0x770] ss:$8 sps:$4 sm:$0xff]  }
 0x5f5   :  { %4811 = vmatpush2.bf16.msra.mxu0 %v9076_v40  ;;  %v3175_v40 = vpack.c.bf16 %v11077_v56, %v11073_v1  ;;  %v9171_v1 = vld [vmem:[#allocation7 + $0x744] ss:$8 sps:$4 sm:$0xff]   ;;  %v9166_v56 = vld [vmem:[#allocation7 + $0x6f0] ss:$8 sps:$4 sm:$0xff]  }
 0x5f6   :  { %4812 = vmatprep.subr.bf16.mxu0 %v9084_v29  ;;  %v9159_v29 = vld [vmem:[#allocation7 + $0x764] ss:$8 sps:$4 sm:$0xff]  }
 0x5f7   :  { %4844 = vmatpush1.bf16.msra.mxu1 %v9079_v6  ;;  %v9154_v6 = vld [vmem:[#allocation7 + $0x610] ss:$8 sps:$4 sm:$0xff]  }
 0x5f8   :  { %4845 = vmatprep.subr.bf16.mxu1 %v9087_v43  ;;  %v9162_v43 = vld [vmem:[#allocation7 + $0x604] ss:$8 sps:$4 sm:$0xff]  }
 0x5f9   :  { %4813 = vmatpush2.bf16.msra.mxu0 %v9082_v44  ;;  %v9157_v44 = vld [vmem:[#allocation7 + $0x760] ss:$8 sps:$4 sm:$0xff]  }
 0x5fa   :  { %4814 = vmatprep.subr.bf16.mxu0 %v9090_v13  ;;  %v9165_v13 = vld [vmem:[#allocation7 + $0x754] ss:$8 sps:$4 sm:$0xff]  }
 0x5fb   :  { %4846 = vmatpush1.bf16.msra.mxu1 %v9085_v45  ;;  %v9160_v45 = vld [vmem:[#allocation7 + $0x600] ss:$8 sps:$4 sm:$0xff]  }
 0x5fc   :  { %4847 = vmatprep.subr.bf16.mxu1 %v9093_v46  ;;  %v9168_v46 = vld [vmem:[#allocation7 + $0x6f4] ss:$8 sps:$4 sm:$0xff]  }
 0x5fd   :  { %4815 = vmatpush2.bf16.msra.mxu0 %v9088_v0  ;;  %v9163_v0 = vld [vmem:[#allocation7 + $0x750] ss:$8 sps:$4 sm:$0xff]  }
 0x5fe   :  { %4816 = vmatprep.subr.bf16.mxu0 %v9096_v47  ;;  %v9174_v47 = vld [vmem:[#allocation7 + $0x6e4] ss:$8 sps:$4 sm:$0xff]  }
 0x5ff   :  { %4848 = vmatpush1.bf16.msra.mxu1 %v9091_v48  ;;  %v9169_v48 = vld [vmem:[#allocation7 + $0x740] ss:$8 sps:$4 sm:$0xff]  }
 0x600   :  { %4849 = vmatprep.subr.bf16.mxu1 %v9099_v49  ;;  %v9177_v49 = vld [vmem:[#allocation7 + $0x734] ss:$8 sps:$4 sm:$0xff]  }
 0x601   :  { %4817 = vmatpush2.bf16.msra.mxu0 %v9094_v16  ;;  %v9172_v16 = vld [vmem:[#allocation7 + $0x6e0] ss:$8 sps:$4 sm:$0xff]  }
 0x602   :  { %4818 = vmatprep.subr.bf16.mxu0 %v9102_v31  ;;  %v9180_v31 = vld [vmem:[#allocation7 + $0x6d4] ss:$8 sps:$4 sm:$0xff]  }
 0x603   :  { %4850 = vmatpush1.bf16.msra.mxu1 %v9097_v51  ;;  %v9175_v51 = vld [vmem:[#allocation7 + $0x730] ss:$8 sps:$4 sm:$0xff]  }
 0x604   :  { %4851 = vmatprep.subr.bf16.mxu1 %v9105_v57  ;;  %v9183_v57 = vld [vmem:[#allocation7 + $0x724] ss:$8 sps:$4 sm:$0xff]  }
 0x605   :  { %4819 = vmatpush2.bf16.msra.mxu0 %v9100_v30  ;;  %v9178_v30 = vld [vmem:[#allocation7 + $0x6d0] ss:$8 sps:$4 sm:$0xff]  }
 0x606   :  { %4820 = vmatprep.subr.bf16.mxu0 %v9108_v34  ;;  %v9186_v34 = vld [vmem:[#allocation7 + $0x6c4] ss:$8 sps:$4 sm:$0xff]  }
 0x607   :  { %4852 = vmatpush2.bf16.msra.mxu1 %v9103_v63  ;;  %v9181_v63 = vld [vmem:[#allocation7 + $0x720] ss:$8 sps:$4 sm:$0xff]  }
 0x608   :  { %4853 = vmatprep.subr.bf16.mxu1 %v9111_v12  ;;  %v9189_v12 = vld [vmem:[#allocation7 + $0x714] ss:$8 sps:$4 sm:$0xff]  }
 0x609   :  { %4821 = vmatpush2.bf16.msra.mxu0 %v9106_v17  ;;  %v9184_v17 = vld [vmem:[#allocation7 + $0x6c0] ss:$8 sps:$4 sm:$0xff]  }
 0x60a   :  { %4822 = vmatprep.subr.bf16.mxu0 %v9114_v10  ;;  %v9192_v10 = vld [vmem:[#allocation7 + $0x6b4] ss:$8 sps:$4 sm:$0xff]  }
 0x60b   :  { %4854 = vmatpush2.bf16.msra.mxu1 %v9109_v18  ;;  %v9187_v18 = vld [vmem:[#allocation7 + $0x710] ss:$8 sps:$4 sm:$0xff]  }
 0x60c   :  { %4855 = vmatprep.subr.bf16.mxu1 %v9117_v25  ;;  %v9195_v25 = vld [vmem:[#allocation7 + $0x704] ss:$8 sps:$4 sm:$0xff]  }
 0x60d   :  { %4823 = vmatpush2.bf16.msra.mxu0 %v9112_v20  ;;  %v9190_v20 = vld [vmem:[#allocation7 + $0x6b0] ss:$8 sps:$4 sm:$0xff]  }
 0x60e   :  { %4878 = vmatprep.subr.bf16.mxu0 %v9120_v22  ;;  %v9198_v22 = vld [vmem:[#allocation7 + $0x6a4] ss:$8 sps:$4 sm:$0xff]  }
 0x60f   :  { %4856 = vmatpush2.bf16.msra.mxu1 %v9115_v39  ;;  %v9196_v39 = vld [vmem:[#allocation7 + $0x6a0] ss:$8 sps:$4 sm:$0xff]  }
 0x610   :  { %4825 = vmatmul.mubr.bf16.vlgmr.msra.gmra.mxu0 %v3173_v59  ;;  %4857 = vmatprep.subr.bf16.mxu1 %v9123_v60  ;;  %v9144_v59 = vld [vmem:[#allocation7 + $0x634] ss:$8 sps:$4 sm:$0xff]  }
 0x611   :  { %4879 = vmatpush1.bf16.msra.mxu0 %v9118_v24  ;;  %4910 = vmatprep.mubr.bf16.mxu0 %v3178_v23  ;;  %v9201_v60 = vld [vmem:[#allocation7 + $0x694] ss:$8 sps:$4 sm:$0xff]   ;;  %v9199_v24 = vld [vmem:[#allocation7 + $0x690] ss:$8 sps:$4 sm:$0xff]   ;;  %v9204_v23 = vld [vmem:[#allocation7 + $0x684] ss:$8 sps:$4 sm:$0xff]  }
 0x612   :  { %4880 = vmatprep.subr.bf16.mxu0 %v9126_v53  ;;  %v9202_v53 = vld [vmem:[#allocation7 + $0x680] ss:$8 sps:$4 sm:$0xff]  }
 0x613   :  { %4858 = vmatpush2.bf16.msra.mxu1 %v9121_v7  ;;  %v5027_v7 = vld [vmem:[#allocation10 + $0xf8] sm:$0xff] }
 0x614   :  { %4859 = vmatprep.subr.bf16.mxu1 %v9129_v9  ;;  %v5011_v9 = vld [vmem:[#allocation10 + $0x78] sm:$0xff] }
 0x615   :  { %4881 = vmatpush1.bf16.msra.mxu0 %v9124_v11  ;;  %v5026_v11 = vld [vmem:[#allocation10 + $0xf0] sm:$0xff] }
 0x616   :  { %4882 = vmatprep.subr.bf16.mxu0 %v9132_v32  ;;  %v5024_v32 = vld [vmem:[#allocation10 + $0xe0] sm:$0xff] }
 0x617   :  { %4860 = vmatpush2.bf16.msra.mxu1 %v9127_v42  ;;  %v5022_v42 = vld [vmem:[#allocation10 + $0xd0] sm:$0xff] }
 0x618   :  { %4861 = vmatprep.subr.bf16.mxu1 %v9135_v27  ;;  %v5006_v27 = vld [vmem:[#allocation10 + $0x50] sm:$0xff] }
 0x619   :  { %4883 = vmatpush1.bf16.msra.mxu0 %v9130_v2  ;;  %v5021_v2 = vld [vmem:[#allocation10 + $0xc8] sm:$0xff] }
 0x61a   :  { %4884 = vmatprep.subr.bf16.mxu0 %v9138_v54  ;;  %v5005_v54 = vld [vmem:[#allocation10 + $0x48] sm:$0xff] }
 0x61b   :  { %4862 = vmatpush2.bf16.msra.mxu1 %v9133_v35  ;;  %v5020_v35 = vld [vmem:[#allocation10 + $0xc0] sm:$0xff] }
 0x61c   :  { %4863 = vmatprep.subr.bf16.mxu1 %v9141_v58  ;;  %v5004_v58 = vld [vmem:[#allocation10 + $0x40] sm:$0xff] }
 0x61d   :  { %4885 = vmatpush1.bf16.msra.mxu0 %v9136_v61  ;;  %v5019_v61 = vld [vmem:[#allocation10 + $0xb8] sm:$0xff] }
 0x61e   :  { %4886 = vmatprep.subr.bf16.mxu0 %v9144_v59  ;;  %v5003_v59 = vld [vmem:[#allocation10 + $0x38] sm:$0xff] }
 0x61f   :  { %4864 = vmatpush2.bf16.msra.mxu1 %v9139_v3  ;;  %v5018_v3 = vld [vmem:[#allocation10 + $0xb0] sm:$0xff] }
 0x620   :  { %4865 = vmatprep.subr.bf16.mxu1 %v9147_v28  ;;  %v5002_v28 = vld [vmem:[#allocation10 + $0x30] sm:$0xff] }
 0x621   :  { %4887 = vmatpush1.bf16.msra.mxu0 %v9142_v19  ;;  %v5017_v19 = vld [vmem:[#allocation10 + $0xa8] sm:$0xff] }
 0x622   :  { %4888 = vmatprep.subr.bf16.mxu0 %v9150_v38  ;;  %v5001_v38 = vld [vmem:[#allocation10 + $0x28] sm:$0xff] }
 0x623   :  { %4866 = vmatpush2.bf16.msra.mxu1 %v9145_v26  ;;  %v5016_v26 = vld [vmem:[#allocation10 + $0xa0] sm:$0xff] }
 0x624   :  { %4921 = vmatprep.subr.bf16.mxu1 %v9153_v4  ;;  %v5000_v4 = vld [vmem:[#allocation10 + $0x20] sm:$0xff] }
 0x625   :  { %4889 = vmatpush1.bf16.msra.mxu0 %v9148_v33  ;;  %v5015_v33 = vld [vmem:[#allocation10 + $0x98] sm:$0xff] }
 0x626   :  { %4868 = vmatmul.mubr.bf16.vlgmr.msra.gmra.mxu1 %v3175_v40  ;;  %4890 = vmatprep.subr.bf16.mxu0 %v9156_v36  ;;  %v4999_v36 = vld [vmem:[#allocation10 + $0x18] sm:$0xff]  ;;  %v4998_v40 = vld [vmem:[#allocation10 + $0x10] sm:$0xff] }
 0x627   :  { %4922 = vmatpush1.bf16.msra.mxu1 %v9151_v55  ;;  %4953 = vmatprep.mubr.bf16.mxu1 %v11519_v21  ;;  %v5014_v55 = vld [vmem:[#allocation10 + $0x90] sm:$0xff] }
 0x628   :  { %4923 = vmatprep.subr.bf16.mxu1 %v9159_v29  ;;  %v5013_v29 = vld [vmem:[#allocation10 + $0x88] sm:$0xff] }
 0x629   :  { %4891 = vmatpush1.bf16.msra.mxu0 %v9154_v6  ;;  %v4997_v6 = vld [vmem:[#allocation10 + $0x8] sm:$0xff] }
 0x62a   :  { %4892 = vmatprep.subr.bf16.mxu0 %v9162_v43  ;;  %v5012_v43 = vld [vmem:[#allocation10 + $0x80] sm:$0xff] }
 0x62b   :  { %4924 = vmatpush1.bf16.msra.mxu1 %v9157_v44  ;;  %v4996_v44 = vld [vmem:[#allocation10] sm:$0xff] }
 0x62c   :  { %4925 = vmatprep.subr.bf16.mxu1 %v9165_v13  ;;  %v5211_v13 = vld [vmem:[%s11386_s10 + $0xf8] sm:$0xff] }
 0x62d   :  { %4893 = vmatpush1.bf16.msra.mxu0 %v9160_v45 }
 0x62e   :  { %4894 = vmatprep.subr.bf16.mxu0 %v9168_v46 }
 0x62f   :  { %4926 = vmatpush1.bf16.msra.mxu1 %v9163_v0 }
 0x630   :  { %4927 = vmatprep.subr.bf16.mxu1 %v9171_v1 }
 0x631   :  { %4895 = vmatpush2.bf16.msra.mxu0 %v9166_v56 }
 0x632   :  { %4896 = vmatprep.subr.bf16.mxu0 %v9174_v47 }
 0x633   :  { %4928 = vmatpush1.bf16.msra.mxu1 %v9169_v48 }
 0x634   :  { %4929 = vmatprep.subr.bf16.mxu1 %v9177_v49 }
 0x635   :  { %4897 = vmatpush2.bf16.msra.mxu0 %v9172_v16 }
 0x636   :  { %4898 = vmatprep.subr.bf16.mxu0 %v9180_v31 }
 0x637   :  { %4930 = vmatpush1.bf16.msra.mxu1 %v9175_v51 }
 0x638   :  { %4931 = vmatprep.subr.bf16.mxu1 %v9183_v57 }
 0x639   :  { %4899 = vmatpush2.bf16.msra.mxu0 %v9178_v30 }
 0x63a   :  { %4900 = vmatprep.subr.bf16.mxu0 %v9186_v34 }
 0x63b   :  { %4932 = vmatpush1.bf16.msra.mxu1 %v9181_v63 }
 0x63c   :  { %4933 = vmatprep.subr.bf16.mxu1 %v9189_v12 }
 0x63d   :  { %4901 = vmatpush2.bf16.msra.mxu0 %v9184_v17 }
 0x63e   :  { %4902 = vmatprep.subr.bf16.mxu0 %v9192_v10 }
 0x63f   :  { %4934 = vmatpush1.bf16.msra.mxu1 %v9187_v18 }
 0x640   :  { %4935 = vmatprep.subr.bf16.mxu1 %v9195_v25 }
 0x641   :  { %4903 = vmatpush2.bf16.msra.mxu0 %v9190_v20 }
 0x642   :  { %4904 = vmatprep.subr.bf16.mxu0 %v9198_v22 }
 0x643   :  { %4936 = vmatpush1.bf16.msra.mxu1 %v9193_v8 }
 0x644   :  { %7888 = vmatprep.subr.mxu1 %v5027_v7 }
 0x645   :  { %4905 = vmatpush2.bf16.msra.mxu0 %v9196_v39 }
 0x646   :  { %4954 = vmatmul.mubr.bf16.vlgmr.msra.gmra.mxu1 %v3179_v15  ;;  %4906 = vmatprep.subr.bf16.mxu0 %v9201_v60  ;;  %v5009_v15 = vld [vmem:[#allocation10 + $0x68] sm:$0xff] }
 0x647   :  { %7889 = vmatpush3.msra.mxu1 %v5011_v9 }
 0x648   :  { %7890 = vmatprep.subr.mxu1 %v5026_v11 }
 0x649   :  { %4907 = vmatpush2.bf16.msra.mxu0 %v9199_v24  ;;  %7891 = vmatpush3.msra.mxu1 %v5010_v50 }
 0x64a   :  { %4908 = vmatprep.subr.bf16.mxu0 %v9204_v23  ;;  %7892 = vmatprep.subr.mxu1 %v5025_v52 }
 0x64b   :  { %7893 = vmatpush3.msra.mxu1 %v5009_v15 }
 0x64c   :  { %7894 = vmatprep.subr.mxu1 %v5024_v32 }
 0x64d   :  { %4909 = vmatpush2.bf16.msra.mxu0 %v9202_v53  ;;  %7895 = vmatpush3.msra.mxu1 %v5008_v62 }
 0x64e   :  { %7923 = vmatprep.subr.mxu0 %v5027_v7  ;;  %7896 = vmatprep.subr.mxu1 %v5023_v37 }
 0x650   :  { %4911 = vmatmul.mubr.bf16.vlgmr.msra.gmra.mxu0 %v3177_v5  ;;  %v5007_v5 = vld [vmem:[#allocation10 + $0x58] sm:$0xff]  ;;  %v4654_v46 = vpop.f32.mrf.mxu0 }
 0x651   :  { %7924 = vmatpush3.msra.mxu0 %v5011_v9  ;;  %7897 = vmatpush3.msra.mxu1 %v5007_v5 }
 0x652   :  { %7925 = vmatprep.subr.mxu0 %v5026_v11  ;;  %7898 = vmatprep.subr.mxu1 %v5022_v42  ;;  %v4656_v1 = vpop.f32.mrf.mxu0 }
 0x653   :  { %7926 = vmatpush3.msra.mxu0 %v5010_v50  ;;  %7899 = vmatpush3.msra.mxu1 %v5006_v27 }
 0x654   :  { %7927 = vmatprep.subr.mxu0 %v5025_v52  ;;  %7900 = vmatprep.subr.mxu1 %v5021_v2  ;;  %v4658_v47 = vpop.f32.mrf.mxu0 }
 0x655   :  { %7928 = vmatpush3.msra.mxu0 %v5009_v15  ;;  %7901 = vmatpush3.msra.mxu1 %v5005_v54 }
 0x656   :  { %7929 = vmatprep.subr.mxu0 %v5024_v32  ;;  %7902 = vmatprep.subr.mxu1 %v5020_v35  ;;  %v4660_v16 = vpop.f32.mrf.mxu0 }
 0x657   :  { %7930 = vmatpush3.msra.mxu0 %v5008_v62  ;;  %7903 = vmatpush3.msra.mxu1 %v5004_v58 }
 0x658   :  { %7931 = vmatprep.subr.mxu0 %v5023_v37  ;;  %7904 = vmatprep.subr.mxu1 %v5019_v61 }
 0x659   :  { %7932 = vmatpush3.msra.mxu0 %v5007_v5  ;;  %7905 = vmatpush3.msra.mxu1 %v5003_v59 }
 0x65a   :  { %7933 = vmatprep.subr.mxu0 %v5022_v42  ;;  %7906 = vmatprep.subr.mxu1 %v5018_v3 }
 0x65b   :  { %7934 = vmatpush3.msra.mxu0 %v5006_v27  ;;  %7907 = vmatpush3.msra.mxu1 %v5002_v28 }
 0x65c   :  { %7935 = vmatprep.subr.mxu0 %v5021_v2  ;;  %7908 = vmatprep.subr.mxu1 %v5017_v19 }
 0x65d   :  { %7936 = vmatpush3.msra.mxu0 %v5005_v54  ;;  %7909 = vmatpush3.msra.mxu1 %v5001_v38 }
 0x65e   :  { %7937 = vmatprep.subr.mxu0 %v5020_v35  ;;  %7910 = vmatprep.subr.mxu1 %v5016_v26 }
 0x65f   :  { %7938 = vmatpush3.msra.mxu0 %v5004_v58  ;;  %7911 = vmatpush3.msra.mxu1 %v5000_v4 }
 0x660   :  { %7939 = vmatprep.subr.mxu0 %v5019_v61  ;;  %7912 = vmatprep.subr.mxu1 %v5015_v33 }
 0x661   :  { %7940 = vmatpush3.msra.mxu0 %v5003_v59  ;;  %7913 = vmatpush3.msra.mxu1 %v4999_v36 }
 0x662   :  { %7941 = vmatprep.subr.mxu0 %v5018_v3  ;;  %7914 = vmatprep.subr.mxu1 %v5014_v55 }
 0x663   :  { %7942 = vmatpush3.msra.mxu0 %v5002_v28  ;;  %7915 = vmatpush3.msra.mxu1 %v4998_v40 }
 0x664   :  { %7943 = vmatprep.subr.mxu0 %v5017_v19  ;;  %7916 = vmatprep.subr.mxu1 %v5013_v29 }
 0x665   :  { %7944 = vmatpush3.msra.mxu0 %v5001_v38  ;;  %7917 = vmatpush3.msra.mxu1 %v4997_v6 }
 0x666   :  { %7945 = vmatprep.subr.mxu0 %v5016_v26  ;;  %7918 = vmatprep.subr.mxu1 %v5012_v43  ;;  %v4697_v45 = vpop.f32.mrf.mxu1 }
 0x667   :  { %7946 = vmatpush3.msra.mxu0 %v5000_v4  ;;  %7919 = vmatpush3.msra.mxu1 %v4996_v44  ;;  %v4698_v22 = vadd.f32 %v4697_v45, %v4654_v46 }
 0x668   :  { %7947 = vmatprep.subr.mxu0 %v5015_v33  ;;  %5212 = vmatprep.subr.mxu1 %v5211_v13  ;;  %v4699_v0 = vpop.f32.mrf.mxu1 }
 0x669   :  { %7948 = vmatpush3.msra.mxu0 %v4999_v36  ;;  %v4700_v8 = vadd.f32 %v4699_v0, %v4656_v1 }
 0x66a   :  { %7949 = vmatprep.subr.mxu0 %v5014_v55  ;;  %v4701_v56 = vpop.f32.mrf.mxu1 }
 0x66b   :  { %7950 = vmatpush3.msra.mxu0 %v4998_v40  ;;  %v4702_v23 = vadd.f32 %v4701_v56, %v4658_v47 }
 0x66c   :  { %7951 = vmatprep.subr.mxu0 %v5013_v29  ;;  %v4703_v48 = vpop.f32.mrf.mxu1 }
 0x66d   :  { %7952 = vmatpush3.msra.mxu0 %v4997_v6  ;;  %v4704_v11 = vadd.f32 %v4703_v48, %v4660_v16 }
 0x66e   :  { %7953 = vmatprep.subr.mxu0 %v5012_v43 }
 0x66f   :  { %7954 = vmatpush3.msra.mxu0 %v4996_v44 }
 0x670   :  { %5283 = vmatprep.subr.mxu0 %v5211_v13 }
 0x690   :  { %v4740_v31 = vpop.f32.mrf.mxu0 }
 0x691   :  { %v4741_v39 = vadd.f32 %v4740_v31, %v4698_v22 }
 0x692   :  { %v4742_v57 = vpop.f32.mrf.mxu0 }
 0x693   :  { %v4743_v53 = vadd.f32 %v4742_v57, %v4700_v8 }
 0x694   :  { %v4744_v34 = vpop.f32.mrf.mxu0 }
 0x695   :  { %v4745_v50 = vadd.f32 %v4744_v34, %v4702_v23 }
 0x696   :  { %v4746_v17 = vpop.f32.mrf.mxu0 }
 0x697   :  { %v4747_v62 = vadd.f32 %v4746_v17, %v4704_v11 }
 0x6a6   :  { %v4783_v49 = vpop.f32.mrf.mxu1 }
 0x6a7   :  { %v4784_v7 = vadd.f32 %v4783_v49, %v4741_v39 }
 0x6a8   :  { %v4785_v51 = vpop.f32.mrf.mxu1 }
 0x6a9   :  { %v4786_v52 = vadd.f32 %v4785_v51, %v4743_v53 }
 0x6aa   :  { %v4787_v30 = vpop.f32.mrf.mxu1 }
 0x6ab   :  { %v4788_v37 = vadd.f32 %v4787_v30, %v4745_v50  ;;  %v5210_v50 = vld [vmem:[%s11386_s10 + $0xf0] sm:$0xff] }
 0x6ac   :  { %v4789_v63 = vpop.f32.mrf.mxu1 }
 0x6ad   :  { %v4790_v54 = vadd.f32 %v4789_v63, %v4747_v62  ;;  %v5206_v62 = vld [vmem:[%s11386_s10 + $0xd0] sm:$0xff] }
 0x6d0   :  { %v4826_v10 = vpop.f32.mrf.mxu0 }
 0x6d1   :  { %v4827_v15 = vadd.f32 %v4826_v10, %v4784_v7 }
 0x6d2   :  { %v4828_v25 = vpop.f32.mrf.mxu0 }
 0x6d3   :  { %v4829_v5 = vadd.f32 %v4828_v25, %v4786_v52  ;;  %v5209_v52 = vld [vmem:[%s11386_s10 + $0xe8] sm:$0xff] }
 0x6d4   :  { %v4830_v60 = vpop.f32.mrf.mxu0 }
 0x6d5   :  { %v4831_v35 = vadd.f32 %v4830_v60, %v4788_v37  ;;  %v5205_v37 = vld [vmem:[%s11386_s10 + $0xc8] sm:$0xff] }
 0x6d6   :  { %v4832_v32 = vpop.f32.mrf.mxu0 }
 0x6d7   :  { %v4833_v3 = vadd.f32 %v4832_v32, %v4790_v54  ;;  %v5207_v32 = vld [vmem:[%s11386_s10 + $0xd8] sm:$0xff]  ;;  %v5200_v54 = vld [vmem:[%s11386_s10 + $0xa0] sm:$0xff] }
 0x6e6   :  { %v4869_v12 = vpop.f32.mrf.mxu1 }
 0x6e7   :  { %v4870_v42 = vadd.f32 %v4869_v12, %v4827_v15  ;;  %v5208_v15 = vld [vmem:[%s11386_s10 + $0xe0] sm:$0xff] }
 0x6e8   :  { %v4871_v18 = vpop.f32.mrf.mxu1 }
 0x6e9   :  { %v4872_v58 = vadd.f32 %v4871_v18, %v4829_v5  ;;  %v5204_v5 = vld [vmem:[%s11386_s10 + $0xc0] sm:$0xff] }
 0x6ea   :  { %v4873_v20 = vpop.f32.mrf.mxu1 }
 0x6eb   :  { %v4874_v28 = vadd.f32 %v4873_v20, %v4831_v35  ;;  %v5199_v35 = vld [vmem:[%s11386_s10 + $0x98] sm:$0xff] }
 0x6ec   :  { %v4875_v24 = vpop.f32.mrf.mxu1 }
 0x6ed   :  { %v4876_v4 = vadd.f32 %v4875_v24, %v4833_v3  ;;  %v5195_v3 = vld [vmem:[%s11386_s10 + $0x78] sm:$0xff] }
 0x706   :  { %v4955_v9 = vpop.f32.mrf.mxu1 }
 0x708   :  { %v4957_v27 = vpop.f32.mrf.mxu1 }
 0x70a   :  { %v4959_v38 = vpop.f32.mrf.mxu1 }
 0x70c   :  { %v4961_v43 = vpop.f32.mrf.mxu1 }
 0x710   :  { %v4912_v2 = vpop.f32.mrf.mxu0 }
 0x711   :  { %v4913_v61 = vadd.f32 %v4912_v2, %v4870_v42  ;;  %v5203_v42 = vld [vmem:[%s11386_s10 + $0xb8] sm:$0xff]  ;;  %v5201_v2 = vld [vmem:[%s11386_s10 + $0xa8] sm:$0xff] }
 0x712   :  { %v4914_v59 = vpop.f32.mrf.mxu0 }
 0x713   :  { %v4915_v19 = vadd.f32 %v4914_v59, %v4872_v58  ;;  %v11132_v33 = vadd.f32 %v4955_v9, %v4913_v61  ;;  %v5198_v58 = vld [vmem:[%s11386_s10 + $0x90] sm:$0xff]  ;;  %v5197_v61 = vld [vmem:[%s11386_s10 + $0x88] sm:$0xff]  ;;  %v5196_v59 = vld [vmem:[%s11386_s10 + $0x80] sm:$0xff] }
 0x714   :  { %v4916_v26 = vpop.f32.mrf.mxu0 }
 0x715   :  { %v4917_v36 = vadd.f32 %v4916_v26, %v4874_v28  ;;  %v11134_v55 = vadd.f32 %v4957_v27, %v4915_v19  ;;  %v4978_v44 = vmul.f32 %v11132_v33, %v11132_v33  ;;  %v5202_v27 = vld [vmem:[%s11386_s10 + $0xb0] sm:$0xff]  ;;  %v5193_v19 = vld [vmem:[%s11386_s10 + $0x68] sm:$0xff]  ;;  %v5191_v26 = vld [vmem:[%s11386_s10 + $0x58] sm:$0xff] }
 0x716   :  { %v4918_v40 = vpop.f32.mrf.mxu0  ;;  %v5194_v28 = vld [vmem:[%s11386_s10 + $0x70] sm:$0xff] }
 0x717   :  { %v11136_v29 = vadd.f32 %v4959_v38, %v4917_v36  ;;  %v4919_v6 = vadd.f32 %v4918_v40, %v4876_v4  ;;  %v4979_v0 = vmul.f32 %v11134_v55, %v11134_v55  ;;  %v5192_v38 = vld [vmem:[%s11386_s10 + $0x60] sm:$0xff]  ;;  %v5190_v4 = vld [vmem:[%s11386_s10 + $0x50] sm:$0xff]  ;;  %v5189_v36 = vld [vmem:[%s11386_s10 + $0x48] sm:$0xff] }
 0x718   :  { %v5188_v40 = vld [vmem:[%s11386_s10 + $0x40] sm:$0xff] }
 0x719   :  { %v4964_v13 = vadd.f32 %v11136_v29, %v11132_v33  ;;  %v4980_v45 = vmul.f32 %v11136_v29, %v11136_v29  ;;  %v11144_v46 = vadd.f32 %v4961_v43, %v4919_v6  ;;  %v5187_v6 = vld [vmem:[%s11386_s10 + $0x38] sm:$0xff]  ;;  %v5186_v43 = vld [vmem:[%s11386_s10 + $0x30] sm:$0xff] }
 0x71b   :  { %v4965_v1 = vrot.slane %v4964_v13, 4  ;;  %v4982_v56 = vadd.f32 %v4980_v45, %v4978_v44  ;;  %v4971_v47 = vadd.f32 %v11144_v46, %v11134_v55  ;;  %v4981_v48 = vmul.f32 %v11144_v46, %v11144_v46  ;;  %v5185_v44 = vld [vmem:[%s11386_s10 + $0x28] sm:$0xff]  ;;  %v5183_v45 = vld [vmem:[%s11386_s10 + $0x18] sm:$0xff] }
 0x71d   :  { %v4966_v49 = vadd.f32 %v4965_v1, %v4964_v13  ;;  %v4983_v16 = vrot.slane %v4982_v56, 4  ;;  %v4972_v31 = vrot.slane %v4971_v47, 4  ;;  %v4989_v51 = vadd.f32 %v4981_v48, %v4979_v0  ;;  %v5184_v13 = vld [vmem:[%s11386_s10 + $0x20] sm:$0xff]  ;;  %v5182_v0 = vld [vmem:[%s11386_s10 + $0x10] sm:$0xff]  ;;  %v5181_v1 = vld [vmem:[%s11386_s10 + $0x8] sm:$0xff] }
 0x71f   :  { %v4967_v57 = vrot.slane %v4966_v49, 2  ;;  %v4984_v30 = vadd.f32 %v4983_v16, %v4982_v56  ;;  %v4973_v34 = vadd.f32 %v4972_v31, %v4971_v47  ;;  %v4990_v63 = vrot.slane %v4989_v51, 4  ;;  %v5180_v56 = vld [vmem:[%s11386_s10] sm:$0xff] }
 0x721   :  { %v4968_v12 = vadd.f32 %v4967_v57, %v4966_v49  ;;  %v4974_v17 = vrot.slane %v4973_v34, 2  ;;  %v4991_v10 = vadd.f32 %v4990_v63, %v4989_v51  ;;  %v4985_v18 = vrot.slane %v4984_v30, 2 }
 0x723   :  { %v4975_v25 = vadd.f32 %v4974_v17, %v4973_v34  ;;  %v4992_v20 = vrot.slane %v4991_v10, 2  ;;  %v4986_v22 = vadd.f32 %v4985_v18, %v4984_v30  ;;  %v4969_v8 = vrot.slane %v4968_v12, 1 }
 0x725   :  { %v4976_v39 = vrot.slane %v4975_v25, 1  ;;  %v4993_v60 = vadd.f32 %v4992_v20, %v4991_v10  ;;  %v4987_v24 = vrot.slane %v4986_v22, 1  ;;  %v4970_v7 = vadd.f32 %v4969_v8, %v4968_v12  ;;  %v5175_v10 = vld [vmem:[#allocation12] sm:$0x1]  ;;  %v5177_v20 = vld [vmem:[#allocation13] sm:$0x1] }
 0x727   :  { %v4977_v23 = vadd.f32 %v4976_v39, %v4975_v25  ;;  %v4994_v53 = vrot.slane %v4993_v60, 1  ;;  %v4988_v11 = vadd.f32 %v4987_v24, %v4986_v22 }
 0x729   :  { %5092 = vmatprep.mubr.f32.mxu1 %v4977_v23  ;;  %v4995_v9 = vadd.f32 %v4994_v53, %v4993_v60 }
 0x72a   :  { %5093 = vmatmul.mubr.f32.vlgmr.msra.gmra.mxu1 %v4970_v7 }
 0x72b   :  { %5162 = vmatprep.mubr.f32.mxu0 %v4995_v9  ;;  %5276 = vmatprep.mubr.f32.mxu1 %v11496_v41 }
 0x72c   :  { %5163 = vmatmul.mubr.f32.vlgmr.msra.gmra.mxu0 %v4988_v11  ;;  %5213 = vmatpush1.msra.mxu1 %v5210_v50 }
 0x72d   :  { %5347 = vmatprep.mubr.f32.mxu0 %v11496_v41  ;;  %5284 = vmatpush1.msra.mxu0 %v5210_v50 }
 0x72e   :  { %5214 = vmatprep.subr.mxu1 %v5209_v52  ;;  %5285 = vmatprep.subr.mxu0 %v5209_v52 }
 0x72f   :  { %5215 = vmatpush1.msra.mxu1 %v5208_v15  ;;  %5286 = vmatpush1.msra.mxu0 %v5208_v15 }
 0x730   :  { %5216 = vmatprep.subr.mxu1 %v5207_v32  ;;  %5287 = vmatprep.subr.mxu0 %v5207_v32 }
 0x731   :  { %5217 = vmatpush1.msra.mxu1 %v5206_v62  ;;  %5288 = vmatpush1.msra.mxu0 %v5206_v62 }
 0x732   :  { %5218 = vmatprep.subr.mxu1 %v5205_v37  ;;  %5289 = vmatprep.subr.mxu0 %v5205_v37 }
 0x733   :  { %5219 = vmatpush1.msra.mxu1 %v5204_v5  ;;  %5290 = vmatpush1.msra.mxu0 %v5204_v5 }
 0x734   :  { %5220 = vmatprep.subr.mxu1 %v5203_v42  ;;  %5291 = vmatprep.subr.mxu0 %v5203_v42 }
 0x735   :  { %5221 = vmatpush1.msra.mxu1 %v5202_v27  ;;  %5292 = vmatpush1.msra.mxu0 %v5202_v27 }
 0x736   :  { %5222 = vmatprep.subr.mxu1 %v5201_v2  ;;  %5293 = vmatprep.subr.mxu0 %v5201_v2 }
 0x737   :  { %5223 = vmatpush1.msra.mxu1 %v5200_v54  ;;  %5294 = vmatpush1.msra.mxu0 %v5200_v54 }
 0x738   :  { %5224 = vmatprep.subr.mxu1 %v5199_v35  ;;  %5295 = vmatprep.subr.mxu0 %v5199_v35 }
 0x739   :  { %5225 = vmatpush1.msra.mxu1 %v5198_v58  ;;  %5296 = vmatpush1.msra.mxu0 %v5198_v58  ;;  %v9210_v58 = vld [vmem:[#allocation15 + $0xf8] sm:$0xff]  }
 0x73a   :  { %5226 = vmatprep.subr.mxu1 %v5197_v61  ;;  %5297 = vmatprep.subr.mxu0 %v5197_v61  ;;  %v9212_v61 = vld [vmem:[#allocation15 + $0xb8] sm:$0xff]  }
 0x73b   :  { %5227 = vmatpush1.msra.mxu1 %v5196_v59  ;;  %5298 = vmatpush1.msra.mxu0 %v5196_v59  ;;  %v9214_v59 = vld [vmem:[#allocation15 + $0xf0] sm:$0xff]  }
 0x73c   :  { %5228 = vmatprep.subr.mxu1 %v5195_v3  ;;  %5299 = vmatprep.subr.mxu0 %v5195_v3  ;;  %v9216_v3 = vld [vmem:[#allocation15 + $0xb0] sm:$0xff]  }
 0x73d   :  { %5229 = vmatpush1.msra.mxu1 %v5194_v28  ;;  %5300 = vmatpush1.msra.mxu0 %v5194_v28  ;;  %v9218_v28 = vld [vmem:[#allocation15 + $0xe8] sm:$0xff]  }
 0x73e   :  { %5230 = vmatprep.subr.mxu1 %v5193_v19  ;;  %5301 = vmatprep.subr.mxu0 %v5193_v19  ;;  %v5431_v19 = vld [vmem:[#allocation16 + $0x4] sm:$0xf] }
 0x73f   :  { %5231 = vmatpush1.msra.mxu1 %v5192_v38  ;;  %5302 = vmatpush1.msra.mxu0 %v5192_v38  ;;  %v9220_v38 = vld [vmem:[#allocation15 + $0xa8] sm:$0xff]  }
 0x740   :  { %5232 = vmatprep.subr.mxu1 %v5191_v26  ;;  %5303 = vmatprep.subr.mxu0 %v5191_v26  ;;  %v9222_v26 = vld [vmem:[#allocation15 + $0xe0] sm:$0xff]  }
 0x741   :  { %5233 = vmatpush1.msra.mxu1 %v5190_v4  ;;  %5304 = vmatpush1.msra.mxu0 %v5190_v4  ;;  %v9224_v4 = vld [vmem:[#allocation15 + $0xa0] sm:$0xff]  }
 0x742   :  { %5234 = vmatprep.subr.mxu1 %v5189_v36  ;;  %5305 = vmatprep.subr.mxu0 %v5189_v36  ;;  %v9226_v36 = vld [vmem:[#allocation15 + $0xd8] sm:$0xff]  }
 0x743   :  { %5235 = vmatpush1.msra.mxu1 %v5188_v40  ;;  %5306 = vmatpush1.msra.mxu0 %v5188_v40  ;;  %v5477_v40 = vld [vmem:[#allocation16 + $0x8] sm:$0xf] }
 0x744   :  { %5236 = vmatprep.subr.mxu1 %v5187_v6  ;;  %5307 = vmatprep.subr.mxu0 %v5187_v6  ;;  %v9205_v6 = vld [vmem:[#allocation15 + $0x78] sm:$0xff]  }
 0x745   :  { %5237 = vmatpush1.msra.mxu1 %v5186_v43  ;;  %5308 = vmatpush1.msra.mxu0 %v5186_v43  ;;  %v9228_v43 = vld [vmem:[#allocation15 + $0x98] sm:$0xff]  }
 0x746   :  { %5238 = vmatprep.subr.mxu1 %v5185_v44  ;;  %5309 = vmatprep.subr.mxu0 %v5185_v44  ;;  %v5523_v44 = vld [vmem:[#allocation16 + $0xc] sm:$0xf] }
 0x747   :  { %5239 = vmatpush1.msra.mxu1 %v5184_v13  ;;  %5310 = vmatpush1.msra.mxu0 %v5184_v13  ;;  %v9206_v13 = vld [vmem:[#allocation15 + $0x38] sm:$0xff]  }
 0x748   :  { %5240 = vmatprep.subr.mxu1 %v5183_v45  ;;  %5311 = vmatprep.subr.mxu0 %v5183_v45  ;;  %v9207_v45 = vld [vmem:[#allocation15 + $0x70] sm:$0xff]  }
 0x749   :  { %5241 = vmatpush1.msra.mxu1 %v5182_v0  ;;  %5312 = vmatpush1.msra.mxu0 %v5182_v0  ;;  %v9208_v0 = vld [vmem:[#allocation15 + $0x30] sm:$0xff]  }
 0x74a   :  { %5242 = vmatprep.subr.mxu1 %v5181_v1  ;;  %5313 = vmatprep.subr.mxu0 %v5181_v1  ;;  %v9209_v1 = vld [vmem:[#allocation15 + $0x68] sm:$0xff]  }
 0x74b   :  { %5243 = vmatpush1.msra.mxu1 %v5180_v56  ;;  %5314 = vmatpush1.msra.mxu0 %v5180_v56  ;;  %v9211_v56 = vld [vmem:[#allocation15 + $0x28] sm:$0xff]  }
 0x7ea   :  { %v7920_v47 = vpop.f32.mrf.mxu1 }
 0x7ec   :  { %v7921_v48 = vpop.f32.mrf.mxu1  ;;  %v7955_v49 = vpop.f32.mrf.mxu0 }
 0x7ed   :  { %v7922_v16 = vadd.f32 %v7921_v48, %v7920_v47  ;;  %v9213_v47 = vld [vmem:[#allocation15 + $0x60] sm:$0xff]  }
 0x7ee   :  { %v7956_v31 = vpop.f32.mrf.mxu0  ;;  %v9215_v48 = vld [vmem:[#allocation15 + $0x20] sm:$0xff]  }
 0x7ef   :  { %v5168_v51 = vmul.f32 0.010204081, %v7922_v16  ;;  %v7957_v57 = vadd.f32 %v7956_v31, %v7955_v49  ;;  %v9217_v49 = vld [vmem:[#allocation15 + $0x58] sm:$0xff]   ;;  %v9221_v16 = vld [vmem:[#allocation15 + $0x50] sm:$0xff]  }
 0x7f0   :  { %v9223_v31 = vld [vmem:[#allocation15 + $0x10] sm:$0xff]  }
 0x7f1   :  { %v5170_v30 = vmul.f32 %v5168_v51, %v5168_v51  ;;  %v5169_v34 = vmul.f32 0.010204081, %v7957_v57  ;;  %v9227_v57 = vld [vmem:[#allocation15 + $0x8] sm:$0xff]  }
 0x7f3   :  { %v5171_v63 = vsub.f32 %v5169_v34, %v5170_v30  ;;  %v9229_v30 = vld [vmem:[#allocation15 + $0x40] sm:$0xff]   ;;  %v9230_v34 = vld [vmem:[#allocation15 + $0xd0] sm:$0xff]  }
 0x7f5   :  { %v5172_v12 = vmax.f32 %v5171_v63, 0.0  ;;  %v9231_v63 = vld [vmem:[#allocation15] sm:$0xff]  }
 0x7f7   :  { %v5173_v17 = vadd.f32 1e-05, %v5172_v12  ;;  %v9232_v12 = vld [vmem:[#allocation15 + $0x90] sm:$0xff]  }
 0x7f9   :  { %9303 = vrsqrt.f32 %v5173_v17  ;;  %v9233_v17 = vld [vmem:[#allocation15 + $0xc8] sm:$0xff]  }
 0x806   :  { %v9304_v18 = vpop.eup %9303 }
 0x807   :  { %v5176_v25 = vmul.f32 %v9304_v18, %v5175_v10  ;;  %v9234_v10 = vld [vmem:[#allocation15 + $0x178] sm:$0xff]   ;;  %v9235_v18 = vld [vmem:[#allocation15 + $0x88] sm:$0xff]  }
 0x809   :  { %5277 = vmatmul.mubr.f32.vlgmr.msra.gmra.mxu1 %v5176_v25  ;;  %v5178_v22 = vmul.f32 %v5176_v25, %v5168_v51  ;;  %v9225_v51 = vld [vmem:[#allocation15 + $0x48] sm:$0xff]   ;;  %v9237_v25 = vld [vmem:[#allocation15 + $0xc0] sm:$0xff]  }
 0x80a   :  { %5421 = vmatprep.mubr.bf16.mxu1 %v11519_v21 }
 0x80b   :  { %v5179_v8 = vsub.f32 %v5177_v20, %v5178_v22  ;;  %v9239_v20 = vld [vmem:[#allocation15 + $0x80] sm:$0xff]   ;;  %v9242_v22 = vld [vmem:[#allocation15 + $0x1f8] sm:$0xff]  }
 0x80d   :  { %5348 = vmatmul.mubr.f32.vlgmr.msra.gmra.mxu0 %v5179_v8 }
 0x80e   :  { %5605 = vmatprep.mubr.bf16.mxu0 %v11519_v21 }
 0x8c9   :  { %v5278_v39 = vpop.f32.mrf.mxu1 }
 0x8ca   :  { %v5357_v60 = vrot.slane %v5278_v39, %v10957_v14 }
 0x8cb   :  { %v5280_v24 = vpop.f32.mrf.mxu1 }
 0x8cc   :  { %v5361_v23 = vrot.slane %v5280_v24, %v10957_v14  ;;  %v5362_v7 = vmul.f32 %v5357_v60, %v11132_v33  ;;  %v5364_v9 = vmul.f32 %v5357_v60, %v11136_v29 }
 0x8cd   :  { %v5349_v53 = vpop.f32.mrf.mxu0 }
 0x8ce   :  { %v5369_v11 = vrot.slane %v5349_v53, %v10957_v14  ;;  %v5363_v50 = vmul.f32 %v5361_v23, %v11134_v55  ;;  %v5365_v15 = vmul.f32 %v5361_v23, %v11144_v46  ;;  %v5384_v55 = vld [vmem:[#allocation16] sm:$0xf]  ;;  %v5569_v46 = vld [vmem:[#allocation16 + $0x10] sm:$0xf]  ;;  %v9236_v53 = vld [vmem:[#allocation15 + $0x138] sm:$0xff]  }
 0x8cf   :  { %v5351_v52 = vpop.f32.mrf.mxu0 }
 0x8d0   :  { %v5374_v32 = vadd.f32 %v5369_v11, %v5362_v7  ;;  %v5376_v62 = vadd.f32 %v5369_v11, %v5364_v9  ;;  %v5373_v37 = vrot.slane %v5351_v52, %v10957_v14  ;;  %v9238_v11 = vld [vmem:[#allocation15 + $0x170] sm:$0xff]  }
 0x8d2   :  { %v5375_v5 = vadd.f32 %v5373_v37, %v5363_v50  ;;  %v5377_v42 = vadd.f32 %v5373_v37, %v5365_v15  ;;  %v5378_v27 = vmax.f32 %v5374_v32, 0.0  ;;  %v5380_v2 = vmax.f32 %v5376_v62, 0.0  ;;  %v9240_v32 = vld [vmem:[#allocation15 + $0x130] sm:$0xff]   ;;  %v9241_v37 = vld [vmem:[#allocation15 + $0x168] sm:$0xff]  }
 0x8d4   :  { %v5379_v54 = vmax.f32 %v5375_v5, 0.0  ;;  %v5381_v35 = vmax.f32 %v5377_v42, 0.0  ;;  %v5382_v29 = vpack.c.bf16 %v5380_v2, %v5378_v27  ;;  %v9243_v2 = vld [vmem:[#allocation15 + $0x128] sm:$0xff]  }
 0x8d6   :  { %v5383_v33 = vpack.c.bf16 %v5381_v35, %v5379_v54  ;;  %v9244_v54 = vld [vmem:[#allocation15 + $0x1b8] sm:$0xff]   ;;  %v9245_v35 = vld [vmem:[#allocation15 + $0x160] sm:$0xff]  }
 0x8d8   :  { %5403 = vmatprep.subr.bf16.mxu1 %v5383_v33  ;;  %5587 = vmatprep.subr.bf16.mxu0 %v5383_v33 }
 0x8d9   :  { %5404 = vmatpush1.bf16.msra.mxu1 %v5382_v29  ;;  %5588 = vmatpush1.bf16.msra.mxu0 %v5382_v29 }
 0x8da   :  { %5449 = vmatprep.subr.bf16.mxu1 %v5383_v33  ;;  %7980 = vmatprep.subr.bf16.mxu0 %v9210_v58 }
 0x8dc   :  { %7506 = vmatmul.mubr.msk.bf16.vlgmr.msra.gmra.mxu1 %vm5385_vm4, %v5384_v55  ;;  %7510 = vmatmul.mubr.msk.bf16.vlgmr.msra.gmra.mxu0 %vm5385_vm4, %v5569_v46  ;;  %v9247_v55 = vld [vmem:[#allocation15 + $0x120] sm:$0xff]   ;;  %v9248_v46 = vld [vmem:[#allocation15 + $0x1b0] sm:$0xff]  }
 0x8dd   :  { %5450 = vmatpush1.bf16.msra.mxu1 %v5382_v29  ;;  %5467 = vmatprep.mubr.bf16.mxu1 %v11519_v21 }
 0x8de   :  { %5495 = vmatprep.subr.bf16.mxu1 %v5383_v33  ;;  %7981 = vmatpush3.bf16.msra.mxu0 %v9212_v61  ;;  %v9249_v61 = vld [vmem:[#allocation15 + $0x158] sm:$0xff]  }
 0x8df   :  { %7982 = vmatprep.subr.bf16.mxu0 %v9214_v59  ;;  %v9250_v59 = vld [vmem:[#allocation15 + $0x1e8] sm:$0xff]  }
 0x8e2   :  { %7983 = vmatpush3.bf16.msra.mxu0 %v9216_v3 }
 0x8e3   :  { %7984 = vmatprep.subr.bf16.mxu0 %v9218_v28 }
 0x8e4   :  { %7507 = vmatmul.mubr.msk.bf16.vlgmr.msra.gmra.mxu1 %vm5385_vm4, %v5431_v19  ;;  %v9251_v19 = vld [vmem:[#allocation15 + $0x118] sm:$0xff]  }
 0x8e5   :  { %5496 = vmatpush1.bf16.msra.mxu1 %v5382_v29  ;;  %5513 = vmatprep.mubr.bf16.mxu1 %v11519_v21 }
 0x8e6   :  { %5541 = vmatprep.subr.bf16.mxu1 %v5383_v33  ;;  %7985 = vmatpush3.bf16.msra.mxu0 %v9220_v38  ;;  %v9246_v33 = vld [vmem:[#allocation15 + $0x1f0] sm:$0xff]   ;;  %v9252_v38 = vld [vmem:[#allocation15 + $0x1a8] sm:$0xff]  }
 0x8e7   :  { %7986 = vmatprep.subr.bf16.mxu0 %v9222_v26 }
 0x8ea   :  { %7987 = vmatpush3.bf16.msra.mxu0 %v9224_v4  ;;  %v9253_v4 = vld [vmem:[#allocation15 + $0x150] sm:$0xff]  }
 0x8eb   :  { %7988 = vmatprep.subr.bf16.mxu0 %v9226_v36  ;;  %v9254_v36 = vld [vmem:[#allocation15 + $0x1e0] sm:$0xff]  }
 0x8ec   :  { %7508 = vmatmul.mubr.msk.bf16.vlgmr.msra.gmra.mxu1 %vm5385_vm4, %v5477_v40 }
 0x8ed   :  { %5542 = vmatpush1.bf16.msra.mxu1 %v5382_v29  ;;  %5559 = vmatprep.mubr.bf16.mxu1 %v11519_v21  ;;  %v9219_v21 = vld [vmem:[#allocation15 + $0x18] sm:$0xff]  }
 0x8ee   :  { %7958 = vmatprep.subr.bf16.mxu1 %v9205_v6  ;;  %7989 = vmatpush3.bf16.msra.mxu0 %v9228_v43  ;;  %v9255_v43 = vld [vmem:[#allocation15 + $0x110] sm:$0xff]  }
 0x8ef   :  { %7990 = vmatprep.subr.bf16.mxu0 %v9230_v34  ;;  %v9266_v34 = vld [vmem:[#allocation15 + $0x278] sm:$0xff]  }
 0x8f2   :  { %7991 = vmatpush3.bf16.msra.mxu0 %v9232_v12  ;;  %v9268_v12 = vld [vmem:[#allocation15 + $0x238] sm:$0xff]  }
 0x8f3   :  { %7992 = vmatprep.subr.bf16.mxu0 %v9233_v17 }
 0x8f4   :  { %7509 = vmatmul.mubr.msk.bf16.vlgmr.msra.gmra.mxu1 %vm5385_vm4, %v5523_v44  ;;  %v9256_v44 = vld [vmem:[#allocation15 + $0x1a0] sm:$0xff]  }
 0x8f5   :  { %7959 = vmatpush3.bf16.msra.mxu1 %v9206_v13  ;;  %v9257_v13 = vld [vmem:[#allocation15 + $0x148] sm:$0xff]  }
 0x8f6   :  { %7960 = vmatprep.subr.bf16.mxu1 %v9207_v45  ;;  %7993 = vmatpush3.bf16.msra.mxu0 %v9235_v18  ;;  %v9258_v45 = vld [vmem:[#allocation15 + $0x1d8] sm:$0xff]   ;;  %v9270_v18 = vld [vmem:[#allocation15 + $0x270] sm:$0xff]  }
 0x8f7   :  { %7994 = vmatprep.subr.bf16.mxu0 %v9237_v25 }
 0x8f9   :  { %7961 = vmatpush3.bf16.msra.mxu1 %v9208_v0 }
 0x8fa   :  { %7962 = vmatprep.subr.bf16.mxu1 %v9209_v1  ;;  %7995 = vmatpush3.bf16.msra.mxu0 %v9239_v20  ;;  %v9271_v20 = vld [vmem:[#allocation15 + $0x180] sm:$0xff]  }
 0x8fb   :  { %8024 = vmatprep.subr.bf16.mxu0 %v9242_v22  ;;  %v9272_v22 = vld [vmem:[#allocation15 + $0x230] sm:$0xff]  }
 0x8fd   :  { %7963 = vmatpush3.bf16.msra.mxu1 %v9211_v56  ;;  %v9259_v56 = vld [vmem:[#allocation15 + $0x108] sm:$0xff]  }
 0x8fe   :  { %7964 = vmatprep.subr.bf16.mxu1 %v9213_v47  ;;  %v9260_v47 = vld [vmem:[#allocation15 + $0x198] sm:$0xff]  }
 0x901   :  { %7965 = vmatpush3.bf16.msra.mxu1 %v9215_v48 }
 0x902   :  { %7966 = vmatprep.subr.bf16.mxu1 %v9217_v49  ;;  %v9261_v49 = vld [vmem:[#allocation15 + $0x140] sm:$0xff]  }
 0x905   :  { %7967 = vmatpush3.bf16.msra.mxu1 %v9219_v21  ;;  %v9262_v21 = vld [vmem:[#allocation15 + $0x1d0] sm:$0xff]  }
 0x906   :  { %7968 = vmatprep.subr.bf16.mxu1 %v9221_v16 }
 0x909   :  { %7969 = vmatpush3.bf16.msra.mxu1 %v9223_v31 }
 0x90a   :  { %7970 = vmatprep.subr.bf16.mxu1 %v9225_v51  ;;  %v9263_v51 = vld [vmem:[#allocation15 + $0x100] sm:$0xff]  }
 0x90d   :  { %7971 = vmatpush3.bf16.msra.mxu1 %v9227_v57  ;;  %v9264_v57 = vld [vmem:[#allocation15 + $0x190] sm:$0xff]  }
 0x90e   :  { %7972 = vmatprep.subr.bf16.mxu1 %v9229_v30  ;;  %v9265_v30 = vld [vmem:[#allocation15 + $0x1c8] sm:$0xff]  }
 0x911   :  { %7973 = vmatpush3.bf16.msra.mxu1 %v9231_v63  ;;  %v9267_v63 = vld [vmem:[#allocation15 + $0x188] sm:$0xff]  }
 0x912   :  { %8002 = vmatprep.subr.bf16.mxu1 %v9234_v10  ;;  %v9269_v10 = vld [vmem:[#allocation15 + $0x1c0] sm:$0xff]  }
 0x99c   :  { %v5423_v8 = vpop.f32.mrf.mxu1  ;;  %v11265_v39 = vpop.f32.mrf.mxu0 }
 0x99d   :  { %v5614_v7 = vpack.c.bf16 %v5423_v8, %v5423_v8  ;;  %v9273_v8 = vld [vmem:[#allocation15 + $0x268] sm:$0xff]  }
 0x99e   :  { %v5425_v60 = vpop.f32.mrf.mxu1  ;;  %v11267_v24 = vpop.f32.mrf.mxu0 }
 0x99f   :  { %v5615_v23 = vpack.c.bf16 %v5425_v60, %v5425_v60  ;;  %v5623_v25 = vpack.c.bf16 %v11267_v24, %v11267_v24  ;;  %v9276_v24 = vld [vmem:[#allocation15 + $0x220] sm:$0xff]  }
 0x9a0   :  { %v5427_v9 = vpop.f32.mrf.mxu1  ;;  %v5611_v50 = vpop.f32.mrf.mxu0 }
 0x9a1   :  { %6296 = vmatprep.mubr.bf16.mxu1 %v5615_v23  ;;  %v9274_v23 = vld [vmem:[#allocation15 + $0x228] sm:$0xff]   ;;  %v9278_v9 = vld [vmem:[#allocation15 + $0x218] sm:$0xff]   ;;  %v9280_v50 = vld [vmem:[#allocation15 + $0x210] sm:$0xff]  }
 0x9a2   :  { %v5428_v52 = vpop.f32.mrf.mxu1  ;;  %6297 = vmatmul.mubr.bf16.vlgmr.msra.gmra.mxu1 %v5614_v7  ;;  %v5612_v15 = vpop.f32.mrf.mxu0  ;;  %v9277_v7 = vld [vmem:[#allocation15 + $0x258] sm:$0xff]  }
 0x9a3   :  { %8003 = vmatpush3.bf16.msra.mxu1 %v9236_v53  ;;  %v9275_v53 = vld [vmem:[#allocation15 + $0x260] sm:$0xff]   ;;  %v9281_v52 = vld [vmem:[#allocation15 + $0x248] sm:$0xff]  }
 0x9a4   :  { %v5469_v62 = vpop.f32.mrf.mxu1  ;;  %8004 = vmatprep.subr.bf16.mxu1 %v9238_v11  ;;  %v9279_v11 = vld [vmem:[#allocation15 + $0x250] sm:$0xff]   ;;  %v9282_v15 = vld [vmem:[#allocation15 + $0x208] sm:$0xff]  }
 0x9a5   :  { %v5616_v5 = vpack.c.bf16 %v5469_v62, %v5469_v62  ;;  %v9284_v62 = vld [vmem:[#allocation15 + $0x200] sm:$0xff]  }
 0x9a6   :  { %v5471_v42 = vpop.f32.mrf.mxu1 }
 0x9a7   :  { %v5617_v27 = vpack.c.bf16 %v5471_v42, %v5471_v42  ;;  %8005 = vmatpush3.bf16.msra.mxu1 %v9240_v32  ;;  %v9283_v32 = vld [vmem:[#allocation15 + $0x240] sm:$0xff]  }
 0x9a8   :  { %8006 = vmatprep.subr.bf16.mxu1 %v9241_v37  ;;  %v5473_v58 = vpop.f32.mrf.mxu1  ;;  %v5622_v37 = vpack.c.bf16 %v11265_v39, %v11265_v39  ;;  %v6491_v42 = vld [vmem:[#allocation18 + $0x70] sm:$0xff]  ;;  %v6489_v39 = vld [vmem:[#allocation18 + $0x60] sm:$0xff] }
 0x9a9   :  { %6336 = vmatprep.mubr.bf16.mxu0 %v5617_v27  ;;  %v6490_v27 = vld [vmem:[#allocation18 + $0x68] sm:$0xff]  ;;  %v6484_v58 = vld [vmem:[#allocation18 + $0x38] sm:$0xff] }
 0x9aa   :  { %6337 = vmatmul.mubr.bf16.vlgmr.msra.gmra.mxu0 %v5616_v5  ;;  %v5474_v29 = vpop.f32.mrf.mxu1  ;;  %v6492_v5 = vld [vmem:[#allocation18 + $0x78] sm:$0xff] }
 0x9ab   :  { %8007 = vmatpush3.bf16.msra.mxu1 %v9243_v2  ;;  %8025 = vmatpush3.bf16.msra.mxu0 %v9244_v54  ;;  %v6488_v2 = vld [vmem:[#allocation18 + $0x58] sm:$0xff]  ;;  %v6487_v54 = vld [vmem:[#allocation18 + $0x50] sm:$0xff] }
 0x9ac   :  { %8008 = vmatprep.subr.bf16.mxu1 %v9245_v35  ;;  %8026 = vmatprep.subr.bf16.mxu0 %v9246_v33  ;;  %v5515_v3 = vpop.f32.mrf.mxu1  ;;  %v6486_v35 = vld [vmem:[#allocation18 + $0x48] sm:$0xff]  ;;  %v6485_v33 = vld [vmem:[#allocation18 + $0x40] sm:$0xff]  ;;  %v6483_v29 = vld [vmem:[#allocation18 + $0x30] sm:$0xff] }
 0x9ad   :  { %v5618_v17 = vpack.c.bf16 %v5515_v3, %v5515_v3  ;;  %v6478_v3 = vld [vmem:[#allocation18 + $0x8] sm:$0xff] }
 0x9ae   :  { %v5517_v28 = vpop.f32.mrf.mxu1 }
 0x9af   :  { %8009 = vmatpush3.bf16.msra.mxu1 %v9247_v55  ;;  %8027 = vmatpush3.bf16.msra.mxu0 %v9248_v46  ;;  %v5619_v26 = vpack.c.bf16 %v5517_v28, %v5517_v28  ;;  %v6482_v55 = vld [vmem:[#allocation18 + $0x28] sm:$0xff]  ;;  %v6481_v46 = vld [vmem:[#allocation18 + $0x20] sm:$0xff] }
 0x9b0   :  { %8010 = vmatprep.subr.bf16.mxu1 %v9249_v61  ;;  %8028 = vmatprep.subr.bf16.mxu0 %v9250_v59  ;;  %v5519_v40 = vpop.f32.mrf.mxu1  ;;  %v6480_v61 = vld [vmem:[#allocation18 + $0x18] sm:$0xff]  ;;  %v6479_v59 = vld [vmem:[#allocation18 + $0x10] sm:$0xff]  ;;  %v6477_v28 = vld [vmem:[#allocation18] sm:$0xff] }
 0x9b1   :  { %6376 = vmatprep.mubr.bf16.mxu1 %v5619_v26 }
 0x9b2   :  { %v5520_v6 = vpop.f32.mrf.mxu1 }
 0x9b3   :  { %8011 = vmatpush3.bf16.msra.mxu1 %v9251_v19  ;;  %8029 = vmatpush3.bf16.msra.mxu0 %v9252_v38 }
 0x9b4   :  { %8012 = vmatprep.subr.bf16.mxu1 %v9253_v4  ;;  %8030 = vmatprep.subr.bf16.mxu0 %v9254_v36  ;;  %v5561_v0 = vpop.f32.mrf.mxu1 }
 0x9b5   :  { %v5620_v60 = vpack.c.bf16 %v5561_v0, %v5561_v0 }
 0x9b6   :  { %v5563_v1 = vpop.f32.mrf.mxu1 }
 0x9b7   :  { %8013 = vmatpush3.bf16.msra.mxu1 %v9255_v43  ;;  %8031 = vmatpush3.bf16.msra.mxu0 %v9256_v44  ;;  %v5621_v48 = vpack.c.bf16 %v5563_v1, %v5563_v1 }
 0x9b8   :  { %8014 = vmatprep.subr.bf16.mxu1 %v9257_v13  ;;  %8032 = vmatprep.subr.bf16.mxu0 %v9258_v45  ;;  %v5565_v16 = vpop.f32.mrf.mxu1 }
 0x9b9   :  { %6416 = vmatprep.mubr.bf16.mxu0 %v5621_v48 }
 0x9ba   :  { %v5566_v31 = vpop.f32.mrf.mxu1 }
 0x9bb   :  { %8015 = vmatpush3.bf16.msra.mxu1 %v9259_v56  ;;  %8033 = vmatpush3.bf16.msra.mxu0 %v9260_v47 }
 0x9bc   :  { %8016 = vmatprep.subr.bf16.mxu1 %v9261_v49  ;;  %8034 = vmatprep.subr.bf16.mxu0 %v9262_v21 }
 0x9bf   :  { %8017 = vmatpush3.bf16.msra.mxu1 %v9263_v51  ;;  %8035 = vmatpush3.bf16.msra.mxu0 %v9264_v57 }
 0x9c0   :  { %8036 = vmatprep.subr.bf16.mxu0 %v9265_v30  ;;  %8046 = vmatprep.subr.bf16.mxu1 %v9266_v34 }
 0x9c2   :  { %6377 = vmatmul.mubr.bf16.vlgmr.msra.gmra.mxu1 %v5618_v17 }
 0x9c3   :  { %8037 = vmatpush3.bf16.msra.mxu0 %v9267_v63  ;;  %8047 = vmatpush3.bf16.msra.mxu1 %v9268_v12 }
 0x9c4   :  { %8038 = vmatprep.subr.bf16.mxu0 %v9269_v10  ;;  %8048 = vmatprep.subr.bf16.mxu1 %v9270_v18 }
 0x9c5   :  { %6456 = vmatprep.mubr.bf16.mxu1 %v5623_v25 }
 0x9c7   :  { %8039 = vmatpush3.bf16.msra.mxu0 %v9271_v20  ;;  %8049 = vmatpush3.bf16.msra.mxu1 %v9272_v22 }
 0x9c8   :  { %8050 = vmatprep.subr.bf16.mxu1 %v9273_v8  ;;  %8490 = vmatprep.subr.mxu0 %v11496_v41 }
 0x9ca   :  { %6417 = vmatmul.mubr.bf16.vlgmr.msra.gmra.mxu0 %v5620_v60 }
 0x9cb   :  { %8051 = vmatpush3.bf16.msra.mxu1 %v9274_v23  ;;  %8522 = vmatprep.mubr.msk.f32.mxu0 %vm9624_vm0, %v11496_v41 }
 0x9cc   :  { %8052 = vmatprep.subr.bf16.mxu1 %v9275_v53  ;;  %8491 = vmatpush3.msra.mxu0 %v6492_v5 }
 0x9cd   :  { %8492 = vmatprep.subr.mxu0 %v11496_v41 }
 0x9ce   :  { %8493 = vmatpush3.msra.mxu0 %v6491_v42 }
 0x9cf   :  { %8053 = vmatpush3.bf16.msra.mxu1 %v9276_v24  ;;  %8494 = vmatprep.subr.mxu0 %v11496_v41 }
 0x9d0   :  { %8054 = vmatprep.subr.bf16.mxu1 %v9277_v7  ;;  %8495 = vmatpush3.msra.mxu0 %v6490_v27 }
 0x9d1   :  { %8496 = vmatprep.subr.mxu0 %v11496_v41 }
 0x9d2   :  { %8497 = vmatpush3.msra.mxu0 %v6489_v39 }
 0x9d3   :  { %8055 = vmatpush3.bf16.msra.mxu1 %v9278_v9  ;;  %8498 = vmatprep.subr.mxu0 %v11496_v41 }
 0x9d4   :  { %8056 = vmatprep.subr.bf16.mxu1 %v9279_v11  ;;  %8499 = vmatpush3.msra.mxu0 %v6488_v2 }
 0x9d5   :  { %8500 = vmatprep.subr.mxu0 %v11496_v41 }
 0x9d6   :  { %8501 = vmatpush3.msra.mxu0 %v6487_v54 }
 0x9d7   :  { %8057 = vmatpush3.bf16.msra.mxu1 %v9280_v50  ;;  %8502 = vmatprep.subr.mxu0 %v11496_v41 }
 0x9d8   :  { %8058 = vmatprep.subr.bf16.mxu1 %v9281_v52  ;;  %8503 = vmatpush3.msra.mxu0 %v6486_v35  ;;  %v6660_v52 = vld [vmem:[#allocation19 + $0x78] sm:$0xff] }
 0x9d9   :  { %8504 = vmatprep.subr.mxu0 %v11496_v41 }
 0x9da   :  { %8505 = vmatpush3.msra.mxu0 %v6485_v33 }
 0x9db   :  { %8059 = vmatpush3.bf16.msra.mxu1 %v9282_v15  ;;  %8506 = vmatprep.subr.mxu0 %v11496_v41 }
 0x9dc   :  { %8060 = vmatprep.subr.bf16.mxu1 %v9283_v32  ;;  %8507 = vmatpush3.msra.mxu0 %v6484_v58  ;;  %v6659_v32 = vld [vmem:[#allocation19 + $0x70] sm:$0xff] }
 0x9dd   :  { %8508 = vmatprep.subr.mxu0 %v11496_v41 }
 0x9de   :  { %8509 = vmatpush3.msra.mxu0 %v6483_v29 }
 0x9df   :  { %8061 = vmatpush3.bf16.msra.mxu1 %v9284_v62  ;;  %8510 = vmatprep.subr.mxu0 %v11496_v41  ;;  %v6658_v62 = vld [vmem:[#allocation19 + $0x68] sm:$0xff] }
 0x9e0   :  { %8525 = vmatprep.subr.mxu1 %v11496_v41  ;;  %8511 = vmatpush3.msra.mxu0 %v6482_v55 }
 0x9e1   :  { %8512 = vmatprep.subr.mxu0 %v11496_v41 }
 0x9e2   :  { %6457 = vmatmul.mubr.bf16.vlgmr.msra.gmra.mxu1 %v5622_v37  ;;  %8513 = vmatpush3.msra.mxu0 %v6481_v46  ;;  %v6657_v37 = vld [vmem:[#allocation19 + $0x60] sm:$0xff] }
 0x9e3   :  { %8557 = vmatprep.mubr.msk.f32.mxu1 %vm9624_vm0, %v11496_v41  ;;  %8526 = vmatpush3.msra.mxu1 %v6492_v5  ;;  %v6656_v5 = vld [vmem:[#allocation19 + $0x58] sm:$0xff] }
 0x9e4   :  { %8527 = vmatprep.subr.mxu1 %v11496_v41  ;;  %8514 = vmatprep.subr.mxu0 %v11496_v41 }
 0x9e5   :  { %8528 = vmatpush3.msra.mxu1 %v6491_v42  ;;  %8515 = vmatpush3.msra.mxu0 %v6480_v61  ;;  %v6655_v42 = vld [vmem:[#allocation19 + $0x50] sm:$0xff] }
 0x9e6   :  { %8529 = vmatprep.subr.mxu1 %v11496_v41  ;;  %8516 = vmatprep.subr.mxu0 %v11496_v41 }
 0x9e7   :  { %8530 = vmatpush3.msra.mxu1 %v6490_v27  ;;  %8517 = vmatpush3.msra.mxu0 %v6479_v59  ;;  %v6654_v27 = vld [vmem:[#allocation19 + $0x48] sm:$0xff] }
 0x9e8   :  { %8531 = vmatprep.subr.mxu1 %v11496_v41  ;;  %8518 = vmatprep.subr.mxu0 %v11496_v41 }
 0x9e9   :  { %8532 = vmatpush3.msra.mxu1 %v6489_v39  ;;  %8519 = vmatpush3.msra.mxu0 %v6478_v3  ;;  %v6653_v39 = vld [vmem:[#allocation19 + $0x40] sm:$0xff] }
 0x9ea   :  { %8533 = vmatprep.subr.mxu1 %v11496_v41  ;;  %8520 = vmatprep.subr.mxu0 %v11496_v41 }
 0x9eb   :  { %8534 = vmatpush3.msra.mxu1 %v6488_v2  ;;  %8521 = vmatpush3.msra.mxu0 %v6477_v28  ;;  %v6652_v2 = vld [vmem:[#allocation19 + $0x38] sm:$0xff] }
 0x9ec   :  { %8535 = vmatprep.subr.mxu1 %v11496_v41  ;;  %8560 = vmatprep.subr.mxu0 %v11496_v41 }
 0x9ed   :  { %8536 = vmatpush3.msra.mxu1 %v6487_v54  ;;  %v6651_v54 = vld [vmem:[#allocation19 + $0x30] sm:$0xff] }
 0x9ee   :  { %8537 = vmatprep.subr.mxu1 %v11496_v41 }
 0x9ef   :  { %8538 = vmatpush3.msra.mxu1 %v6486_v35  ;;  %v6650_v35 = vld [vmem:[#allocation19 + $0x28] sm:$0xff] }
 0x9f0   :  { %8539 = vmatprep.subr.mxu1 %v11496_v41 }
 0x9f1   :  { %8540 = vmatpush3.msra.mxu1 %v6485_v33  ;;  %v6649_v33 = vld [vmem:[#allocation19 + $0x20] sm:$0xff] }
 0x9f2   :  { %8541 = vmatprep.subr.mxu1 %v11496_v41 }
 0x9f3   :  { %8542 = vmatpush3.msra.mxu1 %v6484_v58  ;;  %v6648_v58 = vld [vmem:[#allocation19 + $0x18] sm:$0xff] }
 0x9f4   :  { %8543 = vmatprep.subr.mxu1 %v11496_v41 }
 0x9f5   :  { %8544 = vmatpush3.msra.mxu1 %v6483_v29  ;;  %v6647_v29 = vld [vmem:[#allocation19 + $0x10] sm:$0xff] }
 0x9f6   :  { %8545 = vmatprep.subr.mxu1 %v11496_v41 }
 0x9f7   :  { %8546 = vmatpush3.msra.mxu1 %v6482_v55  ;;  %v6646_v55 = vld [vmem:[#allocation19 + $0x8] sm:$0xff] }
 0x9f8   :  { %8547 = vmatprep.subr.mxu1 %v11496_v41 }
 0x9f9   :  { %8548 = vmatpush3.msra.mxu1 %v6481_v46  ;;  %v6645_v46 = vld [vmem:[#allocation19] sm:$0xff] }
 0x9fa   :  { %8549 = vmatprep.subr.mxu1 %v11496_v41 }
 0x9fb   :  { %8550 = vmatpush3.msra.mxu1 %v6480_v61 }
 0x9fc   :  { %8551 = vmatprep.subr.mxu1 %v11496_v41 }
 0x9fd   :  { %8552 = vmatpush3.msra.mxu1 %v6479_v59 }
 0x9fe   :  { %8553 = vmatprep.subr.mxu1 %v11496_v41 }
 0x9ff   :  { %8554 = vmatpush3.msra.mxu1 %v6478_v3 }
 0xa00   :  { %8555 = vmatprep.subr.mxu1 %v11496_v41 }
 0xa01   :  { %8556 = vmatpush3.msra.mxu1 %v6477_v28 }
 0xa02   :  { %8595 = vmatprep.subr.mxu1 %v11496_v41 }
 0xa62   :  { %v7974_v19 = vpop.f32.mrf.mxu1 }
 0xa64   :  { %v7975_v38 = vpop.f32.mrf.mxu1 }
 0xa65   :  { %v7976_v21 = vadd.f32 %v7975_v38, %v7974_v19 }
 0xa66   :  { %v7977_v26 = vpop.f32.mrf.mxu1 }
 0xa68   :  { %v7978_v4 = vpop.f32.mrf.mxu1 }
 0xa6a   :  { %v7996_v36 = vpop.f32.mrf.mxu0 }
 0xa6c   :  { %v7997_v40 = vpop.f32.mrf.mxu0 }
 0xa6d   :  { %v7998_v49 = vadd.f32 %v7997_v40, %v7996_v36 }
 0xa6e   :  { %v7999_v6 = vpop.f32.mrf.mxu0 }
 0xa6f   :  { %v6339_v31 = vadd.f32 %v7998_v49, %v7976_v21  ;;  %v6640_v6 = vld [vmem:[%s11393_s17] sm:$0x1] }
 0xa70   :  { %v8000_v43 = vpop.f32.mrf.mxu0 }
 0xa82   :  { %v8018_v44 = vpop.f32.mrf.mxu1 }
 0xa84   :  { %v8019_v13 = vpop.f32.mrf.mxu1 }
 0xa85   :  { %v8020_v16 = vadd.f32 %v8019_v13, %v8018_v44  ;;  %v6642_v13 = vld [vmem:[%s11394_s18] sm:$0x1] }
 0xa86   :  { %v8021_v45 = vpop.f32.mrf.mxu1 }
 0xa87   :  { %v6379_v30 = vadd.f32 %v8020_v16, %v6339_v31 }
 0xa88   :  { %v8022_v0 = vpop.f32.mrf.mxu1 }
 0xa8a   :  { %v8040_v1 = vpop.f32.mrf.mxu0 }
 0xa8c   :  { %v8041_v56 = vpop.f32.mrf.mxu0 }
 0xa8d   :  { %v8042_v51 = vadd.f32 %v8041_v56, %v8040_v1 }
 0xa8e   :  { %v8043_v47 = vpop.f32.mrf.mxu0 }
 0xa8f   :  { %v6419_v63 = vadd.f32 %v8042_v51, %v6379_v30 }
 0xa90   :  { %v8044_v48 = vpop.f32.mrf.mxu0 }
 0xaa2   :  { %v8062_v57 = vpop.f32.mrf.mxu1 }
 0xaa4   :  { %v8063_v34 = vpop.f32.mrf.mxu1 }
 0xaa5   :  { %v8064_v12 = vadd.f32 %v8063_v34, %v8062_v57  ;;  %v6813_v34 = vld [vmem:[%s11396_s20] sm:$0xf] }
 0xaa6   :  { %v8065_v17 = vpop.f32.mrf.mxu1 }
 0xaa7   :  { %v11311_v10 = vadd.f32 %v8064_v12, %v6419_v63  ;;  %v9285_v63 = vld [vmem:[#allocation21 + $0x78] sm:$0xff]   ;;  %v9287_v17 = vld [vmem:[#allocation21 + $0x70] sm:$0xff]  }
 0xaa8   :  { %v8066_v18 = vpop.f32.mrf.mxu1  ;;  %v9286_v12 = vld [vmem:[#allocation21 + $0x38] sm:$0xff]  }
 0xaa9   :  { %v6464_v25 = vrot.slane %v11311_v10, 4  ;;  %v6470_v20 = vmul.f32 %v11311_v10, %v11311_v10  ;;  %v9289_v18 = vld [vmem:[#allocation21 + $0x68] sm:$0xff]  }
 0xaab   :  { %v6465_v22 = vadd.f32 %v6464_v25, %v11311_v10  ;;  %v6471_v8 = vrot.slane %v6470_v20, 4  ;;  %v9290_v25 = vld [vmem:[#allocation21 + $0x28] sm:$0xff]  }
 0xaad   :  { %v6466_v60 = vrot.slane %v6465_v22, 2  ;;  %v6472_v23 = vadd.f32 %v6471_v8, %v6470_v20  ;;  %v9291_v20 = vld [vmem:[#allocation21 + $0x60] sm:$0xff]   ;;  %v9294_v8 = vld [vmem:[#allocation21 + $0x18] sm:$0xff]  }
 0xaaf   :  { %v6467_v53 = vadd.f32 %v6466_v60, %v6465_v22  ;;  %v6473_v24 = vrot.slane %v6472_v23, 2  ;;  %v9292_v22 = vld [vmem:[#allocation21 + $0x20] sm:$0xff]   ;;  %v9295_v60 = vld [vmem:[#allocation21 + $0x50] sm:$0xff]  }
 0xab1   :  { %v6468_v7 = vrot.slane %v6467_v53, 1  ;;  %v6474_v9 = vadd.f32 %v6473_v24, %v6472_v23  ;;  %v9296_v23 = vld [vmem:[#allocation21 + $0x10] sm:$0xff]   ;;  %v9298_v24 = vld [vmem:[#allocation21 + $0x8] sm:$0xff]  }
 0xab3   :  { %v6469_v11 = vadd.f32 %v6468_v7, %v6467_v53  ;;  %v6475_v50 = vrot.slane %v6474_v9, 1  ;;  %v9297_v53 = vld [vmem:[#allocation21 + $0x48] sm:$0xff]   ;;  %v9299_v7 = vld [vmem:[#allocation21 + $0x40] sm:$0xff]  }
 0xab5   :  { %8523 = vmatmul.mubr.f32.vlgmr.msra.gmra.mxu0 %v6469_v11  ;;  %v6476_v15 = vadd.f32 %v6475_v50, %v6474_v9  ;;  %v9300_v9 = vld [vmem:[#allocation21] sm:$0xff]  }
 0xab6   :  { %8561 = vmatpush3.msra.mxu0 %v6660_v52  ;;  %8592 = vmatprep.mubr.msk.f32.mxu0 %vm9624_vm0, %v11496_v41 }
 0xab7   :  { %8558 = vmatmul.mubr.f32.vlgmr.msra.gmra.mxu1 %v6476_v15  ;;  %8562 = vmatprep.subr.mxu0 %v11496_v41 }
 0xab8   :  { %8563 = vmatpush3.msra.mxu0 %v6659_v32  ;;  %8596 = vmatpush3.msra.mxu1 %v6660_v52 }
 0xab9   :  { %8564 = vmatprep.subr.mxu0 %v11496_v41  ;;  %8597 = vmatprep.subr.mxu1 %v11496_v41 }
 0xaba   :  { %8598 = vmatpush3.msra.mxu1 %v6659_v32  ;;  %8627 = vmatprep.mubr.msk.f32.mxu1 %vm9624_vm0, %v11496_v41 }
 0xabb   :  { %8599 = vmatprep.subr.mxu1 %v11496_v41  ;;  %8565 = vmatpush3.msra.mxu0 %v6658_v62 }
 0xabc   :  { %8600 = vmatpush3.msra.mxu1 %v6658_v62  ;;  %8566 = vmatprep.subr.mxu0 %v11496_v41 }
 0xabd   :  { %8601 = vmatprep.subr.mxu1 %v11496_v41  ;;  %8567 = vmatpush3.msra.mxu0 %v6657_v37 }
 0xabe   :  { %8602 = vmatpush3.msra.mxu1 %v6657_v37  ;;  %8568 = vmatprep.subr.mxu0 %v11496_v41 }
 0xabf   :  { %8603 = vmatprep.subr.mxu1 %v11496_v41  ;;  %8569 = vmatpush3.msra.mxu0 %v6656_v5 }
 0xac0   :  { %8604 = vmatpush3.msra.mxu1 %v6656_v5  ;;  %8570 = vmatprep.subr.mxu0 %v11496_v41 }
 0xac1   :  { %8605 = vmatprep.subr.mxu1 %v11496_v41  ;;  %8571 = vmatpush3.msra.mxu0 %v6655_v42 }
 0xac2   :  { %8606 = vmatpush3.msra.mxu1 %v6655_v42  ;;  %8572 = vmatprep.subr.mxu0 %v11496_v41 }
 0xac3   :  { %8607 = vmatprep.subr.mxu1 %v11496_v41  ;;  %8573 = vmatpush3.msra.mxu0 %v6654_v27 }
 0xac4   :  { %8608 = vmatpush3.msra.mxu1 %v6654_v27  ;;  %8574 = vmatprep.subr.mxu0 %v11496_v41 }
 0xac5   :  { %8609 = vmatprep.subr.mxu1 %v11496_v41  ;;  %8575 = vmatpush3.msra.mxu0 %v6653_v39 }
 0xac6   :  { %8610 = vmatpush3.msra.mxu1 %v6653_v39  ;;  %8576 = vmatprep.subr.mxu0 %v11496_v41 }
 0xac7   :  { %8611 = vmatprep.subr.mxu1 %v11496_v41  ;;  %8577 = vmatpush3.msra.mxu0 %v6652_v2 }
 0xac8   :  { %8612 = vmatpush3.msra.mxu1 %v6652_v2  ;;  %8578 = vmatprep.subr.mxu0 %v11496_v41  ;;  %v7594_v2 = vld [vmem:[#allocation22] ss:$0 sm:$0xff] }
 0xac9   :  { %8613 = vmatprep.subr.mxu1 %v11496_v41  ;;  %8579 = vmatpush3.msra.mxu0 %v6651_v54 }
 0xaca   :  { %8614 = vmatpush3.msra.mxu1 %v6651_v54  ;;  %8580 = vmatprep.subr.mxu0 %v11496_v41 }
 0xacb   :  { %8615 = vmatprep.subr.mxu1 %v11496_v41  ;;  %8581 = vmatpush3.msra.mxu0 %v6650_v35 }
 0xacc   :  { %8616 = vmatpush3.msra.mxu1 %v6650_v35  ;;  %8582 = vmatprep.subr.mxu0 %v11496_v41 }
 0xacd   :  { %8617 = vmatprep.subr.mxu1 %v11496_v41  ;;  %8583 = vmatpush3.msra.mxu0 %v6649_v33 }
 0xace   :  { %8618 = vmatpush3.msra.mxu1 %v6649_v33  ;;  %8584 = vmatprep.subr.mxu0 %v11496_v41 }
 0xacf   :  { %8619 = vmatprep.subr.mxu1 %v11496_v41  ;;  %8585 = vmatpush3.msra.mxu0 %v6648_v58 }
 0xad0   :  { %8620 = vmatpush3.msra.mxu1 %v6648_v58  ;;  %8586 = vmatprep.subr.mxu0 %v11496_v41 }
 0xad1   :  { %8621 = vmatprep.subr.mxu1 %v11496_v41  ;;  %8587 = vmatpush3.msra.mxu0 %v6647_v29 }
 0xad2   :  { %8622 = vmatpush3.msra.mxu1 %v6647_v29  ;;  %8588 = vmatprep.subr.mxu0 %v11496_v41 }
 0xad3   :  { %8623 = vmatprep.subr.mxu1 %v11496_v41  ;;  %8589 = vmatpush3.msra.mxu0 %v6646_v55 }
 0xad4   :  { %8624 = vmatpush3.msra.mxu1 %v6646_v55  ;;  %8590 = vmatprep.subr.mxu0 %v11496_v41 }
 0xad5   :  { %8625 = vmatprep.subr.mxu1 %v11496_v41  ;;  %8591 = vmatpush3.msra.mxu0 %v6645_v46 }
 0xad6   :  { %8626 = vmatpush3.msra.mxu1 %v6645_v46  ;;  %8630 = vmatprep.subr.bf16.mxu0 %v11496_v41 }
 0xb75   :  { %v6559_v61 = vpop.f32.mrf.mxu0 }
 0xb76   :  { %v6633_v59 = vmul.f32 0.125, %v6559_v61 }
 0xb77   :  { %v8524_v3 = vpop.f32.mrf.mxu0  ;;  %v6629_v28 = vpop.f32.mrf.mxu1 }
 0xb78   :  { %v6635_v19 = vmul.f32 %v6633_v59, %v6633_v59  ;;  %v6634_v38 = vmul.f32 0.125, %v6629_v28 }
 0xb79   :  { %v8559_v26 = vpop.f32.mrf.mxu1 }
 0xb7a   :  { %v6636_v4 = vsub.f32 %v6634_v38, %v6635_v19 }
 0xb7c   :  { %v6637_v36 = vmax.f32 %v6636_v4, 0.0 }
 0xb7e   :  { %v6638_v40 = vadd.f32 1e-05, %v6637_v36 }
 0xb80   :  { %9305 = vrsqrt.f32 %v6638_v40 }
 0xb8d   :  { %v9306_v43 = vpop.eup %9305 }
 0xb8e   :  { %v6641_v44 = vmul.f32 %v9306_v43, %v6640_v6 }
 0xb90   :  { %8593 = vmatmul.mubr.f32.vlgmr.msra.gmra.mxu0 %v6641_v44  ;;  %v6643_v45 = vmul.f32 %v6641_v44, %v6633_v59 }
 0xb91   :  { %8632 = vmatprep.mubr.msk.bf16.mxu0 %vm9624_vm0, %v11496_v41 }
 0xb92   :  { %v6644_v0 = vsub.f32 %v6642_v13, %v6643_v45 }
 0xb94   :  { %8628 = vmatmul.mubr.f32.vlgmr.msra.gmra.mxu1 %v6644_v0 }
 0xc50   :  { %v6727_v1 = vpop.f32.mrf.mxu0 }
 0xc51   :  { %v6804_v56 = vrot.slane %v6727_v1, %v10957_v14 }
 0xc52   :  { %v8594_v47 = vpop.f32.mrf.mxu0 }
 0xc53   :  { %v6805_v49 = vmul.f32 %v6804_v56, %v11311_v10  ;;  %v9288_v10 = vld [vmem:[#allocation21 + $0x30] sm:$0xff]  }
 0xc54   :  { %v6797_v48 = vpop.f32.mrf.mxu1 }
 0xc55   :  { %v6809_v21 = vrot.slane %v6797_v48, %v10957_v14  ;;  %v7592_v14 = vld [vmem:[%s11396_s20 + $0x4] sm:$0xf] }
 0xc56   :  { %v8629_v16 = vpop.f32.mrf.mxu1 }
 0xc57   :  { %v6810_v31 = vadd.f32 %v6809_v21, %v6805_v49 }
 0xc59   :  { %v6811_v51 = vmax.f32 %v6810_v31, 0.0 }
 0xc5b   :  { %v6812_v57 = vpack.c.bf16 %v6811_v51, %v6811_v51 }
 0xc5d   :  { %v6819_v30 = vsel %vm2691_vm2, %v6812_v57, 0 }
 0xc5e   :  { %8631 = vmatpush3.bf16.msra.mxu0 %v6819_v30 }
 0xc5f   :  { %8636 = vmatprep.subr.bf16.mxu0 %v11496_v41 }
 0xc61   :  { %8633 = vmatmul.mubr.msk.bf16.vlgmr.msra.gmra.mxu0 %vm6814_vm5, %v6813_v34 }
 0xc62   :  { %8637 = vmatpush3.bf16.msra.mxu0 %v6819_v30  ;;  %8638 = vmatprep.mubr.msk.bf16.mxu0 %vm9624_vm0, %v11496_v41  ;;  %v9293_v41 = vld [vmem:[#allocation21 + $0x58] sm:$0xff]  }
 0xc63   :  { %8140 = vmatprep.subr.bf16.mxu0 %v9285_v63 }
 0xc69   :  { %8639 = vmatmul.mubr.msk.bf16.vlgmr.msra.gmra.mxu0 %vm6814_vm5, %v7592_v14 }
 0xc6a   :  { %8141 = vmatpush3.bf16.msra.mxu0 %v9286_v12 }
 0xc6b   :  { %8142 = vmatprep.subr.bf16.mxu0 %v9287_v17 }
 0xc6e   :  { %8143 = vmatpush3.bf16.msra.mxu0 %v9288_v10 }
 0xc6f   :  { %8144 = vmatprep.subr.bf16.mxu0 %v9289_v18 }
 0xc72   :  { %8145 = vmatpush3.bf16.msra.mxu0 %v9290_v25 }
 0xc73   :  { %8146 = vmatprep.subr.bf16.mxu0 %v9291_v20 }
 0xc76   :  { %8147 = vmatpush3.bf16.msra.mxu0 %v9292_v22 }
 0xc77   :  { %8148 = vmatprep.subr.bf16.mxu0 %v9293_v41 }
 0xc7a   :  { %8149 = vmatpush3.bf16.msra.mxu0 %v9294_v8 }
 0xc7b   :  { %8150 = vmatprep.subr.bf16.mxu0 %v9295_v60 }
 0xc7e   :  { %8151 = vmatpush3.bf16.msra.mxu0 %v9296_v23 }
 0xc7f   :  { %8152 = vmatprep.subr.bf16.mxu0 %v9297_v53 }
 0xc82   :  { %8153 = vmatpush3.bf16.msra.mxu0 %v9298_v24 }
 0xc83   :  { %8154 = vmatprep.subr.bf16.mxu0 %v9299_v7 }
 0xc86   :  { %8155 = vmatpush3.bf16.msra.mxu0 %v9300_v9 }
 0xd21   :  { %v6855_v11 = vpop.f32.mrf.mxu0 }
 0xd22   :  { %v6906_v37 = vpack.c.bf16 %v6855_v11, %v6855_v11 }
 0xd23   :  { %v8634_v50 = vpop.f32.mrf.mxu0 }
 0xd25   :  { %v6858_v52 = vpop.f32.mrf.mxu0 }
 0xd27   :  { %v8635_v15 = vpop.f32.mrf.mxu0 }
 0xd29   :  { %v6900_v32 = vpop.f32.mrf.mxu0 }
 0xd2a   :  { %v6907_v62 = vpack.c.bf16 %v6900_v32, %v6900_v32 }
 0xd2b   :  { %v8640_v5 = vpop.f32.mrf.mxu0 }
 0xd2c   :  { %7075 = vmatprep.mubr.bf16.mxu0 %v6907_v62 }
 0xd2d   :  { %v6903_v42 = vpop.f32.mrf.mxu0  ;;  %7076 = vmatmul.mubr.bf16.vlgmr.msra.gmra.mxu0 %v6906_v37 }
 0xd2f   :  { %v8641_v27 = vpop.f32.mrf.mxu0 }
 0xded   :  { %v8156_v39 = vpop.f32.mrf.mxu0 }
 0xdef   :  { %v8157_v54 = vpop.f32.mrf.mxu0 }
 0xdf0   :  { %v8158_v35 = vadd.f32 %v8157_v54, %v8156_v39 }
 0xdf1   :  { %v8159_v33 = vpop.f32.mrf.mxu0 }
 0xdf2   :  { %v7078_v58 = vadd.f32 %v8158_v35, %v7594_v2 }
 0xdf3   :  { %v8160_v29 = vpop.f32.mrf.mxu0 }
 0xdf4   :  { %7083 = vst [vmem:[%s11398_s22] sm:$0xff] %v7078_v58 }
 0xdf5   :  { %7088 = vsyncpa [#allocation3], 1 }
 0xdf6   :  { %7089 = vsyncpa [#allocation5], 1 }
 0xdf7   :  { %7090 = vsyncpa [#allocation8], 1 }
 0xdf8   :  { %7091 = vsyncpa [#allocation11], 1 }
 0xdf9   :  { %7092 = vsyncpa [#allocation14], 1 }
 0xdfa   :  { %7093 = vsyncpa [#allocation17], 1 }
 0xdfb   :  { %7094 = vsyncpa [#allocation20], 1 }
 0xdfc   :  { %7095 = vsyncpa [#allocation23], 1 }

</bundles_post_ra>
